<compile_context>
chip_gen: v6e
topology: v6e:2x2x1
jax: 0.10.0
libtpu: 0.0.40
codegen_flags: <defaults>
</compile_context>

<pallas_src>
import numpy as np
import jax
import jax.numpy as jnp
from jax import lax
from jax.experimental import pallas as pl
from jax.experimental.pallas import tpu as pltpu

K = 5     # conv kernel size
PAD = 2   # conv padding


# ------------------------------ Pallas kernel -------------------------------

def fused_forward_kernel(x_ref, w1e_ref, w1o_ref, b1_ref,
                         w2e_ref, w2o_ref, b2_ref,
                         wf1_ref, bf1_ref, wf2_ref, bf2_ref,
                         out_ref):
    """conv1 -> relu -> pool -> conv2 -> relu -> pool -> fc1 -> relu -> fc2.

    All convolution / pooling structure lives in the pre-folded weights, so the
    body is just matmuls (MXU) + bias/relu/max (VPU).  No scratch, no gathers.
    """
    f32 = jnp.float32
    cdt = w1e_ref.dtype

    x = x_ref[...]                                              # (TB, 48)

    # conv1 (+bias) at even/odd output positions, relu, maxpool(2,2):
    # pool(relu(y)) over a pair == max(max(y_even, y_odd), 0).
    ye = jnp.dot(x, w1e_ref[...], preferred_element_type=f32) + b1_ref[...]
    yo = jnp.dot(x, w1o_ref[...], preferred_element_type=f32) + b1_ref[...]
    h1 = jnp.maximum(jnp.maximum(ye, yo), 0.0).astype(cdt)      # (TB, 24*32)

    # conv2 (+bias) even/odd, relu, maxpool(2,2) -- banded weight over h1 lanes.
    ze = jnp.dot(h1, w2e_ref[...], preferred_element_type=f32) + b2_ref[...]
    zo = jnp.dot(h1, w2o_ref[...], preferred_element_type=f32) + b2_ref[...]
    h2 = jnp.maximum(jnp.maximum(ze, zo), 0.0).astype(cdt)      # (TB, 12*64)

    # fc1 + relu (NCW flatten order folded into wf1 rows on the host).
    h3 = jnp.maximum(
        jnp.dot(h2, wf1_ref[...], preferred_element_type=f32) + bf1_ref[...],
        0.0).astype(cdt)                                        # (TB, 128)

    # fc2 padded to 128 output lanes (lane-dense store); sliced to 5 outside.
    out_ref[...] = (jnp.dot(h3, wf2_ref[...], preferred_element_type=f32)
                    + bf2_ref[...])                             # (TB, 128)


# ----------------------------- host-side glue -------------------------------

def _round_up(n, m):
    return ((n + m - 1) // m) * m


def prepare_params(params, compute_dtype=jnp.bfloat16):
    """One-time re-layout of PyTorch-shaped weights into kernel-ready form.

    conv1/conv2 become banded (Toeplitz) matrices whose even/odd output-column
    splits absorb the maxpools; fc1's rows absorb the NCW flatten permutation;
    fc2 is padded to 128 output lanes.  Matmul weights are cast to
    `compute_dtype` (bf16 by default); biases stay f32 (f32 accumulation).
    """
    (w1, b1, w2, b2, wf1, bf1, wf2, bf2) = [np.asarray(p, np.float32)
                                            for p in params]
    C1, _, Kw = w1.shape          # 32, 1, 5
    C2 = w2.shape[0]              # 64
    H1, FEAT = wf1.shape          # 128, 768
    NC = wf2.shape[0]             # 5
    T3 = FEAT // C2               # 12
    T1 = 2 * T3                   # 24
    L = 2 * T1                    # 48
    NH = 128                      # lane-dense padded fc2 width

    # conv1 as a banded matrix over the raw length-48 signal.  Zero padding of
    # the conv is realized by omitting out-of-range rows.  Column = t*C1 + c.
    W1 = np.zeros((L, L * C1), np.float32)
    for t in range(L):
        for k in range(Kw):
            tau = t + k - PAD
            if 0 <= tau < L:
                W1[tau, t * C1:(t + 1) * C1] = w1[:, 0, k]
    W1 = W1.reshape(L, L, C1)
    W1e = W1[:, 0::2, :].reshape(L, T1 * C1)        # even output positions
    W1o = W1[:, 1::2, :].reshape(L, T1 * C1)        # odd  output positions
    b1t = np.tile(b1, T1).reshape(1, T1 * C1)       # lane t1*32 + c -> b1[c]

    # conv2 as a banded matrix over h1's (t1*C1 + c1) lanes; column = t2*C2+c2.
    W2 = np.zeros((T1 * C1, T1 * C2), np.float32)
    for t2 in range(T1):
        for k in range(Kw):
            t1 = t2 + k - PAD
            if 0 <= t1 < T1:
                W2[t1 * C1:(t1 + 1) * C1, t2 * C2:(t2 + 1) * C2] = w2[:, :, k].T
    W2 = W2.reshape(T1 * C1, T1, C2)
    W2e = W2[:, 0::2, :].reshape(T1 * C1, T3 * C2)
    W2o = W2[:, 1::2, :].reshape(T1 * C1, T3 * C2)
    b2t = np.tile(b2, T3).reshape(1, T3 * C2)       # lane t3*64 + c2 -> b2[c2]

    # fc1: fold PyTorch's NCW flatten (feature = c2*12 + t3) into the weight
    # rows so the kernel's (t3*64 + c2) lane order feeds it directly.
    Wf1f = wf1.reshape(H1, C2, T3).transpose(2, 1, 0).reshape(FEAT, H1)
    bf1r = bf1.reshape(1, H1)

    # fc2 padded to 128 output lanes (unmasked lane-dense stores).
    Wf2p = np.zeros((H1, NH), np.float32)
    Wf2p[:, :NC] = wf2.T
    bf2p = np.zeros((1, NH), np.float32)
    bf2p[0, :NC] = bf2

    cdt = compute_dtype
    return (jnp.asarray(W1e, cdt), jnp.asarray(W1o, cdt), jnp.asarray(b1t),
            jnp.asarray(W2e, cdt), jnp.asarray(W2o, cdt), jnp.asarray(b2t),
            jnp.asarray(Wf1f, cdt), jnp.asarray(bf1r),
            jnp.asarray(Wf2p, cdt), jnp.asarray(bf2p))


def conv_net_forward(x, prepped, *, tb_target=256):
    """x: (B, 1, L) with L = 48 (NCW, like PyTorch). Returns (B, 5) logits."""
    B = x.shape[0]
    L = x.shape[-1]
    x2 = x.reshape(B, L)
    cdt = prepped[0].dtype
    assert prepped[0].shape[0] == L, "fc1=768 implies input length 48"

    # Batch tiling: big tiles for MXU row utilization and amortized per-step
    # overhead, but keep the grid >= 2 steps when B >= 16 so the "parallel"
    # batch axis can split across v7x's two TensorCores.  Pad ragged batches.
    TB = int(min(tb_target, max(8, _round_up((B + 1) // 2, 8))))
    Bp = _round_up(B, TB)
    xk = jnp.pad(x2, ((0, Bp - B), (0, 0))).astype(cdt)

    vmem = pl.BlockSpec(memory_space=pltpu.MemorySpace.VMEM)  # whole array,
    # resident in VMEM once (grid-invariant, effectively single-buffered).
    out = pl.pallas_call(
        fused_forward_kernel,
        out_shape=jax.ShapeDtypeStruct((Bp, 128), jnp.float32),
        grid=(Bp // TB,),
        in_specs=[pl.BlockSpec((TB, L), lambda i: (i, 0))] + [vmem] * 10,
        out_specs=pl.BlockSpec((TB, 128), lambda i: (i, 0)),
        compiler_params=pltpu.CompilerParams(
            dimension_semantics=("parallel",),
            vmem_limit_bytes=48 * 1024 * 1024),   # > v5e's 16 MiB default
    )(xk, *prepped)
    return out[:B, :5]


# ---------------------------- pure-JAX reference ----------------------------

def reference_forward(x, params):
    (w1, b1, w2, b2, wf1, bf1, wf2, bf2) = params
    dn = ('NCH', 'OIH', 'NCH')
    y = lax.conv_general_dilated(x, w1, (1,), [(PAD, PAD)], dimension_numbers=dn)
    y = jax.nn.relu(y + b1[None, :, None])
    y = y.reshape(y.shape[0], y.shape[1], -1, 2).max(axis=-1)
    y = lax.conv_general_dilated(y, w2, (1,), [(PAD, PAD)], dimension_numbers=dn)
    y = jax.nn.relu(y + b2[None, :, None])
    y = y.reshape(y.shape[0], y.shape[1], -1, 2).max(axis=-1)
    y = y.reshape(y.shape[0], -1)
    y = jax.nn.relu(y @ wf1.T + bf1)
    return y @ wf2.T + bf2


# ----------------------------------- main ------------------------------------

if __name__ == "__main__":
    key = jax.random.PRNGKey(0)
    ks = jax.random.split(key, 9)
    L = 48   # fc1 expects 768 = 64 * (L/4) -> L = 48

    w1 = jax.random.normal(ks[0], (32, 1, 5), jnp.float32) / np.sqrt(5.0)
    b1 = jax.random.normal(ks[1], (32,), jnp.float32) * 0.1
    w2 = jax.random.normal(ks[2], (64, 32, 5), jnp.float32) / np.sqrt(160.0)
    b2 = jax.random.normal(ks[3], (64,), jnp.float32) * 0.1
    wf1 = jax.random.normal(ks[4], (128, 768), jnp.float32) / np.sqrt(768.0)
    bf1 = jax.random.normal(ks[5], (128,), jnp.float32) * 0.1
    wf2 = jax.random.normal(ks[6], (5, 128), jnp.float32) / np.sqrt(128.0)
    bf2 = jax.random.normal(ks[7], (5,), jnp.float32) * 0.1
    params = (w1, b1, w2, b2, wf1, bf1, wf2, bf2)

    prepped = prepare_params(params)        # one-time weight re-layout (bf16)
    fwd = jax.jit(conv_net_forward)

    # B=16 exercises the 2-step grid; B=6 exercises batch padding + grid of 1.
    for B in (16, 6):
        x = jax.random.normal(ks[8], (B, 1, L), jnp.float32)
        out = jax.block_until_ready(fwd(x, prepped))
        ref = jax.block_until_ready(reference_forward(x, params))
        # Tolerance covers bf16 matmul operands (f32 accumulation) in the
        # kernel vs the default-precision f32 reference; structural errors
        # (wrong band / permutation) would be O(1), far above this.
        np.testing.assert_allclose(np.asarray(out), np.asarray(ref),
                                   rtol=3e-2, atol=3e-2)
    print("KERNEL_OK")
</pallas_src>

<mosaic_0001>
module attributes {stable_mosaic.version = 11 : i64} {
  func.func @fused_forward_kernel(%arg0: i32, %arg1: memref<8x48xbf16, #tpu.memory_space<vmem>>, %arg2: memref<48x768xbf16, #tpu.memory_space<vmem>>, %arg3: memref<48x768xbf16, #tpu.memory_space<vmem>>, %arg4: memref<1x768xf32, #tpu.memory_space<vmem>>, %arg5: memref<768x768xbf16, #tpu.memory_space<vmem>>, %arg6: memref<768x768xbf16, #tpu.memory_space<vmem>>, %arg7: memref<1x768xf32, #tpu.memory_space<vmem>>, %arg8: memref<768x128xbf16, #tpu.memory_space<vmem>>, %arg9: memref<1x128xf32, #tpu.memory_space<vmem>>, %arg10: memref<128x128xbf16, #tpu.memory_space<vmem>>, %arg11: memref<1x128xf32, #tpu.memory_space<vmem>>, %arg12: memref<8x128xf32, #tpu.memory_space<vmem>>) attributes {dimension_semantics = [#tpu.dimension_semantics<parallel>], iteration_bounds = array<i64: 2>, scalar_prefetch = 0 : i64, scratch_operands = 0 : i64, tpu.core_type = #tpu.core_type<tc>, window_params = [{transform_indices = @transform_0, window_bounds = array<i64: 8, 48>}, {pipeline_mode = #tpu.pipeline_mode<synchronous>, transform_indices = @transform_1, window_bounds = array<i64: 48, 768>}, {pipeline_mode = #tpu.pipeline_mode<synchronous>, transform_indices = @transform_2, window_bounds = array<i64: 48, 768>}, {pipeline_mode = #tpu.pipeline_mode<synchronous>, transform_indices = @transform_3, window_bounds = array<i64: 1, 768>}, {pipeline_mode = #tpu.pipeline_mode<synchronous>, transform_indices = @transform_4, window_bounds = array<i64: 768, 768>}, {pipeline_mode = #tpu.pipeline_mode<synchronous>, transform_indices = @transform_5, window_bounds = array<i64: 768, 768>}, {pipeline_mode = #tpu.pipeline_mode<synchronous>, transform_indices = @transform_6, window_bounds = array<i64: 1, 768>}, {pipeline_mode = #tpu.pipeline_mode<synchronous>, transform_indices = @transform_7, window_bounds = array<i64: 768, 128>}, {pipeline_mode = #tpu.pipeline_mode<synchronous>, transform_indices = @transform_8, window_bounds = array<i64: 1, 128>}, {pipeline_mode = #tpu.pipeline_mode<synchronous>, transform_indices = @transform_9, window_bounds = array<i64: 128, 128>}, {pipeline_mode = #tpu.pipeline_mode<synchronous>, transform_indices = @transform_10, window_bounds = array<i64: 1, 128>}, {transform_indices = @transform_11, window_bounds = array<i64: 8, 128>}]} {
    %c0 = arith.constant 0 : index
    %c0_0 = arith.constant 0 : index
    %0 = vector.load %arg1[%c0, %c0_0] : memref<8x48xbf16, #tpu.memory_space<vmem>>, vector<8x48xbf16>
    %c0_1 = arith.constant 0 : index
    %c0_2 = arith.constant 0 : index
    %1 = vector.load %arg2[%c0_1, %c0_2] : memref<48x768xbf16, #tpu.memory_space<vmem>>, vector<48x768xbf16>
    %cst = arith.constant dense<0.000000e+00> : vector<8x768xf32>
    %2 = tpu.matmul %0, %1, %cst {dimension_numbers = #tpu.dot_dimension_numbers<[1], [0], [0], [1], [0, 0, 1, 1], [], []>} : vector<8x48xbf16>, vector<48x768xbf16>, vector<8x768xf32> -> vector<8x768xf32>
    %c0_3 = arith.constant 0 : index
    %c0_4 = arith.constant 0 : index
    %3 = vector.load %arg4[%c0_3, %c0_4] : memref<1x768xf32, #tpu.memory_space<vmem>>, vector<1x768xf32>
    %4 = vector.broadcast %3 : vector<1x768xf32> to vector<8x768xf32>
    %5 = arith.addf %2, %4 : vector<8x768xf32>
    %c0_5 = arith.constant 0 : index
    %c0_6 = arith.constant 0 : index
    %6 = vector.load %arg3[%c0_5, %c0_6] : memref<48x768xbf16, #tpu.memory_space<vmem>>, vector<48x768xbf16>
    %cst_7 = arith.constant dense<0.000000e+00> : vector<8x768xf32>
    %7 = tpu.matmul %0, %6, %cst_7 {dimension_numbers = #tpu.dot_dimension_numbers<[1], [0], [0], [1], [0, 0, 1, 1], [], []>} : vector<8x48xbf16>, vector<48x768xbf16>, vector<8x768xf32> -> vector<8x768xf32>
    %c0_8 = arith.constant 0 : index
    %c0_9 = arith.constant 0 : index
    %8 = vector.load %arg4[%c0_8, %c0_9] : memref<1x768xf32, #tpu.memory_space<vmem>>, vector<1x768xf32>
    %9 = vector.broadcast %8 : vector<1x768xf32> to vector<8x768xf32>
    %10 = arith.addf %7, %9 : vector<8x768xf32>
    %11 = arith.maximumf %5, %10 : vector<8x768xf32>
    %cst_10 = arith.constant 0.000000e+00 : f32
    %12 = vector.broadcast %cst_10 : f32 to vector<8x768xf32>
    %13 = arith.maximumf %11, %12 : vector<8x768xf32>
    %14 = arith.truncf %13 : vector<8x768xf32> to vector<8x768xbf16>
    %c0_11 = arith.constant 0 : index
    %c0_12 = arith.constant 0 : index
    %15 = vector.load %arg5[%c0_11, %c0_12] : memref<768x768xbf16, #tpu.memory_space<vmem>>, vector<768x768xbf16>
    %cst_13 = arith.constant dense<0.000000e+00> : vector<8x768xf32>
    %16 = tpu.matmul %14, %15, %cst_13 {dimension_numbers = #tpu.dot_dimension_numbers<[1], [0], [0], [1], [0, 0, 1, 1], [], []>} : vector<8x768xbf16>, vector<768x768xbf16>, vector<8x768xf32> -> vector<8x768xf32>
    %c0_14 = arith.constant 0 : index
    %c0_15 = arith.constant 0 : index
    %17 = vector.load %arg7[%c0_14, %c0_15] : memref<1x768xf32, #tpu.memory_space<vmem>>, vector<1x768xf32>
    %18 = vector.broadcast %17 : vector<1x768xf32> to vector<8x768xf32>
    %19 = arith.addf %16, %18 : vector<8x768xf32>
    %c0_16 = arith.constant 0 : index
    %c0_17 = arith.constant 0 : index
    %20 = vector.load %arg6[%c0_16, %c0_17] : memref<768x768xbf16, #tpu.memory_space<vmem>>, vector<768x768xbf16>
    %cst_18 = arith.constant dense<0.000000e+00> : vector<8x768xf32>
    %21 = tpu.matmul %14, %20, %cst_18 {dimension_numbers = #tpu.dot_dimension_numbers<[1], [0], [0], [1], [0, 0, 1, 1], [], []>} : vector<8x768xbf16>, vector<768x768xbf16>, vector<8x768xf32> -> vector<8x768xf32>
    %c0_19 = arith.constant 0 : index
    %c0_20 = arith.constant 0 : index
    %22 = vector.load %arg7[%c0_19, %c0_20] : memref<1x768xf32, #tpu.memory_space<vmem>>, vector<1x768xf32>
    %23 = vector.broadcast %22 : vector<1x768xf32> to vector<8x768xf32>
    %24 = arith.addf %21, %23 : vector<8x768xf32>
    %25 = arith.maximumf %19, %24 : vector<8x768xf32>
    %cst_21 = arith.constant 0.000000e+00 : f32
    %26 = vector.broadcast %cst_21 : f32 to vector<8x768xf32>
    %27 = arith.maximumf %25, %26 : vector<8x768xf32>
    %28 = arith.truncf %27 : vector<8x768xf32> to vector<8x768xbf16>
    %c0_22 = arith.constant 0 : index
    %c0_23 = arith.constant 0 : index
    %29 = vector.load %arg8[%c0_22, %c0_23] : memref<768x128xbf16, #tpu.memory_space<vmem>>, vector<768x128xbf16>
    %cst_24 = arith.constant dense<0.000000e+00> : vector<8x128xf32>
    %30 = tpu.matmul %28, %29, %cst_24 {dimension_numbers = #tpu.dot_dimension_numbers<[1], [0], [0], [1], [0, 0, 1, 1], [], []>} : vector<8x768xbf16>, vector<768x128xbf16>, vector<8x128xf32> -> vector<8x128xf32>
    %c0_25 = arith.constant 0 : index
    %c0_26 = arith.constant 0 : index
    %31 = vector.load %arg9[%c0_25, %c0_26] : memref<1x128xf32, #tpu.memory_space<vmem>>, vector<1x128xf32>
    %32 = vector.broadcast %31 : vector<1x128xf32> to vector<8x128xf32>
    %33 = arith.addf %30, %32 : vector<8x128xf32>
    %cst_27 = arith.constant 0.000000e+00 : f32
    %34 = vector.broadcast %cst_27 : f32 to vector<8x128xf32>
    %35 = arith.maximumf %33, %34 : vector<8x128xf32>
    %36 = arith.truncf %35 : vector<8x128xf32> to vector<8x128xbf16>
    %c0_28 = arith.constant 0 : index
    %c0_29 = arith.constant 0 : index
    %37 = vector.load %arg10[%c0_28, %c0_29] : memref<128x128xbf16, #tpu.memory_space<vmem>>, vector<128x128xbf16>
    %cst_30 = arith.constant dense<0.000000e+00> : vector<8x128xf32>
    %38 = tpu.matmul %36, %37, %cst_30 {dimension_numbers = #tpu.dot_dimension_numbers<[1], [0], [0], [1], [0, 0, 1, 1], [], []>} : vector<8x128xbf16>, vector<128x128xbf16>, vector<8x128xf32> -> vector<8x128xf32>
    %c0_31 = arith.constant 0 : index
    %c0_32 = arith.constant 0 : index
    %39 = vector.load %arg11[%c0_31, %c0_32] : memref<1x128xf32, #tpu.memory_space<vmem>>, vector<1x128xf32>
    %40 = vector.broadcast %39 : vector<1x128xf32> to vector<8x128xf32>
    %41 = arith.addf %38, %40 : vector<8x128xf32>
    %c0_33 = arith.constant 0 : index
    %c0_34 = arith.constant 0 : index
    %42 = vector.load %arg12[%c0_33, %c0_34] : memref<8x128xf32, #tpu.memory_space<vmem>>, vector<8x128xf32>
    tpu.vector_store %arg12[%c0_33, %c0_34], %41 {strides = array<i32>} : memref<8x128xf32, #tpu.memory_space<vmem>>, vector<8x128xf32>,
    return
  }
  func.func @transform_0(%arg0: i32) -> (i32, i32) {
    %c0_i32 = arith.constant 0 : i32
    %c0_i32_0 = arith.constant 0 : i32
    return %arg0, %c0_i32 : i32, i32
  }
  func.func @transform_1(%arg0: i32) -> (i32, i32) {
    %c0_i32 = arith.constant 0 : i32
    %c0_i32_0 = arith.constant 0 : i32
    %c0_i32_1 = arith.constant 0 : i32
    return %c0_i32, %c0_i32_0 : i32, i32
  }
  func.func @transform_2(%arg0: i32) -> (i32, i32) {
    %c0_i32 = arith.constant 0 : i32
    %c0_i32_0 = arith.constant 0 : i32
    %c0_i32_1 = arith.constant 0 : i32
    return %c0_i32, %c0_i32_0 : i32, i32
  }
  func.func @transform_3(%arg0: i32) -> (i32, i32) {
    %c0_i32 = arith.constant 0 : i32
    %c0_i32_0 = arith.constant 0 : i32
    %c0_i32_1 = arith.constant 0 : i32
    return %c0_i32, %c0_i32_0 : i32, i32
  }
  func.func @transform_4(%arg0: i32) -> (i32, i32) {
    %c0_i32 = arith.constant 0 : i32
    %c0_i32_0 = arith.constant 0 : i32
    %c0_i32_1 = arith.constant 0 : i32
    return %c0_i32, %c0_i32_0 : i32, i32
  }
  func.func @transform_5(%arg0: i32) -> (i32, i32) {
    %c0_i32 = arith.constant 0 : i32
    %c0_i32_0 = arith.constant 0 : i32
    %c0_i32_1 = arith.constant 0 : i32
    return %c0_i32, %c0_i32_0 : i32, i32
  }
  func.func @transform_6(%arg0: i32) -> (i32, i32) {
    %c0_i32 = arith.constant 0 : i32
    %c0_i32_0 = arith.constant 0 : i32
    %c0_i32_1 = arith.constant 0 : i32
    return %c0_i32, %c0_i32_0 : i32, i32
  }
  func.func @transform_7(%arg0: i32) -> (i32, i32) {
    %c0_i32 = arith.constant 0 : i32
    %c0_i32_0 = arith.constant 0 : i32
    %c0_i32_1 = arith.constant 0 : i32
    return %c0_i32, %c0_i32_0 : i32, i32
  }
  func.func @transform_8(%arg0: i32) -> (i32, i32) {
    %c0_i32 = arith.constant 0 : i32
    %c0_i32_0 = arith.constant 0 : i32
    %c0_i32_1 = arith.constant 0 : i32
    return %c0_i32, %c0_i32_0 : i32, i32
  }
  func.func @transform_9(%arg0: i32) -> (i32, i32) {
    %c0_i32 = arith.constant 0 : i32
    %c0_i32_0 = arith.constant 0 : i32
    %c0_i32_1 = arith.constant 0 : i32
    return %c0_i32, %c0_i32_0 : i32, i32
  }
  func.func @transform_10(%arg0: i32) -> (i32, i32) {
    %c0_i32 = arith.constant 0 : i32
    %c0_i32_0 = arith.constant 0 : i32
    %c0_i32_1 = arith.constant 0 : i32
    return %c0_i32, %c0_i32_0 : i32, i32
  }
  func.func @transform_11(%arg0: i32) -> (i32, i32) {
    %c0_i32 = arith.constant 0 : i32
    %c0_i32_0 = arith.constant 0 : i32
    return %arg0, %c0_i32 : i32, i32
  }
}

</mosaic_0001>

<bundles_post_ra>
// kernel: conv_net_forward.1
= control target key start
LH: loop header
LB: loop body
LE: loop exit
PB: predicated region body
PF: predicated region fallthrough
CT: control target
= control target key end

     0   :  { %16 = vsyncpa [#allocation3], 0  ;;  %s8669_s0 = inlined_call_operand.vmem [shape: bf16[16,48], index: 0, kind: input, shape index: {}]   ;;  %s8670_s1 = inlined_call_operand.hbm [shape: bf16[48,768], index: 1, kind: input, shape index: {}]   ;;  %s8671_s2 = inlined_call_operand.hbm [shape: bf16[48,768], index: 2, kind: input, shape index: {}]   ;;  %s8672_s3 = inlined_call_operand.hbm [shape: f32[1,768], index: 3, kind: input, shape index: {}]   ;;  %s8673_s4 = inlined_call_operand.hbm [shape: bf16[768,768], index: 4, kind: input, shape index: {}]   ;;  %s8674_s5 = inlined_call_operand.hbm [shape: bf16[768,768], index: 5, kind: input, shape index: {}]   ;;  %s8675_s6 = inlined_call_operand.hbm [shape: f32[1,768], index: 6, kind: input, shape index: {}]   ;;  %s8676_s7 = inlined_call_operand.hbm [shape: bf16[768,128], index: 7, kind: input, shape index: {}]   ;;  %s8677_s8 = inlined_call_operand.hbm [shape: f32[1,128], index: 8, kind: input, shape index: {}]   ;;  %s8678_s9 = inlined_call_operand.hbm [shape: bf16[128,128], index: 9, kind: input, shape index: {}]   ;;  %s8679_s10 = inlined_call_operand.hbm [shape: f32[1,128], index: 10, kind: input, shape index: {}]   ;;  %s8680_s11 = inlined_call_operand.vmem [shape: f32[16,128], index: 11, kind: output, shape index: {}]  }
   0x1   :  { %17 = vsyncpa [#allocation5], 0 }
   0x2   :  { %18 = vsyncpa [#allocation8], 0 }
   0x3   :  { %19 = vsyncpa [#allocation11], 0 }
   0x4   :  { %20 = vsyncpa [#allocation14], 0 }
   0x5   :  { %21 = vsyncpa [#allocation17], 0  ;;  %s8317_s17 = smov 0  }
   0x6 LB: > { %s8323_s18 = sadd.s32 4294967295, %s8238_s17   ;;  %p6060_p0 = scmp.ge.s32.totalorder %s8238_s17, 1  ;;  %s8238_s17 = sphi %s8317_s17, %s27_s17  }
   0x7   : > { %p294_p1 = scmp.lt.s32.totalorder %s8238_s17, 3  ;;  %p8681_p2 = scmp.eq.s32.totalorder %s8323_s18, 0 }
   0x8   : > { %s8240_s20 = smov [#allocation4]   ;;  %s8241_s22 = smov [#allocation7]  }
   0x9   : > { %p8328_p3 = pnand %p6060_p0, %p294_p1  ;;  %s319_s21 = sshll.u32 %s8240_s20, 4  ;;  %s320_s21 = int_to_ptr.vmem [resolvable:$true] %s319_s21 }
   0xa   : > { %s343_s23 = sshll.u32 %s8241_s22, 4  ;;  %s8242_s25 = smov [#allocation10]   ;;  %s8334_s23 = int_to_ptr.vmem [resolvable:$true] %s343_s23 }
   0xb   : > { %p6898_p4 = pneg %p8328_p3  ;;  %s370_s26 = sshll.u32 %s8242_s25, 4  ;;  %s8342_s26 = int_to_ptr.vmem [resolvable:$true] %s370_s26 }
   0xc   : > { %s8243_s27 = smov [#allocation13]   ;;  %s7959_s30 = scalar_lea.vmem %s320_s21, 2304 }
   0xd   : > { %p8338_p5 = pnand %p8681_p2, %p6898_p4  ;;  %s8344_s28 = sshll.u32 %s8243_s27, 4  ;;  %s395_s28 = int_to_ptr.vmem [resolvable:$true] %s8344_s28 }
   0xe   : > { %p7960_p7 = scmp.ne.s32.totalorder %s320_s21, %s7959_s30  ;;  %p7967_p10 = scmp.lt.s32.totalorder %s320_s21, %s320_s21 }
   0xf   : > { %p8348_p6 = pneg %p8338_p5  ;;  %p7968_p11 = scmp.lt.s32.totalorder %s7959_s30, %s7959_s30 }
  0x11   : > { %p7962_p8 = pnand %p7960_p7, %p8348_p6  ;;  %p7969_p12 = por %p7968_p11, %p7967_p10 }
  0x13   : > { %p7963_p9 = pneg %p7962_p8 }
  0x15   : > { %p7970_p13 = pnand %p7969_p12, %p7963_p9 }
  0x17   : > { %7973 = shalt.err (!%p7970_p13)
}
  0x18   : > { %s8244_s12 = smov 384   ;;  %s8245_s13 = smov 24  }
  0x19   : > { %6904 = dma.hbm_to_vmem [thread:$0]  (!%p8338_p5), %s8671_s2, 2304, %s320_s21, [#allocation5], %s8244_s12, %s8244_s12, %s8245_s13  }
  0x1a   : > { %s7985_s16 = scalar_lea.vmem %s8334_s23, 36864  ;;  %p7993_p7 = scmp.lt.s32.totalorder %s8334_s23, %s8334_s23 }
  0x1b   : > { %p7986_p0 = scmp.ne.s32.totalorder %s8334_s23, %s7985_s16  ;;  %p7994_p8 = scmp.lt.s32.totalorder %s7985_s16, %s7985_s16 }
  0x1d   : > { %p7988_p1 = pnand %p7986_p0, %p8348_p6  ;;  %p7995_p9 = por %p7994_p8, %p7993_p7 }
  0x1f   : > { %p7989_p4 = pneg %p7988_p1 }
  0x21   : > { %p7996_p10 = pnand %p7995_p9, %p7989_p4 }
  0x23   : > { %7999 = shalt.err (!%p7996_p10)
}
  0x24   : > { %6910 = dma.hbm_to_vmem [thread:$0]  (!%p8338_p5), %s8673_s4, 36864, %s8334_s23, [#allocation8], %s8244_s12, %s8244_s12, %s8245_s13  }
  0x25   : > { %s8011_s21 = scalar_lea.vmem %s8342_s26, 96  ;;  %p8019_p0 = scmp.lt.s32.totalorder %s8342_s26, %s8342_s26 }
  0x26   : > { %p8012_p11 = scmp.ne.s32.totalorder %s8342_s26, %s8011_s21  ;;  %p8020_p1 = scmp.lt.s32.totalorder %s8011_s21, %s8011_s21 }
  0x28   : > { %p8014_p12 = pnand %p8012_p11, %p8348_p6  ;;  %p8021_p4 = por %p8020_p1, %p8019_p0 }
  0x2a   : > { %p8015_p13 = pneg %p8014_p12 }
  0x2c   : > { %p8022_p7 = pnand %p8021_p4, %p8015_p13 }
  0x2e   : > { %8025 = shalt.err (!%p8022_p7)
}
  0x2f   : > { %6916 = dma.hbm_to_vmem [thread:$0]  (!%p8338_p5), %s8675_s6, 96, %s8342_s26, [#allocation11]  }
  0x30   : > { %s8037_s23 = scalar_lea.vmem %s395_s28, 16  ;;  %s8044_s30 = scalar_lea.vmem %s395_s28, 32 }
  0x31   : > { %p8038_p8 = scmp.ne.s32.totalorder %s395_s28, %s8037_s23  ;;  %p8045_p11 = scmp.lt.s32.totalorder %s395_s28, %s395_s28 }
  0x32   : > { %p8046_p12 = scmp.lt.s32.totalorder %s8044_s30, %s8037_s23 }
  0x33   : > { %p8040_p9 = pnand %p8038_p8, %p8348_p6 }
  0x34   : > { %p8047_p13 = por %p8046_p12, %p8045_p11 }
  0x35   : > { %p8041_p10 = pneg %p8040_p9 }
  0x37   : > { %p8048_p0 = pnand %p8047_p13, %p8041_p10 }
  0x39   : > { %8051 = shalt.err (!%p8048_p0)
}
  0x3a   : > { %6922 = dma.hbm_to_vmem [thread:$0]  (!%p8338_p5), %s8677_s8, 16, %s395_s28, [#allocation14]  }
  0x3b   : > { %s8246_s26 = smov [#allocation2]   ;;  %s8247_s20 = smov [#allocation6]  }
  0x3c   : > { %s306_s16 = sshll.u32 %s8246_s26, 4  ;;  %s333_s22 = sshll.u32 %s8247_s20, 4  ;;  %s307_s16 = int_to_ptr.vmem [resolvable:$true] %s306_s16  ;;  %s334_s22 = int_to_ptr.vmem [resolvable:$true] %s333_s22 }
  0x3d   : > { %s8063_s21 = scalar_lea.vmem %s307_s16, 2304  ;;  %p8071_p8 = scmp.lt.s32.totalorder %s307_s16, %s307_s16 }
  0x3e   : > { %p8064_p1 = scmp.ne.s32.totalorder %s307_s16, %s8063_s21  ;;  %p8072_p9 = scmp.lt.s32.totalorder %s8063_s21, %s8063_s21 }
  0x40   : > { %p8066_p4 = pnand %p8064_p1, %p8348_p6  ;;  %p8073_p10 = por %p8072_p9, %p8071_p8 }
  0x42   : > { %p8067_p7 = pneg %p8066_p4 }
  0x44   : > { %p8074_p11 = pnand %p8073_p10, %p8067_p7 }
  0x46   : > { %8077 = shalt.err (!%p8074_p11)
}
  0x47   : > { %6901 = dma.hbm_to_vmem [thread:$0]  (!%p8338_p5), %s8670_s1, 2304, %s307_s16, [#allocation3], %s8244_s12, %s8244_s12, %s8245_s13  }
  0x48   : > { %s8089_s27 = scalar_lea.vmem %s334_s22, 96  ;;  %p8097_p1 = scmp.lt.s32.totalorder %s334_s22, %s334_s22 }
  0x49   : > { %p8090_p12 = scmp.ne.s32.totalorder %s334_s22, %s8089_s27  ;;  %p8098_p4 = scmp.lt.s32.totalorder %s8089_s27, %s8089_s27 }
  0x4b   : > { %p8092_p13 = pnand %p8090_p12, %p8348_p6  ;;  %p8099_p7 = por %p8098_p4, %p8097_p1 }
  0x4d   : > { %p8093_p0 = pneg %p8092_p13 }
  0x4f   : > { %p8100_p8 = pnand %p8099_p7, %p8093_p0 }
  0x51   : > { %8103 = shalt.err (!%p8100_p8)
}
  0x52   : > { %6907 = dma.hbm_to_vmem [thread:$0]  (!%p8338_p5), %s8672_s3, 96, %s334_s22, [#allocation5]  }
  0x53   : > { %s8248_s14 = smov [#allocation9]   ;;  %s8249_s26 = smov [#allocation12]  }
  0x54   : > { %s356_s15 = sshll.u32 %s8248_s14, 4  ;;  %s380_s16 = sshll.u32 %s8249_s26, 4  ;;  %s357_s15 = int_to_ptr.vmem [resolvable:$true] %s356_s15  ;;  %s381_s16 = int_to_ptr.vmem [resolvable:$true] %s380_s16 }
  0x55   : > { %s8115_s20 = scalar_lea.vmem %s357_s15, 36864  ;;  %p8123_p12 = scmp.lt.s32.totalorder %s357_s15, %s357_s15 }
  0x56   : > { %p8116_p9 = scmp.ne.s32.totalorder %s357_s15, %s8115_s20  ;;  %p8124_p13 = scmp.lt.s32.totalorder %s8115_s20, %s8115_s20 }
  0x58   : > { %p8118_p10 = pnand %p8116_p9, %p8348_p6  ;;  %p8125_p0 = por %p8124_p13, %p8123_p12 }
  0x5a   : > { %p8119_p11 = pneg %p8118_p10 }
  0x5c   : > { %p8126_p1 = pnand %p8125_p0, %p8119_p11 }
  0x5e   : > { %8129 = shalt.err (!%p8126_p1)
}
  0x5f   : > { %6913 = dma.hbm_to_vmem [thread:$0]  (!%p8338_p5), %s8674_s5, 36864, %s357_s15, [#allocation8], %s8244_s12, %s8244_s12, %s8245_s13  }
  0x60   : > { %s8141_s28 = scalar_lea.vmem %s381_s16, 6144  ;;  %p8149_p9 = scmp.lt.s32.totalorder %s381_s16, %s381_s16 }
  0x61   : > { %p8142_p4 = scmp.ne.s32.totalorder %s381_s16, %s8141_s28  ;;  %p8150_p10 = scmp.lt.s32.totalorder %s8141_s28, %s8141_s28 }
  0x63   : > { %p8144_p7 = pnand %p8142_p4, %p8348_p6  ;;  %p8151_p11 = por %p8150_p10, %p8149_p9 }
  0x65   : > { %p8145_p8 = pneg %p8144_p7 }
  0x67   : > { %p8152_p12 = pnand %p8151_p11, %p8145_p8 }
  0x69   : > { %8155 = shalt.err (!%p8152_p12)
}
  0x6a   : > { %s8250_s25 = smov 64   ;;  %s8251_s27 = smov 4  }
  0x6b   : > { %6919 = dma.hbm_to_vmem [thread:$0]  (!%p8338_p5), %s8676_s7, 6144, %s381_s16, [#allocation11], %s8250_s25, %s8250_s25, %s8251_s27  }
  0x6c   : > { %s8252_s12 = smov [#allocation15]   ;;  %s8253_s14 = smov [#allocation16]  }
  0x6d   : > { %s404_s13 = sshll.u32 %s8252_s12, 4  ;;  %s418_s15 = sshll.u32 %s8253_s14, 4  ;;  %s405_s13 = int_to_ptr.vmem [resolvable:$true] %s404_s13  ;;  %s419_s15 = int_to_ptr.vmem [resolvable:$true] %s418_s15 }
  0x6e   : > { %s8167_s26 = scalar_lea.vmem %s405_s13, 1024  ;;  %p8175_p4 = scmp.lt.s32.totalorder %s405_s13, %s405_s13 }
  0x6f   : > { %p8168_p13 = scmp.ne.s32.totalorder %s405_s13, %s8167_s26  ;;  %p8176_p7 = scmp.lt.s32.totalorder %s8167_s26, %s8167_s26 }
  0x71   : > { %p8170_p0 = pnand %p8168_p13, %p8348_p6  ;;  %p8177_p8 = por %p8176_p7, %p8175_p4 }
  0x73   : > { %p8171_p1 = pneg %p8170_p0 }
  0x75   : > { %p8178_p9 = pnand %p8177_p8, %p8171_p1 }
  0x77   : > { %8181 = shalt.err (!%p8178_p9)
}
  0x78   : > { %6925 = dma.hbm_to_vmem [thread:$0]  (!%p8338_p5), %s8678_s9, 1024, %s405_s13, [#allocation14], %s8250_s25, %s8250_s25, %s8251_s27  }
  0x79   : > { %s8193_s16 = scalar_lea.vmem %s419_s15, 16  ;;  %s8200_s21 = scalar_lea.vmem %s419_s15, 32 }
  0x7a   : > { %p8194_p10 = scmp.ne.s32.totalorder %s419_s15, %s8193_s16  ;;  %p8201_p13 = scmp.lt.s32.totalorder %s419_s15, %s419_s15 }
  0x7b   : > { %p8202_p0 = scmp.lt.s32.totalorder %s8200_s21, %s8193_s16 }
  0x7c   : > { %p8196_p11 = pnand %p8194_p10, %p8348_p6 }
  0x7d   : > { %p8203_p2 = por %p8202_p0, %p8201_p13 }
  0x7e   : > { %p8197_p12 = pneg %p8196_p11 }
  0x80   : > { %p8204_p4 = pnand %p8203_p2, %p8197_p12 }
  0x82   : > { %8207 = shalt.err (!%p8204_p4)
}
  0x83   : > { %6928 = dma.hbm_to_vmem [thread:$0]  (!%p8338_p5), %s8679_s10, 16, %s419_s15, [#allocation17]  }
  0x84   : > { %438 = sbr.rel (%p8328_p3) target bundleno = 1513 (0x5e9), region = 64  ;;  %p8685_p1 = scmp.eq.s32.totalorder (!%p8328_p3), %s8323_s18, 0 }
  0x89   : > { %8213 = dma.done.wait (%p8685_p1), [#allocation3], 2304   ;;  %p8686_p6 = pmov %p8685_p1 }
  0x8a   : > { %p8687_p7 = pmov %p8685_p1 }
  0x8b   : > { %8215 = vsyncadd (%p8686_p6), [#allocation3], 4294964992 }
  0x8c   : > { %8217 = dma.done.wait (%p8687_p7), [#allocation5], 2400   ;;  %p8688_p2 = pmov %p8685_p1 }
  0x8d   : > { %p8689_p8 = pmov %p8685_p1 }
  0x8e   : > { %8219 = vsyncadd (%p8688_p2), [#allocation5], 4294964896 }
  0x8f   : > { %8221 = dma.done.wait (%p8689_p8), [#allocation8], 73728   ;;  %p8690_p5 = pmov %p8685_p1 }
  0x90   : > { %p8691_p3 = pmov %p8685_p1 }
  0x91   : > { %8223 = vsyncadd (%p8690_p5), [#allocation8], 4294893568 }
  0x92   : > { %8225 = dma.done.wait (%p8691_p3), [#allocation11], 6240   ;;  %p8692_p9 = pmov %p8685_p1 }
  0x93   : > { %p8693_p10 = pmov %p8685_p1 }
  0x94   : > { %8227 = vsyncadd (%p8692_p9), [#allocation11], 4294961056 }
  0x95   : > { %8229 = dma.done.wait (%p8693_p10), [#allocation14], 1040   ;;  %p8694_p11 = pmov %p8685_p1 }
  0x96   : > { %p8695_p12 = pmov %p8685_p1 }
  0x97   : > { %8231 = vsyncadd (%p8694_p11), [#allocation14], 4294966256 }
  0x98   : > { %8233 = dma.done.wait (%p8695_p12), [#allocation17], 16   ;;  %p8696_p13 = pmov %p8685_p1 }
  0x99   : > { %v8254_v0 = vmov 0   ;;  %p512_p0 = scmp.lt.s32.totalorder %s8323_s18, 1  ;;  %v6974_v1 = vld [vmem:[#allocation2 + $0x64] ss:$24 sps:$4 sm:$0xff]   ;;  %v6978_v3 = vld [vmem:[#allocation2 + $0x60] ss:$24 sps:$4 sm:$0xff]  }
  0x9a   : > { %8235 = vsyncadd (%p8696_p13), [#allocation17], 4294967280  ;;  %698 = vmatprep.mubr.bf16.mxu0 %v8254_v0  ;;  %739 = vmatprep.mubr.bf16.mxu1 %v8254_v0  ;;  %v6976_v2 = vld [vmem:[#allocation2 + $0x6c] ss:$24 sps:$4 sm:$0xff]   ;;  %v6979_v4 = vld [vmem:[#allocation2 + $0x68] ss:$24 sps:$4 sm:$0xff]  }
  0x9b   : > { %s8698_s18 = smov (!%p512_p0, %s8323_s18), 1  ;;  %676 = vmatprep.subr.bf16.mxu0 %v6974_v1  ;;  %717 = vmatprep.subr.bf16.mxu1 %v6976_v2  ;;  %v6980_v5 = vld [vmem:[#allocation2 + $0x34] ss:$24 sps:$4 sm:$0xff]   ;;  %v6984_v7 = vld [vmem:[#allocation2 + $0x30] ss:$24 sps:$4 sm:$0xff]   ;;  %vm662_vm0 = vcmask 392192  }
  0x9c   : > { %677 = vmatpush1.bf16.msra.mxu0 %v6978_v3  ;;  %718 = vmatpush1.bf16.msra.mxu1 %v6979_v4  ;;  %v6982_v6 = vld [vmem:[#allocation2 + $0x3c] ss:$24 sps:$4 sm:$0xff]   ;;  %s6083_s19 = sshll.u32 %s8698_s18, 2  ;;  %v6985_v8 = vld [vmem:[#allocation2 + $0x38] ss:$24 sps:$4 sm:$0xff]   ;;  %vm8256_vm1 = vmmov 0  }
  0x9d   : > { %678 = vmatprep.subr.bf16.mxu0 %v6980_v5  ;;  %719 = vmatprep.subr.bf16.mxu1 %v6982_v6  ;;  %v6986_v9 = vld [vmem:[#allocation2 + $0x4] ss:$24 sps:$4 sm:$0xff]   ;;  %v6990_v11 = vld [vmem:[#allocation2] ss:$24 sps:$4 sm:$0xff]   ;;  %s515_s25 = scalar_lea.vmem %s8669_s0, %s6083_s19  ;;  %v6994_v13 = vld [vmem:[#allocation2 + $0x74] ss:$24 sps:$4 sm:$0xff]  }
  0x9e   : > { %v6988_v10 = vld [vmem:[#allocation2 + $0xc] ss:$24 sps:$4 sm:$0xff]   ;;  %v6991_v12 = vld [vmem:[#allocation2 + $0x8] ss:$24 sps:$4 sm:$0xff]   ;;  %v7012_v26 = vld [vmem:[#allocation4 + $0x6c] ss:$24 sps:$4 sm:$0xff]  }
  0x9f   : > { %v8481_v14 = vld [vmem:[%s515_s25] sm:$0xf]  ;;  %v6997_v15 = vld [vmem:[#allocation4 + $0x64] ss:$24 sps:$4 sm:$0xff]   ;;  %v6992_v16 = vld [vmem:[#allocation2 + $0x70] ss:$24 sps:$4 sm:$0xff]  }
  0xa0   : > { %679 = vmatpush1.bf16.msra.mxu0 %v6984_v7  ;;  %720 = vmatpush1.bf16.msra.mxu1 %v6985_v8  ;;  %v6995_v17 = vld [vmem:[#allocation4 + $0x60] ss:$24 sps:$4 sm:$0xff]   ;;  %v7000_v18 = vld [vmem:[#allocation2 + $0x44] ss:$24 sps:$4 sm:$0xff]   ;;  %v6998_v20 = vld [vmem:[#allocation2 + $0x40] ss:$24 sps:$4 sm:$0xff]  }
  0xa1   : > { %680 = vmatprep.subr.bf16.mxu0 %v6986_v9  ;;  %721 = vmatprep.subr.bf16.mxu1 %v6988_v10  ;;  %v7003_v19 = vld [vmem:[#allocation4 + $0x34] ss:$24 sps:$4 sm:$0xff]   ;;  %v7001_v21 = vld [vmem:[#allocation4 + $0x30] ss:$24 sps:$4 sm:$0xff]   ;;  %v7006_v22 = vld [vmem:[#allocation2 + $0x14] ss:$24 sps:$4 sm:$0xff]  }
  0xa2   : > { %v7009_v23 = vld [vmem:[#allocation4 + $0x4] ss:$24 sps:$4 sm:$0xff]   ;;  %v7004_v24 = vld [vmem:[#allocation2 + $0x10] ss:$24 sps:$4 sm:$0xff]   ;;  %v7015_v27 = vld [vmem:[#allocation4 + $0x74] ss:$24 sps:$4 sm:$0xff]  }
  0xa3   : > { %v7007_v25 = vld [vmem:[#allocation4] ss:$24 sps:$4 sm:$0xff]   ;;  %v7013_v29 = vld [vmem:[#allocation4 + $0x70] ss:$24 sps:$4 sm:$0xff]   ;;  %v7018_v30 = vld [vmem:[#allocation4 + $0x3c] ss:$24 sps:$4 sm:$0xff]  }
  0xa4   : > { %681 = vmatpush1.bf16.msra.mxu0 %v6990_v11  ;;  %722 = vmatpush1.bf16.msra.mxu1 %v6991_v12  ;;  %v7010_v28 = vld [vmem:[#allocation4 + $0x68] ss:$24 sps:$4 sm:$0xff]   ;;  %v7021_v31 = vld [vmem:[#allocation4 + $0x44] ss:$24 sps:$4 sm:$0xff]   ;;  %v7016_v32 = vld [vmem:[#allocation4 + $0x38] ss:$24 sps:$4 sm:$0xff]  }
  0xa5   : > { %758 = vmatprep.subr.bf16.mxu0 %v6994_v13  ;;  %907 = vmatprep.subr.bf16.mxu1 %v6997_v15  ;;  %v7019_v33 = vld [vmem:[#allocation4 + $0x40] ss:$24 sps:$4 sm:$0xff]   ;;  %v7024_v34 = vld [vmem:[#allocation4 + $0xc] ss:$24 sps:$4 sm:$0xff]   ;;  %v7025_v37 = vld [vmem:[#allocation4 + $0x10] ss:$24 sps:$4 sm:$0xff]  }
  0xa6   : > { %v7027_v35 = vld [vmem:[#allocation4 + $0x14] ss:$24 sps:$4 sm:$0xff]   ;;  %v7022_v36 = vld [vmem:[#allocation4 + $0x8] ss:$24 sps:$4 sm:$0xff]   ;;  %s6084_s27 = sshll.u32 %s8698_s18, 3 }
  0xa7   : > { %6103 = vmatmul.mubr.msk.bf16.vlgmr.msra.gmra.mxu0 %vm662_vm0, %v8481_v14  ;;  %6104 = vmatmul.mubr.msk.bf16.vlgmr.msra.gmra.mxu1 %vm662_vm0, %v8481_v14  ;;  %v7030_v38 = vld [vmem:[#allocation7 + $0x154] ss:$24 sps:$4 sm:$0xff]   ;;  %v7028_v40 = vld [vmem:[#allocation7 + $0x150] ss:$24 sps:$4 sm:$0xff]   ;;  %v7033_v42 = vld [vmem:[#allocation7 + $0x124] ss:$24 sps:$4 sm:$0xff]   ;;  %s519_s13 = scalar_lea.vmem %s8680_s11, %s6084_s27 }
  0xa8   : > { %759 = vmatpush1.bf16.msra.mxu0 %v6992_v16  ;;  %908 = vmatpush1.bf16.msra.mxu1 %v6995_v17  ;;  %v7042_v39 = vld [vmem:[#allocation7 + $0x454] ss:$24 sps:$4 sm:$0xff]   ;;  %v7040_v41 = vld [vmem:[#allocation7 + $0x450] ss:$24 sps:$4 sm:$0xff]   ;;  %v7048_v43 = vld [vmem:[#allocation7 + $0x424] ss:$24 sps:$4 sm:$0xff]  }
  0xa9   : > { %760 = vmatprep.subr.bf16.mxu0 %v7000_v18  ;;  %909 = vmatprep.subr.bf16.mxu1 %v7003_v19  ;;  %v7031_v44 = vld [vmem:[#allocation7 + $0x120] ss:$24 sps:$4 sm:$0xff]   ;;  %v7036_v46 = vld [vmem:[#allocation7 + $0xf4] ss:$24 sps:$4 sm:$0xff]   ;;  %v7034_v48 = vld [vmem:[#allocation7 + $0xf0] ss:$24 sps:$4 sm:$0xff]  }
  0xaa   : > { %780 = vmatprep.mubr.bf16.mxu0 %v8254_v0  ;;  %929 = vmatprep.mubr.bf16.mxu1 %v8254_v0  ;;  %v7046_v45 = vld [vmem:[#allocation7 + $0x420] ss:$24 sps:$4 sm:$0xff]   ;;  %v7054_v47 = vld [vmem:[#allocation7 + $0x3f4] ss:$24 sps:$4 sm:$0xff]   ;;  %v7052_v49 = vld [vmem:[#allocation7 + $0x3f0] ss:$24 sps:$4 sm:$0xff]  }
  0xab   : > { %v7039_v50 = vld [vmem:[#allocation7 + $0xc4] ss:$24 sps:$4 sm:$0xff]   ;;  %v7037_v52 = vld [vmem:[#allocation7 + $0xc0] ss:$24 sps:$4 sm:$0xff]   ;;  %v7045_v54 = vld [vmem:[#allocation7 + $0x94] ss:$24 sps:$4 sm:$0xff]  }
  0xac   : > { %761 = vmatpush1.bf16.msra.mxu0 %v6998_v20  ;;  %910 = vmatpush1.bf16.msra.mxu1 %v7001_v21  ;;  %v7060_v51 = vld [vmem:[#allocation7 + $0x3c4] ss:$24 sps:$4 sm:$0xff]   ;;  %v7058_v53 = vld [vmem:[#allocation7 + $0x3c0] ss:$24 sps:$4 sm:$0xff]   ;;  %v7066_v55 = vld [vmem:[#allocation7 + $0x394] ss:$24 sps:$4 sm:$0xff]  }
  0xad   : > { %762 = vmatprep.subr.bf16.mxu0 %v7006_v22  ;;  %911 = vmatprep.subr.bf16.mxu1 %v7009_v23  ;;  %v7043_v56 = vld [vmem:[#allocation7 + $0x90] ss:$24 sps:$4 sm:$0xff]   ;;  %v7051_v58 = vld [vmem:[#allocation7 + $0x64] ss:$24 sps:$4 sm:$0xff]   ;;  %v7049_v60 = vld [vmem:[#allocation7 + $0x60] ss:$24 sps:$4 sm:$0xff]  }
  0xae   : > { %v7064_v57 = vld [vmem:[#allocation7 + $0x390] ss:$24 sps:$4 sm:$0xff]   ;;  %v7072_v59 = vld [vmem:[#allocation7 + $0x364] ss:$24 sps:$4 sm:$0xff]   ;;  %v7070_v61 = vld [vmem:[#allocation7 + $0x360] ss:$24 sps:$4 sm:$0xff]  }
  0xaf   : > { %v7057_v62 = vld [vmem:[#allocation7 + $0x34] ss:$24 sps:$4 sm:$0xff]   ;;  %v7076_v1 = vld [vmem:[#allocation7 + $0x330] ss:$24 sps:$4 sm:$0xff]   ;;  %v7063_v2 = vld [vmem:[#allocation7 + $0x4] ss:$24 sps:$4 sm:$0xff]  }
  0xb0   : > { %763 = vmatpush1.bf16.msra.mxu0 %v7004_v24  ;;  %912 = vmatpush1.bf16.msra.mxu1 %v7007_v25  ;;  %v7078_v63 = vld [vmem:[#allocation7 + $0x334] ss:$24 sps:$4 sm:$0xff]   ;;  %v7084_v3 = vld [vmem:[#allocation7 + $0x304] ss:$24 sps:$4 sm:$0xff]   ;;  %v7061_v4 = vld [vmem:[#allocation7] ss:$24 sps:$4 sm:$0xff]  }
  0xb1   : > { %948 = vmatprep.subr.bf16.mxu0 %v7012_v26  ;;  %989 = vmatprep.subr.bf16.mxu1 %v7015_v27  ;;  %v7082_v5 = vld [vmem:[#allocation7 + $0x300] ss:$24 sps:$4 sm:$0xff]   ;;  %v7069_v6 = vld [vmem:[#allocation7 + $0x2d4] ss:$24 sps:$4 sm:$0xff]   ;;  %v7067_v7 = vld [vmem:[#allocation7 + $0x2d0] ss:$24 sps:$4 sm:$0xff]  }
  0xb2   : > { %v7075_v8 = vld [vmem:[#allocation7 + $0x2a4] ss:$24 sps:$4 sm:$0xff]   ;;  %v7073_v9 = vld [vmem:[#allocation7 + $0x2a0] ss:$24 sps:$4 sm:$0xff]   ;;  %v7081_v10 = vld [vmem:[#allocation7 + $0x274] ss:$24 sps:$4 sm:$0xff]  }
  0xb3   : > { %6105 = vmatmul.mubr.msk.bf16.vlgmr.msra.gmra.mxu0 %vm662_vm0, %v8481_v14  ;;  %6124 = vmatmul.mubr.msk.bf16.vlgmr.msra.gmra.mxu1 %vm662_vm0, %v8481_v14  ;;  %v7079_v11 = vld [vmem:[#allocation7 + $0x270] ss:$24 sps:$4 sm:$0xff]   ;;  %v7087_v12 = vld [vmem:[#allocation7 + $0x244] ss:$24 sps:$4 sm:$0xff]   ;;  %v7090_v13 = vld [vmem:[#allocation7 + $0x5d4] ss:$24 sps:$4 sm:$0xff]  }
  0xb4   : > { %949 = vmatpush1.bf16.msra.mxu0 %v7010_v28  ;;  %990 = vmatpush1.bf16.msra.mxu1 %v7013_v29  ;;  %v7088_v15 = vld [vmem:[#allocation7 + $0x5d0] ss:$24 sps:$4 sm:$0xff]   ;;  %v7093_v16 = vld [vmem:[#allocation7 + $0x214] ss:$24 sps:$4 sm:$0xff]   ;;  %v7096_v17 = vld [vmem:[#allocation7 + $0x5a4] ss:$24 sps:$4 sm:$0xff]  }
  0xb5   : > { %950 = vmatprep.subr.bf16.mxu0 %v7018_v30  ;;  %991 = vmatprep.subr.bf16.mxu1 %v7021_v31  ;;  %v7091_v18 = vld [vmem:[#allocation7 + $0x210] ss:$24 sps:$4 sm:$0xff]   ;;  %v7094_v19 = vld [vmem:[#allocation7 + $0x5a0] ss:$24 sps:$4 sm:$0xff]   ;;  %v7099_v21 = vld [vmem:[#allocation7 + $0x1e4] ss:$24 sps:$4 sm:$0xff]  }
  0xb6   : > { %970 = vmatprep.mubr.bf16.mxu0 %v8254_v0  ;;  %1011 = vmatprep.mubr.bf16.mxu1 %v8254_v0  ;;  %v7055_v0 = vld [vmem:[#allocation7 + $0x30] ss:$24 sps:$4 sm:$0xff]   ;;  %v7097_v20 = vld [vmem:[#allocation7 + $0x1e0] ss:$24 sps:$4 sm:$0xff]   ;;  %v7102_v23 = vld [vmem:[#allocation7 + $0x574] ss:$24 sps:$4 sm:$0xff]  }
  0xb7   : > { %v7100_v22 = vld [vmem:[#allocation7 + $0x570] ss:$24 sps:$4 sm:$0xff]   ;;  %v7105_v24 = vld [vmem:[#allocation7 + $0x1b4] ss:$24 sps:$4 sm:$0xff]   ;;  %v7108_v25 = vld [vmem:[#allocation7 + $0x544] ss:$24 sps:$4 sm:$0xff]  }
  0xb8   : > { %951 = vmatpush1.bf16.msra.mxu0 %v7016_v32  ;;  %992 = vmatpush1.bf16.msra.mxu1 %v7019_v33  ;;  %v7103_v26 = vld [vmem:[#allocation7 + $0x1b0] ss:$24 sps:$4 sm:$0xff]   ;;  %v7106_v27 = vld [vmem:[#allocation7 + $0x540] ss:$24 sps:$4 sm:$0xff]   ;;  %v7111_v28 = vld [vmem:[#allocation7 + $0x184] ss:$24 sps:$4 sm:$0xff]  }
  0xb9   : > { %952 = vmatprep.subr.bf16.mxu0 %v7024_v34  ;;  %993 = vmatprep.subr.bf16.mxu1 %v7027_v35  ;;  %v7114_v29 = vld [vmem:[#allocation7 + $0x514] ss:$24 sps:$4 sm:$0xff]   ;;  %v7109_v30 = vld [vmem:[#allocation7 + $0x180] ss:$24 sps:$4 sm:$0xff]   ;;  %v7112_v31 = vld [vmem:[#allocation7 + $0x510] ss:$24 sps:$4 sm:$0xff]  }
  0xba   : > { %v7117_v32 = vld [vmem:[#allocation7 + $0x4e4] ss:$24 sps:$4 sm:$0xff]   ;;  %v7120_v33 = vld [vmem:[#allocation7 + $0x754] ss:$24 sps:$4 sm:$0xff]   ;;  %v7115_v34 = vld [vmem:[#allocation7 + $0x4e0] ss:$24 sps:$4 sm:$0xff]  }
  0xbb   : > { %v7123_v35 = vld [vmem:[#allocation7 + $0x4b4] ss:$24 sps:$4 sm:$0xff]  }
  0xbc   : > { %953 = vmatpush1.bf16.msra.mxu0 %v7022_v36  ;;  %994 = vmatpush1.bf16.msra.mxu1 %v7025_v37  ;;  %v7121_v36 = vld [vmem:[#allocation7 + $0x4b0] ss:$24 sps:$4 sm:$0xff]   ;;  %v7129_v37 = vld [vmem:[#allocation7 + $0x484] ss:$24 sps:$4 sm:$0xff]  }
  0xbd   : > { %2798 = vmatprep.subr.bf16.mxu0 %v7030_v38  ;;  %2839 = vmatprep.subr.bf16.mxu1 %v7042_v39  ;;  %v7127_v38 = vld [vmem:[#allocation7 + $0x480] ss:$24 sps:$4 sm:$0xff]   ;;  %v7138_v39 = vld [vmem:[#allocation7 + $0x15c] ss:$24 sps:$4 sm:$0xff]  }
  0xbf   : > { %6125 = vmatmul.mubr.msk.bf16.vlgmr.msra.gmra.mxu0 %vm662_vm0, %v8481_v14  ;;  %6126 = vmatmul.mubr.msk.bf16.vlgmr.msra.gmra.mxu1 %vm662_vm0, %v8481_v14  ;;  %v7085_v14 = vld [vmem:[#allocation7 + $0x240] ss:$24 sps:$4 sm:$0xff]  }
  0xc0   : > { %2799 = vmatpush1.bf16.msra.mxu0 %v7028_v40  ;;  %2840 = vmatpush1.bf16.msra.mxu1 %v7040_v41  ;;  %v542_v40 = vlaneseq }
  0xc1   : > { %2800 = vmatprep.subr.bf16.mxu0 %v7033_v42  ;;  %2841 = vmatprep.subr.bf16.mxu1 %v7048_v43 }
  0xc2   : > { %v8499_v43 = vshrl.u32 %v542_v40, 7 }
  0xc4   : > { %2801 = vmatpush1.bf16.msra.mxu0 %v7031_v44  ;;  %2842 = vmatpush1.bf16.msra.mxu1 %v7046_v45 }
  0xc5   : > { %2802 = vmatprep.subr.bf16.mxu0 %v7036_v46  ;;  %2843 = vmatprep.subr.bf16.mxu1 %v7054_v47 }
  0xc8   : > { %2803 = vmatpush1.bf16.msra.mxu0 %v7034_v48  ;;  %2844 = vmatpush1.bf16.msra.mxu1 %v7052_v49  ;;  %v544_v48 = vsub.s32 0, %v8499_v43  ;;  %v560_v49 = vsub.s32 4, %v8499_v43 }
  0xc9   : > { %2804 = vmatprep.subr.bf16.mxu0 %v7039_v50  ;;  %2845 = vmatprep.subr.bf16.mxu1 %v7060_v51  ;;  %v540_v50 = vld [vmem:[#allocation6] sm:$0x3f] }
  0xcc   : > { %2805 = vmatpush1.bf16.msra.mxu0 %v7037_v52  ;;  %2846 = vmatpush1.bf16.msra.mxu1 %v7058_v53  ;;  %v548_v53 = vsub.s32 1, %v8499_v43 }
  0xcd   : > { %2806 = vmatprep.subr.bf16.mxu0 %v7045_v54  ;;  %2847 = vmatprep.subr.bf16.mxu1 %v7066_v55  ;;  %v545_v54 = vrot.slane %v540_v50, %v544_v48  ;;  %v561_v55 = vrot.slane %v540_v50, %v560_v49 }
  0xd0   : > { %2807 = vmatpush1.bf16.msra.mxu0 %v7043_v56  ;;  %2848 = vmatpush1.bf16.msra.mxu1 %v7064_v57  ;;  %v549_v56 = vrot.slane %v540_v50, %v548_v53 }
  0xd1   : > { %2808 = vmatprep.subr.bf16.mxu0 %v7051_v58  ;;  %2849 = vmatprep.subr.bf16.mxu1 %v7072_v59 }
  0xd4   : > { %2809 = vmatpush1.bf16.msra.mxu0 %v7049_v60  ;;  %2850 = vmatpush1.bf16.msra.mxu1 %v7070_v61 }
  0xd5   : > { %2810 = vmatprep.subr.bf16.mxu0 %v7057_v62  ;;  %2851 = vmatprep.subr.bf16.mxu1 %v7078_v63 }
  0xd8   : > { %2811 = vmatpush1.bf16.msra.mxu0 %v7055_v0  ;;  %2852 = vmatpush1.bf16.msra.mxu1 %v7076_v1 }
  0xd9   : > { %2812 = vmatprep.subr.bf16.mxu0 %v7063_v2  ;;  %2853 = vmatprep.subr.bf16.mxu1 %v7084_v3 }
  0xdc   : > { %2813 = vmatpush1.bf16.msra.mxu0 %v7061_v4  ;;  %2854 = vmatpush1.bf16.msra.mxu1 %v7082_v5  ;;  %v552_v5 = vsub.s32 2, %v8499_v43 }
  0xdd   : > { %2814 = vmatprep.subr.bf16.mxu0 %v7069_v6  ;;  %2855 = vmatprep.subr.bf16.mxu1 %v7090_v13  ;;  %v7118_v13 = vld [vmem:[#allocation7 + $0x750] ss:$24 sps:$4 sm:$0xff]  }
  0xe0   : > { %2815 = vmatpush2.bf16.msra.mxu0 %v7067_v7  ;;  %2856 = vmatpush2.bf16.msra.mxu1 %v7088_v15  ;;  %v556_v7 = vsub.s32 3, %v8499_v43  ;;  %v553_v15 = vrot.slane %v540_v50, %v552_v5 }
  0xe1   : > { %2816 = vmatprep.subr.bf16.mxu0 %v7075_v8  ;;  %2857 = vmatprep.subr.bf16.mxu1 %v7096_v17 }
  0xe2   : > { %v557_v17 = vrot.slane %v540_v50, %v556_v7 }
  0xe4   : > { %2817 = vmatpush2.bf16.msra.mxu0 %v7073_v9  ;;  %2858 = vmatpush2.bf16.msra.mxu1 %v7094_v19  ;;  %v564_v9 = vsub.s32 5, %v8499_v43  ;;  %v7715_v43 = vld [vmem:[#allocation9 + $0x698] ss:$24 sps:$4 sm:$0xff]  }
  0xe5   : > { %2818 = vmatprep.subr.bf16.mxu0 %v7081_v10  ;;  %2859 = vmatprep.subr.bf16.mxu1 %v7102_v23 }
  0xe6   : > { %v565_v19 = vrot.slane %v540_v50, %v564_v9  ;;  %v7136_v50 = vld [vmem:[#allocation7 + $0x158] ss:$24 sps:$4 sm:$0xff]  }
  0xe8   : > { %2819 = vmatpush2.bf16.msra.mxu0 %v7079_v11  ;;  %2860 = vmatpush2.bf16.msra.mxu1 %v7100_v22  ;;  %v7124_v22 = vld [vmem:[#allocation7 + $0x720] ss:$24 sps:$4 sm:$0xff]  }
  0xe9   : > { %2820 = vmatprep.subr.bf16.mxu0 %v7087_v12  ;;  %2861 = vmatprep.subr.bf16.mxu1 %v7108_v25 }
  0xec   : > { %2821 = vmatpush2.bf16.msra.mxu0 %v7085_v14  ;;  %2862 = vmatpush2.bf16.msra.mxu1 %v7106_v27  ;;  %v7126_v14 = vld [vmem:[#allocation7 + $0x724] ss:$24 sps:$4 sm:$0xff]  }
  0xed   : > { %2822 = vmatprep.subr.bf16.mxu0 %v7093_v16  ;;  %2863 = vmatprep.subr.bf16.mxu1 %v7114_v29 }
  0xf0   : > { %2823 = vmatpush2.bf16.msra.mxu0 %v7091_v18  ;;  %2864 = vmatpush2.bf16.msra.mxu1 %v7112_v31 }
  0xf1   : > { %2824 = vmatprep.subr.bf16.mxu0 %v7099_v21  ;;  %2865 = vmatprep.subr.bf16.mxu1 %v7117_v32 }
  0xf4   : > { %2825 = vmatpush2.bf16.msra.mxu0 %v7097_v20  ;;  %2866 = vmatpush2.bf16.msra.mxu1 %v7115_v34 }
  0xf5   : > { %2826 = vmatprep.subr.bf16.mxu0 %v7105_v24  ;;  %2867 = vmatprep.subr.bf16.mxu1 %v7123_v35 }
  0xf8   : > { %2827 = vmatpush2.bf16.msra.mxu0 %v7103_v26  ;;  %2868 = vmatpush2.bf16.msra.mxu1 %v7121_v36 }
  0xf9   : > { %2828 = vmatprep.subr.bf16.mxu0 %v7111_v28  ;;  %2869 = vmatprep.subr.bf16.mxu1 %v7129_v37 }
  0xfc   : > { %2829 = vmatpush2.bf16.msra.mxu0 %v7109_v30  ;;  %2870 = vmatpush2.bf16.msra.mxu1 %v7127_v38  ;;  %v7132_v30 = vld [vmem:[#allocation7 + $0x6f4] ss:$24 sps:$4 sm:$0xff]  }
  0xfd   : > { %2880 = vmatprep.subr.bf16.mxu0 %v7120_v33  ;;  %2921 = vmatprep.subr.bf16.mxu1 %v7138_v39  ;;  %v7130_v39 = vld [vmem:[#allocation7 + $0x6f0] ss:$24 sps:$4 sm:$0xff]  }
 0x167   : > { %v700_v41 = vpop.f32.mrf.mxu0  ;;  %v741_v42 = vpop.f32.mrf.mxu1 }
 0x168   : > { %v701_v59 = vadd.f32 %v700_v41, %v545_v54  ;;  %v742_v23 = vadd.f32 %v741_v42, %v553_v15  ;;  %v7135_v42 = vld [vmem:[#allocation7 + $0x6c4] ss:$24 sps:$4 sm:$0xff]  }
 0x169   : > { %v702_v44 = vpop.f32.mrf.mxu0  ;;  %v743_v45 = vpop.f32.mrf.mxu1 }
 0x16a   : > { %v703_v0 = vadd.f32 %v702_v44, %v549_v56  ;;  %v744_v26 = vadd.f32 %v743_v45, %v557_v17 }
 0x16b   : > { %v704_v46 = vpop.f32.mrf.mxu0  ;;  %v745_v47 = vpop.f32.mrf.mxu1 }
 0x16c   : > { %v7133_v47 = vld [vmem:[#allocation7 + $0x6c0] ss:$24 sps:$4 sm:$0xff]  }
 0x16d   : > { %v705_v51 = vpop.f32.mrf.mxu0  ;;  %v746_v52 = vpop.f32.mrf.mxu1 }
 0x16e   : > { %v7141_v51 = vld [vmem:[#allocation7 + $0x694] ss:$24 sps:$4 sm:$0xff]  }
 0x173   : > { %v782_v57 = vpop.f32.mrf.mxu0  ;;  %v931_v58 = vpop.f32.mrf.mxu1 }
 0x174   : > { %v8510_v60 = vadd.f32 %v782_v57, %v561_v55  ;;  %v932_v61 = vadd.f32 %v931_v58, %v545_v54  ;;  %v7139_v57 = vld [vmem:[#allocation7 + $0x690] ss:$24 sps:$4 sm:$0xff]  }
 0x175   : > { %v784_v62 = vpop.f32.mrf.mxu0  ;;  %v933_v63 = vpop.f32.mrf.mxu1  ;;  %v7142_v58 = vld [vmem:[#allocation7 + $0x128] ss:$24 sps:$4 sm:$0xff]  }
 0x176   : > { %v1020_v1 = vmax.f32 %v701_v59, %v932_v61  ;;  %v934_v2 = vadd.f32 %v933_v63, %v549_v56  ;;  %v785_v27 = vadd.f32 %v784_v62, %v565_v19  ;;  %v7144_v56 = vld [vmem:[#allocation7 + $0x12c] ss:$24 sps:$4 sm:$0xff]   ;;  %v7150_v61 = vld [vmem:[#allocation7 + $0xfc] ss:$24 sps:$4 sm:$0xff]   ;;  %v7145_v62 = vld [vmem:[#allocation7 + $0x660] ss:$24 sps:$4 sm:$0xff]  }
 0x177   : > { %v786_v3 = vpop.f32.mrf.mxu0  ;;  %v935_v4 = vpop.f32.mrf.mxu1  ;;  %v7147_v59 = vld [vmem:[#allocation7 + $0x664] ss:$24 sps:$4 sm:$0xff]   ;;  %v7148_v63 = vld [vmem:[#allocation7 + $0xf8] ss:$24 sps:$4 sm:$0xff]  }
 0x178   : > { %v1021_v6 = vmax.f32 %v703_v0, %v934_v2  ;;  %v1026_v8 = vmax.f32 %v1020_v1, 0.0  ;;  %v7153_v0 = vld [vmem:[#allocation7 + $0x634] ss:$24 sps:$4 sm:$0xff]   ;;  %v7151_v2 = vld [vmem:[#allocation7 + $0x630] ss:$24 sps:$4 sm:$0xff]  }
 0x179   : > { %v787_v10 = vpop.f32.mrf.mxu0  ;;  %v936_v11 = vpop.f32.mrf.mxu1  ;;  %v7156_v1 = vld [vmem:[#allocation7 + $0xcc] ss:$24 sps:$4 sm:$0xff]   ;;  %v7154_v3 = vld [vmem:[#allocation7 + $0xc8] ss:$24 sps:$4 sm:$0xff]  }
 0x17a   : > { %v1027_v12 = vmax.f32 %v1021_v6, 0.0  ;;  %v8521_v18 = vpack.c.bf16 %v1026_v8, %v1026_v8  ;;  %v7159_v4 = vld [vmem:[#allocation7 + $0x604] ss:$24 sps:$4 sm:$0xff]   ;;  %v7157_v8 = vld [vmem:[#allocation7 + $0x600] ss:$24 sps:$4 sm:$0xff]  }
 0x17b   : > { %v7162_v6 = vld [vmem:[#allocation7 + $0x9c] ss:$24 sps:$4 sm:$0xff]   ;;  %v7160_v10 = vld [vmem:[#allocation7 + $0x98] ss:$24 sps:$4 sm:$0xff]  }
 0x17c   : > { %v8517_v16 = vpack.c.bf16 %v1027_v12, %v1027_v12  ;;  %v7165_v11 = vld [vmem:[#allocation7 + $0x8d4] ss:$24 sps:$4 sm:$0xff]  }
 0x17d   : > { %v7168_v12 = vld [vmem:[#allocation7 + $0x6c] ss:$24 sps:$4 sm:$0xff]  }
 0x17e   : > { %2830 = vmatprep.mubr.bf16.mxu0 %v8517_v16 }
 0x17f   : > { %v972_v20 = vpop.f32.mrf.mxu0  ;;  %v1013_v21 = vpop.f32.mrf.mxu1  ;;  %2831 = vmatmul.mubr.bf16.vlgmr.msra.gmra.mxu0 %v8521_v18 }
 0x180   : > { %v973_v24 = vadd.f32 %v972_v20, %v553_v15  ;;  %v8527_v25 = vadd.f32 %v1013_v21, %v561_v55  ;;  %2881 = vmatpush1.bf16.msra.mxu0 %v7118_v13  ;;  %v7163_v13 = vld [vmem:[#allocation7 + $0x8d0] ss:$24 sps:$4 sm:$0xff]   ;;  %v7171_v15 = vld [vmem:[#allocation7 + $0x8a4] ss:$24 sps:$4 sm:$0xff]   ;;  %v7177_v21 = vld [vmem:[#allocation7 + $0x874] ss:$24 sps:$4 sm:$0xff]  }
 0x181   : > { %v974_v28 = vpop.f32.mrf.mxu0  ;;  %v1015_v29 = vpop.f32.mrf.mxu1  ;;  %2882 = vmatprep.subr.bf16.mxu0 %v7126_v14  ;;  %v7166_v14 = vld [vmem:[#allocation7 + $0x68] ss:$24 sps:$4 sm:$0xff]   ;;  %v7172_v20 = vld [vmem:[#allocation7 + $0x38] ss:$24 sps:$4 sm:$0xff]  }
 0x182   : > { %v1022_v31 = vmax.f32 %v742_v23, %v973_v24  ;;  %v1024_v32 = vmax.f32 %v8510_v60, %v8527_v25  ;;  %v975_v33 = vadd.f32 %v974_v28, %v557_v17  ;;  %v1016_v34 = vadd.f32 %v1015_v29, %v565_v19  ;;  %v7174_v17 = vld [vmem:[#allocation7 + $0x3c] ss:$24 sps:$4 sm:$0xff]   ;;  %v7169_v19 = vld [vmem:[#allocation7 + $0x8a0] ss:$24 sps:$4 sm:$0xff]   ;;  %v7175_v23 = vld [vmem:[#allocation7 + $0x870] ss:$24 sps:$4 sm:$0xff]  }
 0x183   : > { %v976_v35 = vpop.f32.mrf.mxu0  ;;  %v1017_v36 = vpop.f32.mrf.mxu1  ;;  %v7178_v24 = vld [vmem:[#allocation7 + $0x8] ss:$24 sps:$4 sm:$0xff]   ;;  %v7184_v29 = vld [vmem:[#allocation7 + $0x2d8] ss:$24 sps:$4 sm:$0xff]   ;;  %v7225_v60 = vld [vmem:[#allocation7 + $0x18c] ss:$24 sps:$4 sm:$0xff]  }
 0x184   : > { %v1023_v37 = vmax.f32 %v744_v26, %v975_v33  ;;  %v1025_v38 = vmax.f32 %v785_v27, %v1016_v34  ;;  %2883 = vmatpush1.bf16.msra.mxu0 %v7124_v22  ;;  %v1028_v40 = vmax.f32 %v1022_v31, 0.0  ;;  %v7180_v22 = vld [vmem:[#allocation7 + $0xc] ss:$24 sps:$4 sm:$0xff]   ;;  %v7186_v27 = vld [vmem:[#allocation7 + $0x2dc] ss:$24 sps:$4 sm:$0xff]  }
 0x185   : > { %v977_v41 = vpop.f32.mrf.mxu0  ;;  %2884 = vmatprep.subr.bf16.mxu0 %v7132_v30  ;;  %v1018_v44 = vpop.f32.mrf.mxu1  ;;  %v7183_v26 = vld [vmem:[#allocation7 + $0x844] ss:$24 sps:$4 sm:$0xff]   ;;  %v7181_v28 = vld [vmem:[#allocation7 + $0x840] ss:$24 sps:$4 sm:$0xff]   ;;  %v7189_v30 = vld [vmem:[#allocation7 + $0x814] ss:$24 sps:$4 sm:$0xff]  }
 0x186   : > { %v1029_v45 = vmax.f32 %v1023_v37, 0.0  ;;  %v1031_v46 = vmax.f32 %v1025_v38, 0.0  ;;  %v8535_v55 = vpack.c.bf16 %v1028_v40, %v1028_v40  ;;  %v7192_v31 = vld [vmem:[#allocation7 + $0x2ac] ss:$24 sps:$4 sm:$0xff]   ;;  %v7187_v33 = vld [vmem:[#allocation7 + $0x810] ss:$24 sps:$4 sm:$0xff]  }
 0x187   : > { %v7190_v34 = vld [vmem:[#allocation7 + $0x2a8] ss:$24 sps:$4 sm:$0xff]   ;;  %v7195_v35 = vld [vmem:[#allocation7 + $0x7e4] ss:$24 sps:$4 sm:$0xff]   ;;  %v7196_v38 = vld [vmem:[#allocation7 + $0x278] ss:$24 sps:$4 sm:$0xff]  }
 0x188   : > { %v8531_v52 = vpack.c.bf16 %v1029_v45, %v1029_v45  ;;  %v8533_v54 = vpack.c.bf16 %v1031_v46, %v1031_v46  ;;  %2885 = vmatpush1.bf16.msra.mxu0 %v7130_v39  ;;  %v7198_v36 = vld [vmem:[#allocation7 + $0x27c] ss:$24 sps:$4 sm:$0xff]   ;;  %v7193_v37 = vld [vmem:[#allocation7 + $0x7e0] ss:$24 sps:$4 sm:$0xff]   ;;  %v7204_v40 = vld [vmem:[#allocation7 + $0x24c] ss:$24 sps:$4 sm:$0xff]  }
 0x189   : > { %2886 = vmatprep.subr.bf16.mxu0 %v7135_v42  ;;  %v7201_v39 = vld [vmem:[#allocation7 + $0x7b4] ss:$24 sps:$4 sm:$0xff]   ;;  %v7199_v41 = vld [vmem:[#allocation7 + $0x7b0] ss:$24 sps:$4 sm:$0xff]   ;;  %v7207_v44 = vld [vmem:[#allocation7 + $0x784] ss:$24 sps:$4 sm:$0xff]  }
 0x18a   : > { %2871 = vmatprep.mubr.bf16.mxu1 %v8531_v52  ;;  %2912 = vmatprep.mubr.bf16.mxu0 %v8533_v54  ;;  %v7202_v42 = vld [vmem:[#allocation7 + $0x248] ss:$24 sps:$4 sm:$0xff]   ;;  %v7210_v45 = vld [vmem:[#allocation7 + $0x21c] ss:$24 sps:$4 sm:$0xff]  }
 0x18b   : > { %2872 = vmatmul.mubr.bf16.vlgmr.msra.gmra.mxu1 %v8535_v55  ;;  %v7205_v46 = vld [vmem:[#allocation7 + $0x780] ss:$24 sps:$4 sm:$0xff]   ;;  %v7228_v25 = vld [vmem:[#allocation7 + $0x3fc] ss:$24 sps:$4 sm:$0xff]  }
 0x18c   : > { %2887 = vmatpush1.bf16.msra.mxu0 %v7133_v47  ;;  %2922 = vmatpush1.bf16.msra.mxu1 %v7136_v50  ;;  %v7208_v47 = vld [vmem:[#allocation7 + $0x218] ss:$24 sps:$4 sm:$0xff]   ;;  %v1030_v50 = vmax.f32 %v1024_v32, 0.0  ;;  %v7223_v32 = vld [vmem:[#allocation7 + $0x188] ss:$24 sps:$4 sm:$0xff]  }
 0x18d   : > { %2953 = vmatprep.mubr.bf16.mxu1 %v8517_v16  ;;  %2888 = vmatprep.subr.bf16.mxu0 %v7141_v51  ;;  %v7213_v51 = vld [vmem:[#allocation7 + $0x1ec] ss:$24 sps:$4 sm:$0xff]  }
 0x18e   : > { %2923 = vmatprep.subr.bf16.mxu1 %v7144_v56  ;;  %v7216_v56 = vld [vmem:[#allocation7 + $0x45c] ss:$24 sps:$4 sm:$0xff]  }
 0x190   : > { %2889 = vmatpush1.bf16.msra.mxu0 %v7139_v57  ;;  %2924 = vmatpush1.bf16.msra.mxu1 %v7142_v58  ;;  %v7211_v57 = vld [vmem:[#allocation7 + $0x1e8] ss:$24 sps:$4 sm:$0xff]   ;;  %v7214_v58 = vld [vmem:[#allocation7 + $0x458] ss:$24 sps:$4 sm:$0xff]  }
 0x191   : > { %2890 = vmatprep.subr.bf16.mxu0 %v7147_v59  ;;  %2925 = vmatprep.subr.bf16.mxu1 %v7150_v61  ;;  %v7219_v59 = vld [vmem:[#allocation7 + $0x1bc] ss:$24 sps:$4 sm:$0xff]   ;;  %v8544_v61 = vpack.c.bf16 %v1030_v50, %v1030_v50  ;;  %v7283_v50 = vld [vmem:[#allocation7 + $0x518] ss:$24 sps:$4 sm:$0xff]  }
 0x194   : > { %2891 = vmatpush1.bf16.msra.mxu0 %v7145_v62  ;;  %2926 = vmatpush1.bf16.msra.mxu1 %v7148_v63  ;;  %v7217_v62 = vld [vmem:[#allocation7 + $0x1b8] ss:$24 sps:$4 sm:$0xff]   ;;  %v7222_v63 = vld [vmem:[#allocation7 + $0x42c] ss:$24 sps:$4 sm:$0xff]  }
 0x195   : > { %2892 = vmatprep.subr.bf16.mxu0 %v7153_v0  ;;  %2927 = vmatprep.subr.bf16.mxu1 %v7156_v1  ;;  %v7220_v0 = vld [vmem:[#allocation7 + $0x428] ss:$24 sps:$4 sm:$0xff]   ;;  %v7226_v1 = vld [vmem:[#allocation7 + $0x3f8] ss:$24 sps:$4 sm:$0xff]  }
 0x198   : > { %2893 = vmatpush1.bf16.msra.mxu0 %v7151_v2  ;;  %2928 = vmatpush1.bf16.msra.mxu1 %v7154_v3  ;;  %v7231_v2 = vld [vmem:[#allocation7 + $0x3cc] ss:$24 sps:$4 sm:$0xff]   ;;  %v7234_v3 = vld [vmem:[#allocation7 + $0x75c] ss:$24 sps:$4 sm:$0xff]  }
 0x199   : > { %2894 = vmatprep.subr.bf16.mxu0 %v7159_v4  ;;  %2929 = vmatprep.subr.bf16.mxu1 %v7162_v6  ;;  %v7229_v4 = vld [vmem:[#allocation7 + $0x3c8] ss:$24 sps:$4 sm:$0xff]   ;;  %v7232_v6 = vld [vmem:[#allocation7 + $0x758] ss:$24 sps:$4 sm:$0xff]  }
 0x19c   : > { %2895 = vmatpush1.bf16.msra.mxu0 %v7157_v8  ;;  %2930 = vmatpush1.bf16.msra.mxu1 %v7160_v10  ;;  %v7237_v8 = vld [vmem:[#allocation7 + $0x39c] ss:$24 sps:$4 sm:$0xff]   ;;  %v7235_v10 = vld [vmem:[#allocation7 + $0x398] ss:$24 sps:$4 sm:$0xff]  }
 0x19d   : > { %2896 = vmatprep.subr.bf16.mxu0 %v7165_v11  ;;  %2931 = vmatprep.subr.bf16.mxu1 %v7168_v12  ;;  %v7238_v11 = vld [vmem:[#allocation7 + $0x728] ss:$24 sps:$4 sm:$0xff]   ;;  %v7240_v12 = vld [vmem:[#allocation7 + $0x72c] ss:$24 sps:$4 sm:$0xff]  }
 0x1a0   : > { %2897 = vmatpush2.bf16.msra.mxu0 %v7163_v13  ;;  %2932 = vmatpush1.bf16.msra.mxu1 %v7166_v14  ;;  %v7243_v13 = vld [vmem:[#allocation7 + $0x36c] ss:$24 sps:$4 sm:$0xff]   ;;  %v7246_v14 = vld [vmem:[#allocation7 + $0x6fc] ss:$24 sps:$4 sm:$0xff]  }
 0x1a1   : > { %2898 = vmatprep.subr.bf16.mxu0 %v7171_v15  ;;  %2933 = vmatprep.subr.bf16.mxu1 %v7174_v17  ;;  %v7241_v15 = vld [vmem:[#allocation7 + $0x368] ss:$24 sps:$4 sm:$0xff]   ;;  %v7244_v17 = vld [vmem:[#allocation7 + $0x6f8] ss:$24 sps:$4 sm:$0xff]  }
 0x1a4   : > { %2899 = vmatpush2.bf16.msra.mxu0 %v7169_v19  ;;  %2934 = vmatpush1.bf16.msra.mxu1 %v7172_v20  ;;  %v7249_v19 = vld [vmem:[#allocation7 + $0x33c] ss:$24 sps:$4 sm:$0xff]   ;;  %v7252_v20 = vld [vmem:[#allocation7 + $0x6cc] ss:$24 sps:$4 sm:$0xff]  }
 0x1a5   : > { %2900 = vmatprep.subr.bf16.mxu0 %v7177_v21  ;;  %2935 = vmatprep.subr.bf16.mxu1 %v7180_v22  ;;  %v7247_v21 = vld [vmem:[#allocation7 + $0x338] ss:$24 sps:$4 sm:$0xff]   ;;  %v7250_v22 = vld [vmem:[#allocation7 + $0x6c8] ss:$24 sps:$4 sm:$0xff]  }
 0x1a8   : > { %2901 = vmatpush2.bf16.msra.mxu0 %v7175_v23  ;;  %2936 = vmatpush1.bf16.msra.mxu1 %v7178_v24  ;;  %v7255_v23 = vld [vmem:[#allocation7 + $0x30c] ss:$24 sps:$4 sm:$0xff]   ;;  %v7258_v24 = vld [vmem:[#allocation7 + $0x69c] ss:$24 sps:$4 sm:$0xff]  }
 0x1a9   : > { %2902 = vmatprep.subr.bf16.mxu0 %v7183_v26  ;;  %2937 = vmatprep.subr.bf16.mxu1 %v7186_v27  ;;  %v7253_v26 = vld [vmem:[#allocation7 + $0x308] ss:$24 sps:$4 sm:$0xff]   ;;  %v7256_v27 = vld [vmem:[#allocation7 + $0x698] ss:$24 sps:$4 sm:$0xff]  }
 0x1ac   : > { %2903 = vmatpush2.bf16.msra.mxu0 %v7181_v28  ;;  %2938 = vmatpush2.bf16.msra.mxu1 %v7184_v29  ;;  %v7261_v28 = vld [vmem:[#allocation7 + $0x5dc] ss:$24 sps:$4 sm:$0xff]   ;;  %v7264_v29 = vld [vmem:[#allocation7 + $0x66c] ss:$24 sps:$4 sm:$0xff]  }
 0x1ad   : > { %2904 = vmatprep.subr.bf16.mxu0 %v7189_v30  ;;  %2939 = vmatprep.subr.bf16.mxu1 %v7192_v31  ;;  %v7259_v30 = vld [vmem:[#allocation7 + $0x5d8] ss:$24 sps:$4 sm:$0xff]   ;;  %v7262_v31 = vld [vmem:[#allocation7 + $0x668] ss:$24 sps:$4 sm:$0xff]  }
 0x1b0   : > { %2905 = vmatpush2.bf16.msra.mxu0 %v7187_v33  ;;  %2940 = vmatpush2.bf16.msra.mxu1 %v7190_v34  ;;  %v7267_v33 = vld [vmem:[#allocation7 + $0x5ac] ss:$24 sps:$4 sm:$0xff]   ;;  %v7270_v34 = vld [vmem:[#allocation7 + $0x63c] ss:$24 sps:$4 sm:$0xff]  }
 0x1b1   : > { %2906 = vmatprep.subr.bf16.mxu0 %v7195_v35  ;;  %2941 = vmatprep.subr.bf16.mxu1 %v7198_v36  ;;  %v7265_v35 = vld [vmem:[#allocation7 + $0x5a8] ss:$24 sps:$4 sm:$0xff]   ;;  %v7268_v36 = vld [vmem:[#allocation7 + $0x638] ss:$24 sps:$4 sm:$0xff]  }
 0x1b4   : > { %2907 = vmatpush2.bf16.msra.mxu0 %v7193_v37  ;;  %2942 = vmatpush2.bf16.msra.mxu1 %v7196_v38  ;;  %v7273_v37 = vld [vmem:[#allocation7 + $0x57c] ss:$24 sps:$4 sm:$0xff]   ;;  %v7276_v38 = vld [vmem:[#allocation7 + $0x60c] ss:$24 sps:$4 sm:$0xff]  }
 0x1b5   : > { %2908 = vmatprep.subr.bf16.mxu0 %v7201_v39  ;;  %2943 = vmatprep.subr.bf16.mxu1 %v7204_v40  ;;  %v7271_v39 = vld [vmem:[#allocation7 + $0x578] ss:$24 sps:$4 sm:$0xff]   ;;  %v7274_v40 = vld [vmem:[#allocation7 + $0x608] ss:$24 sps:$4 sm:$0xff]  }
 0x1b8   : > { %2909 = vmatpush2.bf16.msra.mxu0 %v7199_v41  ;;  %2944 = vmatpush2.bf16.msra.mxu1 %v7202_v42  ;;  %v7279_v41 = vld [vmem:[#allocation7 + $0x54c] ss:$24 sps:$4 sm:$0xff]   ;;  %v7282_v42 = vld [vmem:[#allocation7 + $0x8dc] ss:$24 sps:$4 sm:$0xff]  }
 0x1b9   : > { %2910 = vmatprep.subr.bf16.mxu0 %v7207_v44  ;;  %2945 = vmatprep.subr.bf16.mxu1 %v7210_v45  ;;  %v7277_v44 = vld [vmem:[#allocation7 + $0x548] ss:$24 sps:$4 sm:$0xff]   ;;  %v7280_v45 = vld [vmem:[#allocation7 + $0x8d8] ss:$24 sps:$4 sm:$0xff]  }
 0x1bc   : > { %2911 = vmatpush2.bf16.msra.mxu0 %v7205_v46  ;;  %2946 = vmatpush2.bf16.msra.mxu1 %v7208_v47  ;;  %v7285_v46 = vld [vmem:[#allocation7 + $0x51c] ss:$24 sps:$4 sm:$0xff]   ;;  %v7288_v47 = vld [vmem:[#allocation7 + $0x8ac] ss:$24 sps:$4 sm:$0xff]  }
 0x1bd   : > { %2947 = vmatprep.subr.bf16.mxu1 %v7213_v51  ;;  %2962 = vmatprep.subr.bf16.mxu0 %v7216_v56  ;;  %v7286_v51 = vld [vmem:[#allocation7 + $0x8a8] ss:$24 sps:$4 sm:$0xff]   ;;  %v7291_v56 = vld [vmem:[#allocation7 + $0x4ec] ss:$24 sps:$4 sm:$0xff]  }
 0x1bf   : > { %2913 = vmatmul.mubr.bf16.vlgmr.msra.gmra.mxu0 %v8544_v61 }
 0x1c0   : > { %2948 = vmatpush2.bf16.msra.mxu1 %v7211_v57  ;;  %2963 = vmatpush1.bf16.msra.mxu0 %v7214_v58  ;;  %v7294_v57 = vld [vmem:[#allocation7 + $0x87c] ss:$24 sps:$4 sm:$0xff]   ;;  %v7289_v58 = vld [vmem:[#allocation7 + $0x4e8] ss:$24 sps:$4 sm:$0xff]  }
 0x1c1   : > { %2994 = vmatprep.mubr.bf16.mxu0 %v8531_v52  ;;  %2949 = vmatprep.subr.bf16.mxu1 %v7219_v59  ;;  %v7292_v59 = vld [vmem:[#allocation7 + $0x878] ss:$24 sps:$4 sm:$0xff]  }
 0x1c2   : > { %2964 = vmatprep.subr.bf16.mxu0 %v7222_v63  ;;  %v7300_v63 = vld [vmem:[#allocation7 + $0x84c] ss:$24 sps:$4 sm:$0xff]  }
 0x1c4   : > { %2950 = vmatpush2.bf16.msra.mxu1 %v7217_v62  ;;  %2965 = vmatpush1.bf16.msra.mxu0 %v7220_v0  ;;  %v7297_v62 = vld [vmem:[#allocation7 + $0x4bc] ss:$24 sps:$4 sm:$0xff]   ;;  %v7295_v0 = vld [vmem:[#allocation7 + $0x4b8] ss:$24 sps:$4 sm:$0xff]  }
 0x1c5   : > { %2951 = vmatprep.subr.bf16.mxu1 %v7225_v60  ;;  %2966 = vmatprep.subr.bf16.mxu0 %v7228_v25  ;;  %v7298_v60 = vld [vmem:[#allocation7 + $0x848] ss:$24 sps:$4 sm:$0xff]   ;;  %v7303_v25 = vld [vmem:[#allocation7 + $0x48c] ss:$24 sps:$4 sm:$0xff]  }
 0x1c8   : > { %2952 = vmatpush2.bf16.msra.mxu1 %v7223_v32  ;;  %2967 = vmatpush1.bf16.msra.mxu0 %v7226_v1  ;;  %v7306_v32 = vld [vmem:[#allocation7 + $0x81c] ss:$24 sps:$4 sm:$0xff]   ;;  %v7301_v1 = vld [vmem:[#allocation7 + $0x488] ss:$24 sps:$4 sm:$0xff]  }
 0x1c9   : > { %2968 = vmatprep.subr.bf16.mxu0 %v7231_v2  ;;  %3003 = vmatprep.subr.bf16.mxu1 %v7234_v3  ;;  %v7304_v2 = vld [vmem:[#allocation7 + $0x818] ss:$24 sps:$4 sm:$0xff]   ;;  %v7309_v3 = vld [vmem:[#allocation7 + $0x7ec] ss:$24 sps:$4 sm:$0xff]  }
 0x1cb   : > { %2954 = vmatmul.mubr.bf16.vlgmr.msra.gmra.mxu1 %v8521_v18 }
 0x1cc   : > { %2969 = vmatpush1.bf16.msra.mxu0 %v7229_v4  ;;  %3004 = vmatpush1.bf16.msra.mxu1 %v7232_v6  ;;  %v7312_v4 = vld [vmem:[#allocation7 + $0x164] ss:$24 sps:$4 sm:$0xff]   ;;  %v7307_v6 = vld [vmem:[#allocation7 + $0x7e8] ss:$24 sps:$4 sm:$0xff]  }
 0x1cd   : > { %3035 = vmatprep.mubr.bf16.mxu1 %v8533_v54  ;;  %2970 = vmatprep.subr.bf16.mxu0 %v7237_v8  ;;  %v7310_v8 = vld [vmem:[#allocation7 + $0x160] ss:$24 sps:$4 sm:$0xff]  }
 0x1ce   : > { %3005 = vmatprep.subr.bf16.mxu1 %v7240_v12  ;;  %v7313_v12 = vld [vmem:[#allocation7 + $0x7b8] ss:$24 sps:$4 sm:$0xff]  }
 0x1d0   : > { %2971 = vmatpush1.bf16.msra.mxu0 %v7235_v10  ;;  %3006 = vmatpush1.bf16.msra.mxu1 %v7238_v11  ;;  %v7315_v10 = vld [vmem:[#allocation7 + $0x7bc] ss:$24 sps:$4 sm:$0xff]  }
 0x1d1   : > { %2972 = vmatprep.subr.bf16.mxu0 %v7243_v13  ;;  %3007 = vmatprep.subr.bf16.mxu1 %v7246_v14  ;;  %v7318_v11 = vld [vmem:[#allocation7 + $0x134] ss:$24 sps:$4 sm:$0xff]   ;;  %v7316_v13 = vld [vmem:[#allocation7 + $0x130] ss:$24 sps:$4 sm:$0xff]  }
 0x1d2   : > { %v7321_v14 = vld [vmem:[#allocation7 + $0x78c] ss:$24 sps:$4 sm:$0xff]  }
 0x1d4   : > { %2973 = vmatpush1.bf16.msra.mxu0 %v7241_v15  ;;  %3008 = vmatpush1.bf16.msra.mxu1 %v7244_v17  ;;  %v7324_v15 = vld [vmem:[#allocation7 + $0x104] ss:$24 sps:$4 sm:$0xff]   ;;  %v7319_v17 = vld [vmem:[#allocation7 + $0x788] ss:$24 sps:$4 sm:$0xff]  }
 0x1d5   : > { %2974 = vmatprep.subr.bf16.mxu0 %v7249_v19  ;;  %3009 = vmatprep.subr.bf16.mxu1 %v7252_v20  ;;  %v7322_v19 = vld [vmem:[#allocation7 + $0x100] ss:$24 sps:$4 sm:$0xff]   ;;  %v7327_v20 = vld [vmem:[#allocation7 + $0xd4] ss:$24 sps:$4 sm:$0xff]  }
 0x1d8   : > { %2975 = vmatpush1.bf16.msra.mxu0 %v7247_v21  ;;  %3010 = vmatpush1.bf16.msra.mxu1 %v7250_v22  ;;  %v7330_v21 = vld [vmem:[#allocation7 + $0x464] ss:$24 sps:$4 sm:$0xff]   ;;  %v7325_v22 = vld [vmem:[#allocation7 + $0xd0] ss:$24 sps:$4 sm:$0xff]  }
 0x1d9   : > { %2976 = vmatprep.subr.bf16.mxu0 %v7255_v23  ;;  %3011 = vmatprep.subr.bf16.mxu1 %v7258_v24  ;;  %v7328_v23 = vld [vmem:[#allocation7 + $0x460] ss:$24 sps:$4 sm:$0xff]   ;;  %v7333_v24 = vld [vmem:[#allocation7 + $0xa4] ss:$24 sps:$4 sm:$0xff]  }
 0x1dc   : > { %2977 = vmatpush1.bf16.msra.mxu0 %v7253_v26  ;;  %3012 = vmatpush1.bf16.msra.mxu1 %v7256_v27  ;;  %v7336_v26 = vld [vmem:[#allocation7 + $0x434] ss:$24 sps:$4 sm:$0xff]   ;;  %v7331_v27 = vld [vmem:[#allocation7 + $0xa0] ss:$24 sps:$4 sm:$0xff]  }
 0x1dd   : > { %2978 = vmatprep.subr.bf16.mxu0 %v7261_v28  ;;  %3013 = vmatprep.subr.bf16.mxu1 %v7264_v29  ;;  %v7334_v28 = vld [vmem:[#allocation7 + $0x430] ss:$24 sps:$4 sm:$0xff]   ;;  %v7339_v29 = vld [vmem:[#allocation7 + $0x74] ss:$24 sps:$4 sm:$0xff]  }
 0x1e0   : > { %2979 = vmatpush2.bf16.msra.mxu0 %v7259_v30  ;;  %3014 = vmatpush1.bf16.msra.mxu1 %v7262_v31  ;;  %v7342_v30 = vld [vmem:[#allocation7 + $0x404] ss:$24 sps:$4 sm:$0xff]   ;;  %v7337_v31 = vld [vmem:[#allocation7 + $0x70] ss:$24 sps:$4 sm:$0xff]  }
 0x1e1   : > { %2980 = vmatprep.subr.bf16.mxu0 %v7267_v33  ;;  %3015 = vmatprep.subr.bf16.mxu1 %v7270_v34  ;;  %v7340_v33 = vld [vmem:[#allocation7 + $0x400] ss:$24 sps:$4 sm:$0xff]   ;;  %v7345_v34 = vld [vmem:[#allocation7 + $0x44] ss:$24 sps:$4 sm:$0xff]  }
 0x1e4   : > { %2981 = vmatpush2.bf16.msra.mxu0 %v7265_v35  ;;  %3016 = vmatpush1.bf16.msra.mxu1 %v7268_v36  ;;  %v7348_v35 = vld [vmem:[#allocation7 + $0x3d4] ss:$24 sps:$4 sm:$0xff]   ;;  %v7343_v36 = vld [vmem:[#allocation7 + $0x40] ss:$24 sps:$4 sm:$0xff]  }
 0x1e5   : > { %2982 = vmatprep.subr.bf16.mxu0 %v7273_v37  ;;  %3017 = vmatprep.subr.bf16.mxu1 %v7276_v38  ;;  %v7346_v37 = vld [vmem:[#allocation7 + $0x3d0] ss:$24 sps:$4 sm:$0xff]   ;;  %v7351_v38 = vld [vmem:[#allocation7 + $0x14] ss:$24 sps:$4 sm:$0xff]  }
 0x1e8   : > { %2983 = vmatpush2.bf16.msra.mxu0 %v7271_v39  ;;  %3018 = vmatpush1.bf16.msra.mxu1 %v7274_v40  ;;  %v7354_v39 = vld [vmem:[#allocation7 + $0x3a4] ss:$24 sps:$4 sm:$0xff]   ;;  %v7349_v40 = vld [vmem:[#allocation7 + $0x10] ss:$24 sps:$4 sm:$0xff]  }
 0x1e9   : > { %2984 = vmatprep.subr.bf16.mxu0 %v7279_v41  ;;  %3019 = vmatprep.subr.bf16.mxu1 %v7282_v42  ;;  %v7352_v41 = vld [vmem:[#allocation7 + $0x3a0] ss:$24 sps:$4 sm:$0xff]   ;;  %v7357_v42 = vld [vmem:[#allocation7 + $0x2e4] ss:$24 sps:$4 sm:$0xff]  }
 0x1ec   : > { %2985 = vmatpush2.bf16.msra.mxu0 %v7277_v44  ;;  %3020 = vmatpush2.bf16.msra.mxu1 %v7280_v45  ;;  %v7360_v44 = vld [vmem:[#allocation7 + $0x374] ss:$24 sps:$4 sm:$0xff]   ;;  %v7355_v45 = vld [vmem:[#allocation7 + $0x2e0] ss:$24 sps:$4 sm:$0xff]  }
 0x1ed   : > { %2986 = vmatprep.subr.bf16.mxu0 %v7285_v46  ;;  %3021 = vmatprep.subr.bf16.mxu1 %v7288_v47  ;;  %v7358_v46 = vld [vmem:[#allocation7 + $0x370] ss:$24 sps:$4 sm:$0xff]   ;;  %v7363_v47 = vld [vmem:[#allocation7 + $0x2b4] ss:$24 sps:$4 sm:$0xff]  }
 0x1f0   : > { %2987 = vmatpush2.bf16.msra.mxu0 %v7283_v50  ;;  %3022 = vmatpush2.bf16.msra.mxu1 %v7286_v51  ;;  %v7366_v50 = vld [vmem:[#allocation7 + $0x344] ss:$24 sps:$4 sm:$0xff]   ;;  %v7361_v51 = vld [vmem:[#allocation7 + $0x2b0] ss:$24 sps:$4 sm:$0xff]  }
 0x1f1   : > { %2988 = vmatprep.subr.bf16.mxu0 %v7291_v56  ;;  %3023 = vmatprep.subr.bf16.mxu1 %v7294_v57  ;;  %v7364_v56 = vld [vmem:[#allocation7 + $0x340] ss:$24 sps:$4 sm:$0xff]   ;;  %v7369_v57 = vld [vmem:[#allocation7 + $0x284] ss:$24 sps:$4 sm:$0xff]  }
 0x1f4   : > { %2989 = vmatpush2.bf16.msra.mxu0 %v7289_v58  ;;  %3024 = vmatpush2.bf16.msra.mxu1 %v7292_v59  ;;  %v7372_v58 = vld [vmem:[#allocation7 + $0x314] ss:$24 sps:$4 sm:$0xff]   ;;  %v7367_v59 = vld [vmem:[#allocation7 + $0x280] ss:$24 sps:$4 sm:$0xff]  }
 0x1f5   : > { %2990 = vmatprep.subr.bf16.mxu0 %v7297_v62  ;;  %3025 = vmatprep.subr.bf16.mxu1 %v7300_v63  ;;  %v7370_v62 = vld [vmem:[#allocation7 + $0x310] ss:$24 sps:$4 sm:$0xff]   ;;  %v7375_v63 = vld [vmem:[#allocation7 + $0x254] ss:$24 sps:$4 sm:$0xff]  }
 0x1f8   : > { %2991 = vmatpush2.bf16.msra.mxu0 %v7295_v0  ;;  %3026 = vmatpush2.bf16.msra.mxu1 %v7298_v60  ;;  %v7378_v0 = vld [vmem:[#allocation7 + $0x5e4] ss:$24 sps:$4 sm:$0xff]   ;;  %v7373_v60 = vld [vmem:[#allocation7 + $0x250] ss:$24 sps:$4 sm:$0xff]  }
 0x1f9   : > { %2992 = vmatprep.subr.bf16.mxu0 %v7303_v25  ;;  %3027 = vmatprep.subr.bf16.mxu1 %v7306_v32  ;;  %v7376_v25 = vld [vmem:[#allocation7 + $0x5e0] ss:$24 sps:$4 sm:$0xff]   ;;  %v7381_v32 = vld [vmem:[#allocation7 + $0x224] ss:$24 sps:$4 sm:$0xff]  }
 0x1fc   : > { %2993 = vmatpush2.bf16.msra.mxu0 %v7301_v1  ;;  %3028 = vmatpush2.bf16.msra.mxu1 %v7304_v2  ;;  %v7384_v1 = vld [vmem:[#allocation7 + $0x5b4] ss:$24 sps:$4 sm:$0xff]   ;;  %v7379_v2 = vld [vmem:[#allocation7 + $0x220] ss:$24 sps:$4 sm:$0xff]  }
 0x1fd   : > { %3029 = vmatprep.subr.bf16.mxu1 %v7309_v3  ;;  %3044 = vmatprep.subr.bf16.mxu0 %v7312_v4  ;;  %v7382_v3 = vld [vmem:[#allocation7 + $0x5b0] ss:$24 sps:$4 sm:$0xff]   ;;  %v7387_v4 = vld [vmem:[#allocation7 + $0x1f4] ss:$24 sps:$4 sm:$0xff]  }
 0x1ff   : > { %2995 = vmatmul.mubr.bf16.vlgmr.msra.gmra.mxu0 %v8535_v55 }
 0x200   : > { %3030 = vmatpush2.bf16.msra.mxu1 %v7307_v6  ;;  %3045 = vmatpush1.bf16.msra.mxu0 %v7310_v8  ;;  %v7390_v6 = vld [vmem:[#allocation7 + $0x584] ss:$24 sps:$4 sm:$0xff]   ;;  %v7385_v8 = vld [vmem:[#allocation7 + $0x1f0] ss:$24 sps:$4 sm:$0xff]  }
 0x201   : > { %3076 = vmatprep.mubr.bf16.mxu0 %v8517_v16  ;;  %3031 = vmatprep.subr.bf16.mxu1 %v7315_v10  ;;  %v7388_v10 = vld [vmem:[#allocation7 + $0x580] ss:$24 sps:$4 sm:$0xff]  }
 0x202   : > { %3046 = vmatprep.subr.bf16.mxu0 %v7318_v11  ;;  %v7393_v11 = vld [vmem:[#allocation7 + $0x1c4] ss:$24 sps:$4 sm:$0xff]  }
 0x204   : > { %3032 = vmatpush2.bf16.msra.mxu1 %v7313_v12  ;;  %3047 = vmatpush1.bf16.msra.mxu0 %v7316_v13  ;;  %v7396_v12 = vld [vmem:[#allocation7 + $0x554] ss:$24 sps:$4 sm:$0xff]   ;;  %v7391_v13 = vld [vmem:[#allocation7 + $0x1c0] ss:$24 sps:$4 sm:$0xff]  }
 0x205   : > { %3033 = vmatprep.subr.bf16.mxu1 %v7321_v14  ;;  %3048 = vmatprep.subr.bf16.mxu0 %v7324_v15  ;;  %v7394_v14 = vld [vmem:[#allocation7 + $0x550] ss:$24 sps:$4 sm:$0xff]   ;;  %v7399_v15 = vld [vmem:[#allocation7 + $0x194] ss:$24 sps:$4 sm:$0xff]  }
 0x208   : > { %3034 = vmatpush2.bf16.msra.mxu1 %v7319_v17  ;;  %3049 = vmatpush1.bf16.msra.mxu0 %v7322_v19  ;;  %v7402_v17 = vld [vmem:[#allocation7 + $0x524] ss:$24 sps:$4 sm:$0xff]   ;;  %v7397_v19 = vld [vmem:[#allocation7 + $0x190] ss:$24 sps:$4 sm:$0xff]  }
 0x209   : > { %3050 = vmatprep.subr.bf16.mxu0 %v7327_v20  ;;  %3085 = vmatprep.subr.bf16.mxu1 %v7330_v21  ;;  %v7400_v20 = vld [vmem:[#allocation7 + $0x520] ss:$24 sps:$4 sm:$0xff]   ;;  %v7405_v21 = vld [vmem:[#allocation7 + $0x4f4] ss:$24 sps:$4 sm:$0xff]  }
 0x20b   : > { %3036 = vmatmul.mubr.bf16.vlgmr.msra.gmra.mxu1 %v8544_v61 }
 0x20c   : > { %3051 = vmatpush1.bf16.msra.mxu0 %v7325_v22  ;;  %3086 = vmatpush1.bf16.msra.mxu1 %v7328_v23  ;;  %v7408_v22 = vld [vmem:[#allocation7 + $0x764] ss:$24 sps:$4 sm:$0xff]   ;;  %v7403_v23 = vld [vmem:[#allocation7 + $0x4f0] ss:$24 sps:$4 sm:$0xff]  }
 0x20d   : > { %3117 = vmatprep.mubr.bf16.mxu1 %v8531_v52  ;;  %3052 = vmatprep.subr.bf16.mxu0 %v7333_v24  ;;  %v7406_v24 = vld [vmem:[#allocation7 + $0x760] ss:$24 sps:$4 sm:$0xff]  }
 0x20e   : > { %3087 = vmatprep.subr.bf16.mxu1 %v7336_v26  ;;  %v7411_v26 = vld [vmem:[#allocation7 + $0x4c4] ss:$24 sps:$4 sm:$0xff]  }
 0x210   : > { %3053 = vmatpush1.bf16.msra.mxu0 %v7331_v27  ;;  %3088 = vmatpush1.bf16.msra.mxu1 %v7334_v28  ;;  %v7414_v27 = vld [vmem:[#allocation7 + $0x734] ss:$24 sps:$4 sm:$0xff]  }
 0x211   : > { %3054 = vmatprep.subr.bf16.mxu0 %v7339_v29  ;;  %3089 = vmatprep.subr.bf16.mxu1 %v7342_v30  ;;  %v7409_v29 = vld [vmem:[#allocation7 + $0x4c0] ss:$24 sps:$4 sm:$0xff]   ;;  %v7412_v30 = vld [vmem:[#allocation7 + $0x730] ss:$24 sps:$4 sm:$0xff]  }
 0x214   : > { %3055 = vmatpush1.bf16.msra.mxu0 %v7337_v31  ;;  %3090 = vmatpush1.bf16.msra.mxu1 %v7340_v33  ;;  %v7417_v33 = vld [vmem:[#allocation7 + $0x494] ss:$24 sps:$4 sm:$0xff]  }
 0x215   : > { %3056 = vmatprep.subr.bf16.mxu0 %v7345_v34  ;;  %3091 = vmatprep.subr.bf16.mxu1 %v7348_v35  ;;  %v7420_v34 = vld [vmem:[#allocation7 + $0x704] ss:$24 sps:$4 sm:$0xff]  }
 0x216   : > { %v8556_v35 = vld [vmem:[#allocation10] sm:$0x3f] }
 0x218   : > { %3057 = vmatpush1.bf16.msra.mxu0 %v7343_v36  ;;  %3092 = vmatpush1.bf16.msra.mxu1 %v7346_v37  ;;  %v7415_v37 = vld [vmem:[#allocation7 + $0x490] ss:$24 sps:$4 sm:$0xff]  }
 0x219   : > { %3058 = vmatprep.subr.bf16.mxu0 %v7351_v38  ;;  %3093 = vmatprep.subr.bf16.mxu1 %v7354_v39  ;;  %v7418_v38 = vld [vmem:[#allocation7 + $0x700] ss:$24 sps:$4 sm:$0xff]  }
 0x21c   : > { %3059 = vmatpush1.bf16.msra.mxu0 %v7349_v40  ;;  %3094 = vmatpush1.bf16.msra.mxu1 %v7352_v41  ;;  %v7423_v40 = vld [vmem:[#allocation7 + $0x6d4] ss:$24 sps:$4 sm:$0xff]  }
 0x21d   : > { %3060 = vmatprep.subr.bf16.mxu0 %v7357_v42  ;;  %3095 = vmatprep.subr.bf16.mxu1 %v7360_v44  ;;  %v7426_v41 = vld [vmem:[#allocation9 + $0x154] ss:$24 sps:$4 sm:$0xff]   ;;  %v8561_v42 = vrot.slane %v8556_v35, %v544_v48  ;;  %v8566_v44 = vrot.slane %v8556_v35, %v548_v53  ;;  %v7427_v53 = vld [vmem:[#allocation7 + $0x6a0] ss:$24 sps:$4 sm:$0xff]  }
 0x220   : > { %3061 = vmatpush2.bf16.msra.mxu0 %v7355_v45  ;;  %3096 = vmatpush1.bf16.msra.mxu1 %v7358_v46  ;;  %v7421_v45 = vld [vmem:[#allocation7 + $0x6d0] ss:$24 sps:$4 sm:$0xff]  }
 0x221   : > { %3062 = vmatprep.subr.bf16.mxu0 %v7363_v47  ;;  %3097 = vmatprep.subr.bf16.mxu1 %v7366_v50  ;;  %v7424_v46 = vld [vmem:[#allocation9 + $0x150] ss:$24 sps:$4 sm:$0xff]   ;;  %v7429_v47 = vld [vmem:[#allocation7 + $0x6a4] ss:$24 sps:$4 sm:$0xff]  }
 0x224   : > { %3063 = vmatpush2.bf16.msra.mxu0 %v7361_v51  ;;  %3098 = vmatpush1.bf16.msra.mxu1 %v7364_v56  ;;  %v7432_v51 = vld [vmem:[#allocation9 + $0x124] ss:$24 sps:$4 sm:$0xff]  }
 0x225   : > { %3064 = vmatprep.subr.bf16.mxu0 %v7369_v57  ;;  %3099 = vmatprep.subr.bf16.mxu1 %v7372_v58  ;;  %v7430_v58 = vld [vmem:[#allocation9 + $0x120] ss:$24 sps:$4 sm:$0xff]  }
 0x228   : > { %3065 = vmatpush2.bf16.msra.mxu0 %v7367_v59  ;;  %3100 = vmatpush1.bf16.msra.mxu1 %v7370_v62  ;;  %v7435_v62 = vld [vmem:[#allocation7 + $0x674] ss:$24 sps:$4 sm:$0xff]  }
 0x229   : > { %3066 = vmatprep.subr.bf16.mxu0 %v7375_v63  ;;  %3101 = vmatprep.subr.bf16.mxu1 %v7378_v0  ;;  %v7438_v63 = vld [vmem:[#allocation9 + $0xf4] ss:$24 sps:$4 sm:$0xff]  }
 0x22c   : > { %3067 = vmatpush2.bf16.msra.mxu0 %v7373_v60  ;;  %3102 = vmatpush2.bf16.msra.mxu1 %v7376_v25  ;;  %v7433_v25 = vld [vmem:[#allocation7 + $0x670] ss:$24 sps:$4 sm:$0xff]  }
 0x22d   : > { %3068 = vmatprep.subr.bf16.mxu0 %v7381_v32  ;;  %3103 = vmatprep.subr.bf16.mxu1 %v7384_v1  ;;  %v7436_v32 = vld [vmem:[#allocation9 + $0xf0] ss:$24 sps:$4 sm:$0xff]  }
 0x230   : > { %3069 = vmatpush2.bf16.msra.mxu0 %v7379_v2  ;;  %3104 = vmatpush2.bf16.msra.mxu1 %v7382_v3  ;;  %v7441_v2 = vld [vmem:[#allocation7 + $0x644] ss:$24 sps:$4 sm:$0xff]  }
 0x231   : > { %3070 = vmatprep.subr.bf16.mxu0 %v7387_v4  ;;  %3105 = vmatprep.subr.bf16.mxu1 %v7390_v6  ;;  %v7444_v3 = vld [vmem:[#allocation9 + $0xc4] ss:$24 sps:$4 sm:$0xff]   ;;  %v7439_v4 = vld [vmem:[#allocation7 + $0x640] ss:$24 sps:$4 sm:$0xff]  }
 0x232   : > { %v7442_v6 = vld [vmem:[#allocation9 + $0xc0] ss:$24 sps:$4 sm:$0xff]  }
 0x234   : > { %3071 = vmatpush2.bf16.msra.mxu0 %v7385_v8  ;;  %3106 = vmatpush2.bf16.msra.mxu1 %v7388_v10  ;;  %v7447_v8 = vld [vmem:[#allocation7 + $0x614] ss:$24 sps:$4 sm:$0xff]  }
 0x235   : > { %3072 = vmatprep.subr.bf16.mxu0 %v7393_v11  ;;  %3107 = vmatprep.subr.bf16.mxu1 %v7396_v12  ;;  %v7450_v10 = vld [vmem:[#allocation9 + $0x94] ss:$24 sps:$4 sm:$0xff]   ;;  %v7445_v11 = vld [vmem:[#allocation7 + $0x610] ss:$24 sps:$4 sm:$0xff]  }
 0x236   : > { %v7448_v12 = vld [vmem:[#allocation9 + $0x90] ss:$24 sps:$4 sm:$0xff]  }
 0x238   : > { %3073 = vmatpush2.bf16.msra.mxu0 %v7391_v13  ;;  %3108 = vmatpush2.bf16.msra.mxu1 %v7394_v14  ;;  %v7453_v13 = vld [vmem:[#allocation7 + $0x8e4] ss:$24 sps:$4 sm:$0xff]  }
 0x239   : > { %3074 = vmatprep.subr.bf16.mxu0 %v7399_v15  ;;  %3109 = vmatprep.subr.bf16.mxu1 %v7402_v17  ;;  %v7456_v14 = vld [vmem:[#allocation9 + $0x64] ss:$24 sps:$4 sm:$0xff]   ;;  %v7451_v15 = vld [vmem:[#allocation7 + $0x8e0] ss:$24 sps:$4 sm:$0xff]  }
 0x23a   : > { %v7454_v17 = vld [vmem:[#allocation9 + $0x60] ss:$24 sps:$4 sm:$0xff]  }
 0x23c   : > { %3075 = vmatpush2.bf16.msra.mxu0 %v7397_v19  ;;  %3110 = vmatpush2.bf16.msra.mxu1 %v7400_v20  ;;  %v7459_v19 = vld [vmem:[#allocation7 + $0x8b4] ss:$24 sps:$4 sm:$0xff]  }
 0x23d   : > { %3111 = vmatprep.subr.bf16.mxu1 %v7405_v21  ;;  %3126 = vmatprep.subr.bf16.mxu0 %v7408_v22  ;;  %v7462_v20 = vld [vmem:[#allocation9 + $0x34] ss:$24 sps:$4 sm:$0xff]   ;;  %v7457_v21 = vld [vmem:[#allocation7 + $0x8b0] ss:$24 sps:$4 sm:$0xff]  }
 0x23e   : > { %v7460_v22 = vld [vmem:[#allocation9 + $0x30] ss:$24 sps:$4 sm:$0xff]  }
 0x23f   : > { %3077 = vmatmul.mubr.bf16.vlgmr.msra.gmra.mxu0 %v8521_v18  ;;  %v2832_v28 = vpop.f32.mrf.mxu0 }
 0x240   : > { %3112 = vmatpush2.bf16.msra.mxu1 %v7403_v23  ;;  %3127 = vmatpush1.bf16.msra.mxu0 %v7406_v24  ;;  %v2833_v50 = vadd.f32 %v2832_v28, %v8561_v42  ;;  %v7465_v23 = vld [vmem:[#allocation7 + $0x884] ss:$24 sps:$4 sm:$0xff]   ;;  %v7471_v28 = vld [vmem:[#allocation7 + $0x854] ss:$24 sps:$4 sm:$0xff]  }
 0x241   : > { %3158 = vmatprep.mubr.bf16.mxu0 %v8533_v54  ;;  %v2834_v31 = vpop.f32.mrf.mxu0  ;;  %3113 = vmatprep.subr.bf16.mxu1 %v7411_v26  ;;  %v7468_v24 = vld [vmem:[#allocation9 + $0x4] ss:$24 sps:$4 sm:$0xff]   ;;  %v7463_v26 = vld [vmem:[#allocation7 + $0x880] ss:$24 sps:$4 sm:$0xff]  }
 0x242   : > { %3128 = vmatprep.subr.bf16.mxu0 %v7414_v27  ;;  %v2835_v48 = vadd.f32 %v2834_v31, %v8566_v44  ;;  %v7466_v27 = vld [vmem:[#allocation9] ss:$24 sps:$4 sm:$0xff]   ;;  %v7472_v31 = vld [vmem:[#allocation9 + $0x2d0] ss:$24 sps:$4 sm:$0xff]  }
 0x243   : > { %v2836_v36 = vpop.f32.mrf.mxu0 }
 0x244   : > { %3114 = vmatpush2.bf16.msra.mxu1 %v7409_v29  ;;  %3129 = vmatpush1.bf16.msra.mxu0 %v7412_v30  ;;  %v7474_v29 = vld [vmem:[#allocation9 + $0x2d4] ss:$24 sps:$4 sm:$0xff]   ;;  %v7469_v30 = vld [vmem:[#allocation7 + $0x850] ss:$24 sps:$4 sm:$0xff]   ;;  %v7475_v36 = vld [vmem:[#allocation7 + $0x820] ss:$24 sps:$4 sm:$0xff]  }
 0x245   : > { %v2837_v39 = vpop.f32.mrf.mxu0  ;;  %3115 = vmatprep.subr.bf16.mxu1 %v7417_v33  ;;  %3130 = vmatprep.subr.bf16.mxu0 %v7420_v34  ;;  %v7477_v33 = vld [vmem:[#allocation7 + $0x824] ss:$24 sps:$4 sm:$0xff]  }
 0x246   : > { %v7480_v34 = vld [vmem:[#allocation9 + $0x2a4] ss:$24 sps:$4 sm:$0xff]   ;;  %v7486_v39 = vld [vmem:[#allocation9 + $0x274] ss:$24 sps:$4 sm:$0xff]  }
 0x248   : > { %3116 = vmatpush2.bf16.msra.mxu1 %v7415_v37  ;;  %3131 = vmatpush1.bf16.msra.mxu0 %v7418_v38  ;;  %v7478_v37 = vld [vmem:[#allocation9 + $0x2a0] ss:$24 sps:$4 sm:$0xff]   ;;  %v7483_v38 = vld [vmem:[#allocation7 + $0x7f4] ss:$24 sps:$4 sm:$0xff]  }
 0x249   : > { %3132 = vmatprep.subr.bf16.mxu0 %v7423_v40  ;;  %4895 = vmatprep.subr.bf16.mxu1 %v7426_v41  ;;  %v7481_v40 = vld [vmem:[#allocation7 + $0x7f0] ss:$24 sps:$4 sm:$0xff]  }
 0x24a   : > { %v7484_v41 = vld [vmem:[#allocation9 + $0x270] ss:$24 sps:$4 sm:$0xff]  }
 0x24b   : > { %3118 = vmatmul.mubr.bf16.vlgmr.msra.gmra.mxu1 %v8535_v55  ;;  %v2873_v56 = vpop.f32.mrf.mxu1 }
 0x24c   : > { %v8571_v57 = vadd.f32 %v2873_v56, %v2833_v50  ;;  %3133 = vmatpush1.bf16.msra.mxu0 %v7421_v45  ;;  %4896 = vmatpush1.bf16.msra.mxu1 %v7424_v46  ;;  %v7489_v45 = vld [vmem:[#allocation7 + $0x7c4] ss:$24 sps:$4 sm:$0xff]   ;;  %v7490_v50 = vld [vmem:[#allocation9 + $0x240] ss:$24 sps:$4 sm:$0xff]   ;;  %v7498_v56 = vld [vmem:[#allocation9 + $0x214] ss:$24 sps:$4 sm:$0xff]  }
 0x24d   : > { %4927 = vmatprep.mubr.bf16.mxu1 %v8517_v16  ;;  %v2875_v59 = vpop.f32.mrf.mxu1  ;;  %3134 = vmatprep.subr.bf16.mxu0 %v7429_v47  ;;  %v7492_v46 = vld [vmem:[#allocation9 + $0x244] ss:$24 sps:$4 sm:$0xff]   ;;  %v7487_v47 = vld [vmem:[#allocation7 + $0x7c0] ss:$24 sps:$4 sm:$0xff]  }
 0x24e   : > { %v8574_v0 = vadd.f32 %v2875_v59, %v2835_v48  ;;  %4897 = vmatprep.subr.bf16.mxu1 %v7432_v51  ;;  %v7495_v51 = vld [vmem:[#allocation7 + $0x794] ss:$24 sps:$4 sm:$0xff]   ;;  %v7493_v48 = vld [vmem:[#allocation7 + $0x790] ss:$24 sps:$4 sm:$0xff]  }
 0x24f   : > { %v2877_v60 = vpop.f32.mrf.mxu1  ;;  %v7504_v59 = vld [vmem:[#allocation9 + $0x454] ss:$24 sps:$4 sm:$0xff]  }
 0x250   : > { %3135 = vmatpush1.bf16.msra.mxu0 %v7427_v53  ;;  %4898 = vmatpush1.bf16.msra.mxu1 %v7430_v58  ;;  %v7496_v53 = vld [vmem:[#allocation9 + $0x210] ss:$24 sps:$4 sm:$0xff]   ;;  %v7501_v58 = vld [vmem:[#allocation9 + $0x1e4] ss:$24 sps:$4 sm:$0xff]   ;;  %v7507_v60 = vld [vmem:[#allocation9 + $0x1b4] ss:$24 sps:$4 sm:$0xff]  }
 0x251   : > { %v2878_v1 = vpop.f32.mrf.mxu1  ;;  %3136 = vmatprep.subr.bf16.mxu0 %v7435_v62  ;;  %4899 = vmatprep.subr.bf16.mxu1 %v7438_v63  ;;  %v7499_v62 = vld [vmem:[#allocation9 + $0x1e0] ss:$24 sps:$4 sm:$0xff]   ;;  %v7502_v63 = vld [vmem:[#allocation9 + $0x450] ss:$24 sps:$4 sm:$0xff]  }
 0x254   : > { %3137 = vmatpush1.bf16.msra.mxu0 %v7433_v25  ;;  %4900 = vmatpush1.bf16.msra.mxu1 %v7436_v32  ;;  %v7510_v25 = vld [vmem:[#allocation9 + $0x424] ss:$24 sps:$4 sm:$0xff]  }
 0x255   : > { %3138 = vmatprep.subr.bf16.mxu0 %v7441_v2  ;;  %4901 = vmatprep.subr.bf16.mxu1 %v7444_v3  ;;  %v7505_v2 = vld [vmem:[#allocation9 + $0x1b0] ss:$24 sps:$4 sm:$0xff]   ;;  %v7508_v3 = vld [vmem:[#allocation9 + $0x420] ss:$24 sps:$4 sm:$0xff]  }
 0x258   : > { %3139 = vmatpush1.bf16.msra.mxu0 %v7439_v4  ;;  %4902 = vmatpush1.bf16.msra.mxu1 %v7442_v6  ;;  %v7513_v6 = vld [vmem:[#allocation9 + $0x184] ss:$24 sps:$4 sm:$0xff]  }
 0x259   : > { %3140 = vmatprep.subr.bf16.mxu0 %v7447_v8  ;;  %4903 = vmatprep.subr.bf16.mxu1 %v7450_v10  ;;  %v7516_v8 = vld [vmem:[#allocation9 + $0x3f4] ss:$24 sps:$4 sm:$0xff]  }
 0x25c   : > { %3141 = vmatpush1.bf16.msra.mxu0 %v7445_v11  ;;  %4904 = vmatpush1.bf16.msra.mxu1 %v7448_v12  ;;  %v7511_v12 = vld [vmem:[#allocation9 + $0x180] ss:$24 sps:$4 sm:$0xff]  }
 0x25d   : > { %3142 = vmatprep.subr.bf16.mxu0 %v7453_v13  ;;  %4905 = vmatprep.subr.bf16.mxu1 %v7456_v14  ;;  %v7519_v14 = vld [vmem:[#allocation9 + $0x3c4] ss:$24 sps:$4 sm:$0xff]  }
 0x260   : > { %3143 = vmatpush2.bf16.msra.mxu0 %v7451_v15  ;;  %4906 = vmatpush1.bf16.msra.mxu1 %v7454_v17  ;;  %v7522_v15 = vld [vmem:[#allocation9 + $0x754] ss:$24 sps:$4 sm:$0xff]   ;;  %v7517_v17 = vld [vmem:[#allocation9 + $0x3c0] ss:$24 sps:$4 sm:$0xff]  }
 0x261   : > { %3144 = vmatprep.subr.bf16.mxu0 %v7459_v19  ;;  %4907 = vmatprep.subr.bf16.mxu1 %v7462_v20  ;;  %v7520_v19 = vld [vmem:[#allocation9 + $0x750] ss:$24 sps:$4 sm:$0xff]   ;;  %v7525_v20 = vld [vmem:[#allocation9 + $0x394] ss:$24 sps:$4 sm:$0xff]  }
 0x264   : > { %3145 = vmatpush2.bf16.msra.mxu0 %v7457_v21  ;;  %4908 = vmatpush1.bf16.msra.mxu1 %v7460_v22  ;;  %v7523_v22 = vld [vmem:[#allocation9 + $0x390] ss:$24 sps:$4 sm:$0xff]  }
 0x265   : > { %3146 = vmatprep.subr.bf16.mxu0 %v7465_v23  ;;  %4909 = vmatprep.subr.bf16.mxu1 %v7468_v24  ;;  %v7526_v23 = vld [vmem:[#allocation9 + $0x720] ss:$24 sps:$4 sm:$0xff]  }
 0x268   : > { %3147 = vmatpush2.bf16.msra.mxu0 %v7463_v26  ;;  %4910 = vmatpush1.bf16.msra.mxu1 %v7466_v27  ;;  %v7531_v26 = vld [vmem:[#allocation9 + $0x364] ss:$24 sps:$4 sm:$0xff]   ;;  %v7534_v27 = vld [vmem:[#allocation9 + $0x6f4] ss:$24 sps:$4 sm:$0xff]  }
 0x269   : > { %3148 = vmatprep.subr.bf16.mxu0 %v7471_v28  ;;  %4911 = vmatprep.subr.bf16.mxu1 %v7474_v29  ;;  %v7529_v29 = vld [vmem:[#allocation9 + $0x360] ss:$24 sps:$4 sm:$0xff]  }
 0x26c   : > { %3149 = vmatpush2.bf16.msra.mxu0 %v7469_v30  ;;  %4912 = vmatpush2.bf16.msra.mxu1 %v7472_v31  ;;  %v7532_v30 = vld [vmem:[#allocation9 + $0x6f0] ss:$24 sps:$4 sm:$0xff]  }
 0x26d   : > { %3150 = vmatprep.subr.bf16.mxu0 %v7477_v33  ;;  %4913 = vmatprep.subr.bf16.mxu1 %v7480_v34  ;;  %v7537_v33 = vld [vmem:[#allocation9 + $0x334] ss:$24 sps:$4 sm:$0xff]   ;;  %v7540_v34 = vld [vmem:[#allocation9 + $0x6c4] ss:$24 sps:$4 sm:$0xff]  }
 0x270   : > { %3151 = vmatpush2.bf16.msra.mxu0 %v7475_v36  ;;  %4914 = vmatpush2.bf16.msra.mxu1 %v7478_v37  ;;  %v7535_v36 = vld [vmem:[#allocation9 + $0x330] ss:$24 sps:$4 sm:$0xff]   ;;  %v7538_v37 = vld [vmem:[#allocation9 + $0x6c0] ss:$24 sps:$4 sm:$0xff]  }
 0x271   : > { %3152 = vmatprep.subr.bf16.mxu0 %v7483_v38  ;;  %4915 = vmatprep.subr.bf16.mxu1 %v7486_v39  ;;  %v7543_v38 = vld [vmem:[#allocation9 + $0x304] ss:$24 sps:$4 sm:$0xff]   ;;  %v7546_v39 = vld [vmem:[#allocation9 + $0x694] ss:$24 sps:$4 sm:$0xff]  }
 0x274   : > { %3153 = vmatpush2.bf16.msra.mxu0 %v7481_v40  ;;  %4916 = vmatpush2.bf16.msra.mxu1 %v7484_v41  ;;  %v7541_v40 = vld [vmem:[#allocation9 + $0x300] ss:$24 sps:$4 sm:$0xff]   ;;  %v7544_v41 = vld [vmem:[#allocation9 + $0x690] ss:$24 sps:$4 sm:$0xff]  }
 0x275   : > { %3154 = vmatprep.subr.bf16.mxu0 %v7489_v45  ;;  %4917 = vmatprep.subr.bf16.mxu1 %v7492_v46  ;;  %v7549_v45 = vld [vmem:[#allocation9 + $0x5d4] ss:$24 sps:$4 sm:$0xff]   ;;  %v7552_v46 = vld [vmem:[#allocation9 + $0x664] ss:$24 sps:$4 sm:$0xff]  }
 0x278   : > { %3155 = vmatpush2.bf16.msra.mxu0 %v7487_v47  ;;  %4918 = vmatpush2.bf16.msra.mxu1 %v7490_v50  ;;  %v7547_v47 = vld [vmem:[#allocation9 + $0x5d0] ss:$24 sps:$4 sm:$0xff]   ;;  %v7550_v50 = vld [vmem:[#allocation9 + $0x660] ss:$24 sps:$4 sm:$0xff]  }
 0x279   : > { %3156 = vmatprep.subr.bf16.mxu0 %v7495_v51  ;;  %4919 = vmatprep.subr.bf16.mxu1 %v7498_v56  ;;  %v7555_v51 = vld [vmem:[#allocation9 + $0x5a4] ss:$24 sps:$4 sm:$0xff]   ;;  %v7558_v56 = vld [vmem:[#allocation9 + $0x634] ss:$24 sps:$4 sm:$0xff]  }
 0x27c   : > { %3157 = vmatpush2.bf16.msra.mxu0 %v7493_v48  ;;  %4920 = vmatpush2.bf16.msra.mxu1 %v7496_v53  ;;  %v7553_v48 = vld [vmem:[#allocation9 + $0x5a0] ss:$24 sps:$4 sm:$0xff]   ;;  %v7556_v53 = vld [vmem:[#allocation9 + $0x630] ss:$24 sps:$4 sm:$0xff]  }
 0x27d   : > { %4921 = vmatprep.subr.bf16.mxu1 %v7501_v58  ;;  %4936 = vmatprep.subr.bf16.mxu0 %v7504_v59  ;;  %v7561_v58 = vld [vmem:[#allocation9 + $0x574] ss:$24 sps:$4 sm:$0xff]   ;;  %v7564_v59 = vld [vmem:[#allocation9 + $0x604] ss:$24 sps:$4 sm:$0xff]  }
 0x27f   : > { %v2914_v32 = vpop.f32.mrf.mxu0  ;;  %3159 = vmatmul.mubr.bf16.vlgmr.msra.gmra.mxu0 %v8544_v61 }
 0x280   : > { %v8578_v1 = vadd.f32 %v2914_v32, %v8571_v57  ;;  %4922 = vmatpush2.bf16.msra.mxu1 %v7499_v62  ;;  %4937 = vmatpush1.bf16.msra.mxu0 %v7502_v63  ;;  %v7514_v57 = vld [vmem:[#allocation9 + $0x3f0] ss:$24 sps:$4 sm:$0xff]   ;;  %v7562_v63 = vld [vmem:[#allocation9 + $0x600] ss:$24 sps:$4 sm:$0xff]  }
 0x281   : > { %4968 = vmatprep.mubr.bf16.mxu0 %v8531_v52  ;;  %v2916_v4 = vpop.f32.mrf.mxu0  ;;  %4923 = vmatprep.subr.bf16.mxu1 %v7507_v60  ;;  %v7559_v62 = vld [vmem:[#allocation9 + $0x570] ss:$24 sps:$4 sm:$0xff]   ;;  %v7567_v60 = vld [vmem:[#allocation9 + $0x544] ss:$24 sps:$4 sm:$0xff]   ;;  %v7565_v32 = vld [vmem:[#allocation9 + $0x540] ss:$24 sps:$4 sm:$0xff]  }
 0x282   : > { %v8582_v10 = vadd.f32 %v2916_v4, %v8574_v0  ;;  %4938 = vmatprep.subr.bf16.mxu0 %v7510_v25  ;;  %v7528_v0 = vld [vmem:[#allocation9 + $0x724] ss:$24 sps:$4 sm:$0xff]   ;;  %v7570_v25 = vld [vmem:[#allocation9 + $0x8d4] ss:$24 sps:$4 sm:$0xff]  }
 0x283   : > { %v2918_v11 = vpop.f32.mrf.mxu0  ;;  %v7576_v4 = vld [vmem:[#allocation9 + $0x8a4] ss:$24 sps:$4 sm:$0xff]  }
 0x284   : > { %4924 = vmatpush2.bf16.msra.mxu1 %v7505_v2  ;;  %4939 = vmatpush1.bf16.msra.mxu0 %v7508_v3  ;;  %v7568_v2 = vld [vmem:[#allocation9 + $0x8d0] ss:$24 sps:$4 sm:$0xff]   ;;  %v7573_v3 = vld [vmem:[#allocation9 + $0x514] ss:$24 sps:$4 sm:$0xff]   ;;  %v7579_v11 = vld [vmem:[#allocation9 + $0x4e4] ss:$24 sps:$4 sm:$0xff]  }
 0x285   : > { %v2919_v13 = vpop.f32.mrf.mxu0  ;;  %4925 = vmatprep.subr.bf16.mxu1 %v7513_v6  ;;  %4940 = vmatprep.subr.bf16.mxu0 %v7516_v8  ;;  %v7571_v6 = vld [vmem:[#allocation9 + $0x510] ss:$24 sps:$4 sm:$0xff]   ;;  %v7574_v8 = vld [vmem:[#allocation9 + $0x8a0] ss:$24 sps:$4 sm:$0xff]  }
 0x286   : > { %v7580_v13 = vld [vmem:[#allocation9 + $0x870] ss:$24 sps:$4 sm:$0xff]  }
 0x288   : > { %4926 = vmatpush2.bf16.msra.mxu1 %v7511_v12  ;;  %4941 = vmatpush1.bf16.msra.mxu0 %v7514_v57  ;;  %v7582_v12 = vld [vmem:[#allocation9 + $0x874] ss:$24 sps:$4 sm:$0xff]   ;;  %v7577_v57 = vld [vmem:[#allocation9 + $0x4e0] ss:$24 sps:$4 sm:$0xff]  }
 0x289   : > { %4942 = vmatprep.subr.bf16.mxu0 %v7519_v14  ;;  %4977 = vmatprep.subr.bf16.mxu1 %v7522_v15  ;;  %v7585_v14 = vld [vmem:[#allocation9 + $0x4b4] ss:$24 sps:$4 sm:$0xff]   ;;  %v7588_v15 = vld [vmem:[#allocation9 + $0x844] ss:$24 sps:$4 sm:$0xff]  }
 0x28b   : > { %v8584_v21 = vpop.f32.mrf.mxu1  ;;  %4928 = vmatmul.mubr.bf16.vlgmr.msra.gmra.mxu1 %v8521_v18 }
 0x28c   : > { %4943 = vmatpush1.bf16.msra.mxu0 %v7517_v17  ;;  %4978 = vmatpush1.bf16.msra.mxu1 %v7520_v19  ;;  %v7583_v17 = vld [vmem:[#allocation9 + $0x4b0] ss:$24 sps:$4 sm:$0xff]   ;;  %v7586_v19 = vld [vmem:[#allocation9 + $0x840] ss:$24 sps:$4 sm:$0xff]  }
 0x28d   : > { %5009 = vmatprep.mubr.bf16.mxu1 %v8533_v54  ;;  %v8588_v24 = vpop.f32.mrf.mxu1  ;;  %4944 = vmatprep.subr.bf16.mxu0 %v7525_v20  ;;  %v7591_v20 = vld [vmem:[#allocation9 + $0x484] ss:$24 sps:$4 sm:$0xff]  }
 0x28e   : > { %4979 = vmatprep.subr.bf16.mxu1 %v7528_v0  ;;  %v7594_v0 = vld [vmem:[#allocation9 + $0x814] ss:$24 sps:$4 sm:$0xff]  }
 0x28f   : > { %v2959_v28 = vpop.f32.mrf.mxu1 }
 0x290   : > { %4945 = vmatpush1.bf16.msra.mxu0 %v7523_v22  ;;  %4980 = vmatpush1.bf16.msra.mxu1 %v7526_v23  ;;  %v7589_v22 = vld [vmem:[#allocation9 + $0x480] ss:$24 sps:$4 sm:$0xff]   ;;  %v7592_v23 = vld [vmem:[#allocation9 + $0x810] ss:$24 sps:$4 sm:$0xff]   ;;  %v8593_v28 = vrot.slane %v8556_v35, %v552_v5 }
 0x291   : > { %v2960_v31 = vpop.f32.mrf.mxu1  ;;  %4946 = vmatprep.subr.bf16.mxu0 %v7531_v26  ;;  %4981 = vmatprep.subr.bf16.mxu1 %v7534_v27  ;;  %v7597_v26 = vld [vmem:[#allocation9 + $0x7e4] ss:$24 sps:$4 sm:$0xff]  }
 0x292   : > { %v7600_v27 = vld [vmem:[#allocation9 + $0x15c] ss:$24 sps:$4 sm:$0xff]   ;;  %v7598_v31 = vld [vmem:[#allocation9 + $0x158] ss:$24 sps:$4 sm:$0xff]  }
 0x294   : > { %4947 = vmatpush1.bf16.msra.mxu0 %v7529_v29  ;;  %4982 = vmatpush1.bf16.msra.mxu1 %v7532_v30  ;;  %v8598_v29 = vrot.slane %v8556_v35, %v556_v7  ;;  %v7595_v30 = vld [vmem:[#allocation9 + $0x7e0] ss:$24 sps:$4 sm:$0xff]   ;;  %v7601_v7 = vld [vmem:[#allocation9 + $0x7b0] ss:$24 sps:$4 sm:$0xff]  }
 0x295   : > { %4948 = vmatprep.subr.bf16.mxu0 %v7537_v33  ;;  %4983 = vmatprep.subr.bf16.mxu1 %v7540_v34  ;;  %v7603_v33 = vld [vmem:[#allocation9 + $0x7b4] ss:$24 sps:$4 sm:$0xff]   ;;  %v2956_v34 = vadd.f32 %v8584_v21, %v8593_v28 }
 0x296   : > { %v2958_v5 = vadd.f32 %v8588_v24, %v8598_v29  ;;  %v7615_v24 = vld [vmem:[#allocation9 + $0xcc] ss:$24 sps:$4 sm:$0xff]  }
 0x298   : > { %4949 = vmatpush1.bf16.msra.mxu0 %v7535_v36  ;;  %4984 = vmatpush1.bf16.msra.mxu1 %v7538_v37  ;;  %v7606_v36 = vld [vmem:[#allocation9 + $0x12c] ss:$24 sps:$4 sm:$0xff]  }
 0x299   : > { %4950 = vmatprep.subr.bf16.mxu0 %v7543_v38  ;;  %4985 = vmatprep.subr.bf16.mxu1 %v7546_v39  ;;  %v7604_v39 = vld [vmem:[#allocation9 + $0x128] ss:$24 sps:$4 sm:$0xff]  }
 0x29c   : > { %4951 = vmatpush1.bf16.msra.mxu0 %v7541_v40  ;;  %4986 = vmatpush1.bf16.msra.mxu1 %v7544_v41  ;;  %v7609_v41 = vld [vmem:[#allocation9 + $0x784] ss:$24 sps:$4 sm:$0xff]  }
 0x29d   : > { %4952 = vmatprep.subr.bf16.mxu0 %v7549_v45  ;;  %4987 = vmatprep.subr.bf16.mxu1 %v7552_v46  ;;  %v7612_v45 = vld [vmem:[#allocation9 + $0xfc] ss:$24 sps:$4 sm:$0xff]  }
 0x2a0   : > { %4953 = vmatpush2.bf16.msra.mxu0 %v7547_v47  ;;  %4988 = vmatpush1.bf16.msra.mxu1 %v7550_v50  ;;  %v7607_v47 = vld [vmem:[#allocation9 + $0x780] ss:$24 sps:$4 sm:$0xff]  }
 0x2a1   : > { %4954 = vmatprep.subr.bf16.mxu0 %v7555_v51  ;;  %4989 = vmatprep.subr.bf16.mxu1 %v7558_v56  ;;  %v7610_v50 = vld [vmem:[#allocation9 + $0xf8] ss:$24 sps:$4 sm:$0xff]   ;;  %v7618_v56 = vld [vmem:[#allocation9 + $0x45c] ss:$24 sps:$4 sm:$0xff]  }
 0x2a4   : > { %4955 = vmatpush2.bf16.msra.mxu0 %v7553_v48  ;;  %4990 = vmatpush1.bf16.msra.mxu1 %v7556_v53  ;;  %v7613_v48 = vld [vmem:[#allocation9 + $0xc8] ss:$24 sps:$4 sm:$0xff]   ;;  %v7616_v53 = vld [vmem:[#allocation9 + $0x458] ss:$24 sps:$4 sm:$0xff]  }
 0x2a5   : > { %4956 = vmatprep.subr.bf16.mxu0 %v7561_v58  ;;  %4991 = vmatprep.subr.bf16.mxu1 %v7564_v59  ;;  %v7621_v58 = vld [vmem:[#allocation9 + $0x9c] ss:$24 sps:$4 sm:$0xff]   ;;  %v7624_v59 = vld [vmem:[#allocation9 + $0x42c] ss:$24 sps:$4 sm:$0xff]  }
 0x2a8   : > { %4957 = vmatpush2.bf16.msra.mxu0 %v7559_v62  ;;  %4992 = vmatpush1.bf16.msra.mxu1 %v7562_v63 }
 0x2a9   : > { %4958 = vmatprep.subr.bf16.mxu0 %v7567_v60  ;;  %4993 = vmatprep.subr.bf16.mxu1 %v7570_v25  ;;  %v7619_v60 = vld [vmem:[#allocation9 + $0x98] ss:$24 sps:$4 sm:$0xff]   ;;  %v7622_v25 = vld [vmem:[#allocation9 + $0x428] ss:$24 sps:$4 sm:$0xff]  }
 0x2ac   : > { %4959 = vmatpush2.bf16.msra.mxu0 %v7565_v32  ;;  %4994 = vmatpush2.bf16.msra.mxu1 %v7568_v2  ;;  %v7627_v2 = vld [vmem:[#allocation9 + $0x6c] ss:$24 sps:$4 sm:$0xff]  }
 0x2ad   : > { %4960 = vmatprep.subr.bf16.mxu0 %v7573_v3  ;;  %4995 = vmatprep.subr.bf16.mxu1 %v7576_v4  ;;  %v7630_v3 = vld [vmem:[#allocation9 + $0x3fc] ss:$24 sps:$4 sm:$0xff]  }
 0x2b0   : > { %4961 = vmatpush2.bf16.msra.mxu0 %v7571_v6  ;;  %4996 = vmatpush2.bf16.msra.mxu1 %v7574_v8  ;;  %v7625_v8 = vld [vmem:[#allocation9 + $0x68] ss:$24 sps:$4 sm:$0xff]  }
 0x2b1   : > { %4962 = vmatprep.subr.bf16.mxu0 %v7579_v11  ;;  %4997 = vmatprep.subr.bf16.mxu1 %v7582_v12  ;;  %v7628_v11 = vld [vmem:[#allocation9 + $0x3f8] ss:$24 sps:$4 sm:$0xff]  }
 0x2b4   : > { %4963 = vmatpush2.bf16.msra.mxu0 %v7577_v57  ;;  %4998 = vmatpush2.bf16.msra.mxu1 %v7580_v13  ;;  %v7633_v57 = vld [vmem:[#allocation9 + $0x3c] ss:$24 sps:$4 sm:$0xff]   ;;  %v7636_v13 = vld [vmem:[#allocation9 + $0x3cc] ss:$24 sps:$4 sm:$0xff]  }
 0x2b5   : > { %4964 = vmatprep.subr.bf16.mxu0 %v7585_v14  ;;  %4999 = vmatprep.subr.bf16.mxu1 %v7588_v15  ;;  %v7631_v14 = vld [vmem:[#allocation9 + $0x38] ss:$24 sps:$4 sm:$0xff]   ;;  %v7634_v15 = vld [vmem:[#allocation9 + $0x3c8] ss:$24 sps:$4 sm:$0xff]  }
 0x2b8   : > { %4965 = vmatpush2.bf16.msra.mxu0 %v7583_v17  ;;  %5000 = vmatpush2.bf16.msra.mxu1 %v7586_v19  ;;  %v7639_v17 = vld [vmem:[#allocation9 + $0xc] ss:$24 sps:$4 sm:$0xff]   ;;  %v7642_v19 = vld [vmem:[#allocation9 + $0x39c] ss:$24 sps:$4 sm:$0xff]  }
 0x2b9   : > { %4966 = vmatprep.subr.bf16.mxu0 %v7591_v20  ;;  %5001 = vmatprep.subr.bf16.mxu1 %v7594_v0  ;;  %v7637_v20 = vld [vmem:[#allocation9 + $0x8] ss:$24 sps:$4 sm:$0xff]   ;;  %v7640_v0 = vld [vmem:[#allocation9 + $0x398] ss:$24 sps:$4 sm:$0xff]  }
 0x2bc   : > { %4967 = vmatpush2.bf16.msra.mxu0 %v7589_v22  ;;  %5002 = vmatpush2.bf16.msra.mxu1 %v7592_v23  ;;  %v7645_v22 = vld [vmem:[#allocation9 + $0x2dc] ss:$24 sps:$4 sm:$0xff]   ;;  %v7648_v23 = vld [vmem:[#allocation9 + $0x36c] ss:$24 sps:$4 sm:$0xff]  }
 0x2bd   : > { %5003 = vmatprep.subr.bf16.mxu1 %v7597_v26  ;;  %5018 = vmatprep.subr.bf16.mxu0 %v7600_v27  ;;  %v7643_v26 = vld [vmem:[#allocation9 + $0x2d8] ss:$24 sps:$4 sm:$0xff]   ;;  %v7646_v27 = vld [vmem:[#allocation9 + $0x368] ss:$24 sps:$4 sm:$0xff]  }
 0x2bf   : > { %v2996_v37 = vpop.f32.mrf.mxu0  ;;  %4969 = vmatmul.mubr.bf16.vlgmr.msra.gmra.mxu0 %v8535_v55 }
 0x2c0   : > { %v2997_v38 = vadd.f32 %v2996_v37, %v2956_v34  ;;  %5004 = vmatpush2.bf16.msra.mxu1 %v7595_v30  ;;  %5019 = vmatpush1.bf16.msra.mxu0 %v7598_v31  ;;  %v7651_v30 = vld [vmem:[#allocation9 + $0x2ac] ss:$24 sps:$4 sm:$0xff]   ;;  %v7654_v31 = vld [vmem:[#allocation9 + $0x33c] ss:$24 sps:$4 sm:$0xff]   ;;  %v7652_v34 = vld [vmem:[#allocation9 + $0x338] ss:$24 sps:$4 sm:$0xff]  }
 0x2c1   : > { %5050 = vmatprep.mubr.bf16.mxu0 %v8517_v16  ;;  %v2998_v40 = vpop.f32.mrf.mxu0  ;;  %5005 = vmatprep.subr.bf16.mxu1 %v7603_v33  ;;  %v7649_v33 = vld [vmem:[#allocation9 + $0x2a8] ss:$24 sps:$4 sm:$0xff]   ;;  %v7660_v37 = vld [vmem:[#allocation9 + $0x30c] ss:$24 sps:$4 sm:$0xff]  }
 0x2c2   : > { %v2999_v46 = vadd.f32 %v2998_v40, %v2958_v5  ;;  %5020 = vmatprep.subr.bf16.mxu0 %v7606_v36  ;;  %v7657_v36 = vld [vmem:[#allocation9 + $0x27c] ss:$24 sps:$4 sm:$0xff]   ;;  %v7655_v5 = vld [vmem:[#allocation9 + $0x278] ss:$24 sps:$4 sm:$0xff]   ;;  %v7661_v40 = vld [vmem:[#allocation9 + $0x248] ss:$24 sps:$4 sm:$0xff]  }
 0x2c3   : > { %v3000_v21 = vpop.f32.mrf.mxu0 }
 0x2c4   : > { %5006 = vmatpush2.bf16.msra.mxu1 %v7601_v7  ;;  %5021 = vmatpush1.bf16.msra.mxu0 %v7604_v39  ;;  %v7663_v7 = vld [vmem:[#allocation9 + $0x24c] ss:$24 sps:$4 sm:$0xff]   ;;  %v7666_v39 = vld [vmem:[#allocation9 + $0x5dc] ss:$24 sps:$4 sm:$0xff]   ;;  %v7667_v21 = vld [vmem:[#allocation9 + $0x218] ss:$24 sps:$4 sm:$0xff]  }
 0x2c5   : > { %v3001_v51 = vpop.f32.mrf.mxu0  ;;  %5007 = vmatprep.subr.bf16.mxu1 %v7609_v41  ;;  %5022 = vmatprep.subr.bf16.mxu0 %v7612_v45  ;;  %v7664_v41 = vld [vmem:[#allocation9 + $0x5d8] ss:$24 sps:$4 sm:$0xff]   ;;  %v7669_v45 = vld [vmem:[#allocation9 + $0x21c] ss:$24 sps:$4 sm:$0xff]  }
 0x2c6   : > { %v7678_v51 = vld [vmem:[#allocation9 + $0x57c] ss:$24 sps:$4 sm:$0xff]  }
 0x2c8   : > { %5008 = vmatpush2.bf16.msra.mxu1 %v7607_v47  ;;  %5023 = vmatpush1.bf16.msra.mxu0 %v7610_v50  ;;  %v7670_v47 = vld [vmem:[#allocation9 + $0x5a8] ss:$24 sps:$4 sm:$0xff]   ;;  %v7675_v50 = vld [vmem:[#allocation9 + $0x1ec] ss:$24 sps:$4 sm:$0xff]  }
 0x2c9   : > { %5024 = vmatprep.subr.bf16.mxu0 %v7615_v24  ;;  %5059 = vmatprep.subr.bf16.mxu1 %v7618_v56  ;;  %v7673_v24 = vld [vmem:[#allocation9 + $0x1e8] ss:$24 sps:$4 sm:$0xff]   ;;  %v7676_v56 = vld [vmem:[#allocation9 + $0x578] ss:$24 sps:$4 sm:$0xff]  }
 0x2cb   : > { %v3037_v62 = vpop.f32.mrf.mxu1  ;;  %5010 = vmatmul.mubr.bf16.vlgmr.msra.gmra.mxu1 %v8544_v61 }
 0x2cc   : > { %v8607_v63 = vadd.f32 %v3037_v62, %v2997_v38  ;;  %5025 = vmatpush1.bf16.msra.mxu0 %v7613_v48  ;;  %5060 = vmatpush1.bf16.msra.mxu1 %v7616_v53  ;;  %v7658_v38 = vld [vmem:[#allocation9 + $0x308] ss:$24 sps:$4 sm:$0xff]   ;;  %v7681_v48 = vld [vmem:[#allocation9 + $0x1bc] ss:$24 sps:$4 sm:$0xff]   ;;  %v7684_v53 = vld [vmem:[#allocation9 + $0x54c] ss:$24 sps:$4 sm:$0xff]  }
 0x2cd   : > { %5091 = vmatprep.mubr.bf16.mxu1 %v8531_v52  ;;  %v3039_v32 = vpop.f32.mrf.mxu1  ;;  %5026 = vmatprep.subr.bf16.mxu0 %v7621_v58  ;;  %v7679_v58 = vld [vmem:[#allocation9 + $0x1b8] ss:$24 sps:$4 sm:$0xff]   ;;  %v7687_v62 = vld [vmem:[#allocation9 + $0x18c] ss:$24 sps:$4 sm:$0xff]  }
 0x2ce   : > { %v8610_v4 = vadd.f32 %v3039_v32, %v2999_v46  ;;  %5061 = vmatprep.subr.bf16.mxu1 %v7624_v59  ;;  %v7672_v46 = vld [vmem:[#allocation9 + $0x5ac] ss:$24 sps:$4 sm:$0xff]   ;;  %v7682_v59 = vld [vmem:[#allocation9 + $0x548] ss:$24 sps:$4 sm:$0xff]   ;;  %v7688_v32 = vld [vmem:[#allocation9 + $0x518] ss:$24 sps:$4 sm:$0xff]  }
 0x2cf   : > { %v3041_v6 = vpop.f32.mrf.mxu1 }
 0x2d0   : > { %5027 = vmatpush1.bf16.msra.mxu0 %v7619_v60  ;;  %5062 = vmatpush1.bf16.msra.mxu1 %v7622_v25  ;;  %v7690_v60 = vld [vmem:[#allocation9 + $0x51c] ss:$24 sps:$4 sm:$0xff]   ;;  %v7685_v25 = vld [vmem:[#allocation9 + $0x188] ss:$24 sps:$4 sm:$0xff]  }
 0x2d1   : > { %v3042_v12 = vpop.f32.mrf.mxu1  ;;  %5028 = vmatprep.subr.bf16.mxu0 %v7627_v2  ;;  %5063 = vmatprep.subr.bf16.mxu1 %v7630_v3  ;;  %v7693_v2 = vld [vmem:[#allocation9 + $0x4ec] ss:$24 sps:$4 sm:$0xff]   ;;  %v7696_v3 = vld [vmem:[#allocation9 + $0x75c] ss:$24 sps:$4 sm:$0xff]   ;;  %v7691_v6 = vld [vmem:[#allocation9 + $0x4e8] ss:$24 sps:$4 sm:$0xff]  }
 0x2d2   : > { %v7702_v12 = vld [vmem:[#allocation9 + $0x72c] ss:$24 sps:$4 sm:$0xff]  }
 0x2d4   : > { %5029 = vmatpush1.bf16.msra.mxu0 %v7625_v8  ;;  %5064 = vmatpush1.bf16.msra.mxu1 %v7628_v11  ;;  %v7694_v8 = vld [vmem:[#allocation9 + $0x758] ss:$24 sps:$4 sm:$0xff]   ;;  %v7699_v11 = vld [vmem:[#allocation9 + $0x4bc] ss:$24 sps:$4 sm:$0xff]  }
 0x2d5   : > { %5030 = vmatprep.subr.bf16.mxu0 %v7633_v57  ;;  %5065 = vmatprep.subr.bf16.mxu1 %v7636_v13  ;;  %v7697_v13 = vld [vmem:[#allocation9 + $0x4b8] ss:$24 sps:$4 sm:$0xff]  }
 0x2d8   : > { %5031 = vmatpush1.bf16.msra.mxu0 %v7631_v14  ;;  %5066 = vmatpush1.bf16.msra.mxu1 %v7634_v15  ;;  %v7700_v14 = vld [vmem:[#allocation9 + $0x728] ss:$24 sps:$4 sm:$0xff]  }
 0x2d9   : > { %5032 = vmatprep.subr.bf16.mxu0 %v7639_v17  ;;  %5067 = vmatprep.subr.bf16.mxu1 %v7642_v19  ;;  %v7705_v17 = vld [vmem:[#allocation9 + $0x48c] ss:$24 sps:$4 sm:$0xff]   ;;  %v7708_v19 = vld [vmem:[#allocation9 + $0x6fc] ss:$24 sps:$4 sm:$0xff]  }
 0x2dc   : > { %5033 = vmatpush1.bf16.msra.mxu0 %v7637_v20  ;;  %5068 = vmatpush1.bf16.msra.mxu1 %v7640_v0  ;;  %v7703_v0 = vld [vmem:[#allocation9 + $0x488] ss:$24 sps:$4 sm:$0xff]  }
 0x2dd   : > { %5034 = vmatprep.subr.bf16.mxu0 %v7645_v22  ;;  %5069 = vmatprep.subr.bf16.mxu1 %v7648_v23  ;;  %v7706_v22 = vld [vmem:[#allocation9 + $0x6f8] ss:$24 sps:$4 sm:$0xff]  }
 0x2e0   : > { %5035 = vmatpush2.bf16.msra.mxu0 %v7643_v26  ;;  %5070 = vmatpush1.bf16.msra.mxu1 %v7646_v27  ;;  %v7711_v26 = vld [vmem:[#allocation9 + $0x6cc] ss:$24 sps:$4 sm:$0xff]  }
 0x2e1   : > { %5036 = vmatprep.subr.bf16.mxu0 %v7651_v30  ;;  %5071 = vmatprep.subr.bf16.mxu1 %v7654_v31  ;;  %v7714_v27 = vld [vmem:[#allocation9 + $0x164] ss:$24 sps:$4 sm:$0xff]   ;;  %v8617_v30 = vrot.slane %v8556_v35, %v560_v49  ;;  %v8622_v31 = vrot.slane %v8556_v35, %v564_v9  ;;  %v7718_v9 = vld [vmem:[#allocation9 + $0x130] ss:$24 sps:$4 sm:$0xff]  }
 0x2e4   : > { %5037 = vmatpush2.bf16.msra.mxu0 %v7649_v33  ;;  %5072 = vmatpush1.bf16.msra.mxu1 %v7652_v34  ;;  %v7709_v33 = vld [vmem:[#allocation9 + $0x6c8] ss:$24 sps:$4 sm:$0xff]  }
 0x2e5   : > { %5038 = vmatprep.subr.bf16.mxu0 %v7657_v36  ;;  %5073 = vmatprep.subr.bf16.mxu1 %v7660_v37  ;;  %v7712_v34 = vld [vmem:[#allocation9 + $0x160] ss:$24 sps:$4 sm:$0xff]   ;;  %v7717_v36 = vld [vmem:[#allocation9 + $0x69c] ss:$24 sps:$4 sm:$0xff]  }
 0x2e8   : > { %5039 = vmatpush2.bf16.msra.mxu0 %v7655_v5  ;;  %5074 = vmatpush1.bf16.msra.mxu1 %v7658_v38  ;;  %v7720_v5 = vld [vmem:[#allocation9 + $0x134] ss:$24 sps:$4 sm:$0xff]  }
 0x2e9   : > { %5040 = vmatprep.subr.bf16.mxu0 %v7663_v7  ;;  %5075 = vmatprep.subr.bf16.mxu1 %v7666_v39  ;;  %v7723_v39 = vld [vmem:[#allocation9 + $0x66c] ss:$24 sps:$4 sm:$0xff]  }
 0x2ec   : > { %5041 = vmatpush2.bf16.msra.mxu0 %v7661_v40  ;;  %5076 = vmatpush2.bf16.msra.mxu1 %v7664_v41  ;;  %v7726_v40 = vld [vmem:[#allocation9 + $0x104] ss:$24 sps:$4 sm:$0xff]  }
 0x2ed   : > { %5042 = vmatprep.subr.bf16.mxu0 %v7669_v45  ;;  %5077 = vmatprep.subr.bf16.mxu1 %v7672_v46  ;;  %v7721_v46 = vld [vmem:[#allocation9 + $0x668] ss:$24 sps:$4 sm:$0xff]  }
 0x2f0   : > { %5043 = vmatpush2.bf16.msra.mxu0 %v7667_v21  ;;  %5078 = vmatpush2.bf16.msra.mxu1 %v7670_v47  ;;  %v7724_v21 = vld [vmem:[#allocation9 + $0x100] ss:$24 sps:$4 sm:$0xff]  }
 0x2f1   : > { %5044 = vmatprep.subr.bf16.mxu0 %v7675_v50  ;;  %5079 = vmatprep.subr.bf16.mxu1 %v7678_v51  ;;  %v7729_v50 = vld [vmem:[#allocation9 + $0x63c] ss:$24 sps:$4 sm:$0xff]  }
 0x2f2   : > { %v7732_v51 = vld [vmem:[#allocation9 + $0xd4] ss:$24 sps:$4 sm:$0xff]  }
 0x2f4   : > { %5045 = vmatpush2.bf16.msra.mxu0 %v7673_v24  ;;  %5080 = vmatpush2.bf16.msra.mxu1 %v7676_v56  ;;  %v7730_v24 = vld [vmem:[#allocation9 + $0xd0] ss:$24 sps:$4 sm:$0xff]   ;;  %v7735_v56 = vld [vmem:[#allocation9 + $0x60c] ss:$24 sps:$4 sm:$0xff]  }
 0x2f5   : > { %5046 = vmatprep.subr.bf16.mxu0 %v7681_v48  ;;  %5081 = vmatprep.subr.bf16.mxu1 %v7684_v53  ;;  %v7738_v48 = vld [vmem:[#allocation9 + $0xa4] ss:$24 sps:$4 sm:$0xff]   ;;  %v7733_v53 = vld [vmem:[#allocation9 + $0x608] ss:$24 sps:$4 sm:$0xff]  }
 0x2f8   : > { %5047 = vmatpush2.bf16.msra.mxu0 %v7679_v58  ;;  %5082 = vmatpush2.bf16.msra.mxu1 %v7682_v59  ;;  %v7736_v58 = vld [vmem:[#allocation9 + $0xa0] ss:$24 sps:$4 sm:$0xff]   ;;  %v7741_v59 = vld [vmem:[#allocation9 + $0x8dc] ss:$24 sps:$4 sm:$0xff]  }
 0x2f9   : > { %5048 = vmatprep.subr.bf16.mxu0 %v7687_v62  ;;  %5083 = vmatprep.subr.bf16.mxu1 %v7690_v60  ;;  %v7744_v62 = vld [vmem:[#allocation9 + $0x74] ss:$24 sps:$4 sm:$0xff]   ;;  %v7739_v60 = vld [vmem:[#allocation9 + $0x8d8] ss:$24 sps:$4 sm:$0xff]  }
 0x2fc   : > { %5049 = vmatpush2.bf16.msra.mxu0 %v7685_v25  ;;  %5084 = vmatpush2.bf16.msra.mxu1 %v7688_v32  ;;  %v7742_v25 = vld [vmem:[#allocation9 + $0x70] ss:$24 sps:$4 sm:$0xff]   ;;  %v7747_v32 = vld [vmem:[#allocation9 + $0x8ac] ss:$24 sps:$4 sm:$0xff]  }
 0x2fd   : > { %5085 = vmatprep.subr.bf16.mxu1 %v7693_v2  ;;  %5100 = vmatprep.subr.bf16.mxu0 %v7696_v3  ;;  %v7750_v2 = vld [vmem:[#allocation9 + $0x44] ss:$24 sps:$4 sm:$0xff]   ;;  %v7745_v3 = vld [vmem:[#allocation9 + $0x8a8] ss:$24 sps:$4 sm:$0xff]  }
 0x2ff   : > { %v3078_v57 = vpop.f32.mrf.mxu0  ;;  %5051 = vmatmul.mubr.bf16.vlgmr.msra.gmra.mxu0 %v8521_v18 }
 0x300   : > { %5086 = vmatpush2.bf16.msra.mxu1 %v7691_v6  ;;  %5101 = vmatpush1.bf16.msra.mxu0 %v7694_v8  ;;  %v3079_v37 = vadd.f32 %v3078_v57, %v8617_v30  ;;  %v7748_v6 = vld [vmem:[#allocation9 + $0x40] ss:$24 sps:$4 sm:$0xff]   ;;  %v7753_v8 = vld [vmem:[#allocation9 + $0x87c] ss:$24 sps:$4 sm:$0xff]   ;;  %v7754_v57 = vld [vmem:[#allocation9 + $0x10] ss:$24 sps:$4 sm:$0xff]  }
 0x301   : > { %5132 = vmatprep.mubr.bf16.mxu0 %v8533_v54  ;;  %v3080_v15 = vpop.f32.mrf.mxu0  ;;  %5087 = vmatprep.subr.bf16.mxu1 %v7699_v11  ;;  %v7756_v11 = vld [vmem:[#allocation9 + $0x14] ss:$24 sps:$4 sm:$0xff]  }
 0x302   : > { %5102 = vmatprep.subr.bf16.mxu0 %v7702_v12  ;;  %v3081_v49 = vadd.f32 %v3080_v15, %v8622_v31  ;;  %v7751_v12 = vld [vmem:[#allocation9 + $0x878] ss:$24 sps:$4 sm:$0xff]   ;;  %v7757_v15 = vld [vmem:[#allocation9 + $0x848] ss:$24 sps:$4 sm:$0xff]  }
 0x303   : > { %v3082_v20 = vpop.f32.mrf.mxu0 }
 0x304   : > { %5088 = vmatpush2.bf16.msra.mxu1 %v7697_v13  ;;  %5103 = vmatpush1.bf16.msra.mxu0 %v7700_v14  ;;  %v7759_v13 = vld [vmem:[#allocation9 + $0x84c] ss:$24 sps:$4 sm:$0xff]  }
 0x305   : > { %v3083_v23 = vpop.f32.mrf.mxu0  ;;  %5089 = vmatprep.subr.bf16.mxu1 %v7705_v17  ;;  %5104 = vmatprep.subr.bf16.mxu0 %v7708_v19  ;;  %v7762_v14 = vld [vmem:[#allocation9 + $0x2e4] ss:$24 sps:$4 sm:$0xff]   ;;  %v7760_v17 = vld [vmem:[#allocation9 + $0x2e0] ss:$24 sps:$4 sm:$0xff]   ;;  %v7768_v20 = vld [vmem:[#allocation9 + $0x2b4] ss:$24 sps:$4 sm:$0xff]  }
 0x306   : > { %v7765_v19 = vld [vmem:[#allocation9 + $0x81c] ss:$24 sps:$4 sm:$0xff]   ;;  %v7771_v23 = vld [vmem:[#allocation9 + $0x7ec] ss:$24 sps:$4 sm:$0xff]  }
 0x308   : > { %5090 = vmatpush2.bf16.msra.mxu1 %v7703_v0  ;;  %5105 = vmatpush1.bf16.msra.mxu0 %v7706_v22  ;;  %v7763_v0 = vld [vmem:[#allocation9 + $0x818] ss:$24 sps:$4 sm:$0xff]  }
 0x309   : > { %5106 = vmatprep.subr.bf16.mxu0 %v7711_v26  ;;  %5141 = vmatprep.subr.bf16.mxu1 %v7714_v27  ;;  %v7766_v22 = vld [vmem:[#allocation9 + $0x2b0] ss:$24 sps:$4 sm:$0xff]   ;;  %v7774_v26 = vld [vmem:[#allocation9 + $0x284] ss:$24 sps:$4 sm:$0xff]  }
 0x30a   : > { %v7769_v27 = vld [vmem:[#allocation9 + $0x7e8] ss:$24 sps:$4 sm:$0xff]  }
 0x30b   : > { %v3119_v38 = vpop.f32.mrf.mxu1  ;;  %5092 = vmatmul.mubr.bf16.vlgmr.msra.gmra.mxu1 %v8535_v55 }
 0x30c   : > { %v8627_v7 = vadd.f32 %v3119_v38, %v3079_v37  ;;  %5107 = vmatpush1.bf16.msra.mxu0 %v7709_v33  ;;  %5142 = vmatpush1.bf16.msra.mxu1 %v7712_v34  ;;  %v7772_v33 = vld [vmem:[#allocation9 + $0x280] ss:$24 sps:$4 sm:$0xff]   ;;  %v7777_v34 = vld [vmem:[#allocation9 + $0x7bc] ss:$24 sps:$4 sm:$0xff]   ;;  %v7783_v38 = vld [vmem:[#allocation9 + $0x78c] ss:$24 sps:$4 sm:$0xff]  }
 0x30d   : > { %5173 = vmatprep.mubr.bf16.mxu1 %v8517_v16  ;;  %v3121_v35 = vpop.f32.mrf.mxu1  ;;  %5108 = vmatprep.subr.bf16.mxu0 %v7717_v36  ;;  %v7727_v16 = vld [vmem:[#allocation9 + $0x638] ss:$24 sps:$4 sm:$0xff]   ;;  %v7780_v36 = vld [vmem:[#allocation9 + $0x254] ss:$24 sps:$4 sm:$0xff]  }
 0x30e   : > { %v8630_v41 = vadd.f32 %v3121_v35, %v3081_v49  ;;  %5143 = vmatprep.subr.bf16.mxu1 %v7720_v5  ;;  %v7775_v37 = vld [vmem:[#allocation9 + $0x7b8] ss:$24 sps:$4 sm:$0xff]   ;;  %v7786_v49 = vld [vmem:[#allocation9 + $0x224] ss:$24 sps:$4 sm:$0xff]   ;;  %v7789_v35 = vld [vmem:[#allocation9 + $0x1f4] ss:$24 sps:$4 sm:$0xff]  }
 0x30f   : > { %v3123_v45 = vpop.f32.mrf.mxu1  ;;  %v7778_v5 = vld [vmem:[#allocation9 + $0x250] ss:$24 sps:$4 sm:$0xff]  }
 0x310   : > { %5109 = vmatpush1.bf16.msra.mxu0 %v7715_v43  ;;  %5144 = vmatpush1.bf16.msra.mxu1 %v7718_v9  ;;  %v7781_v43 = vld [vmem:[#allocation9 + $0x788] ss:$24 sps:$4 sm:$0xff]  }
 0x311   : > { %v3124_v47 = vpop.f32.mrf.mxu1  ;;  %5110 = vmatprep.subr.bf16.mxu0 %v7723_v39  ;;  %5145 = vmatprep.subr.bf16.mxu1 %v7726_v40  ;;  %v7784_v9 = vld [vmem:[#allocation9 + $0x220] ss:$24 sps:$4 sm:$0xff]   ;;  %v7792_v39 = vld [vmem:[#allocation9 + $0x464] ss:$24 sps:$4 sm:$0xff]   ;;  %v7787_v40 = vld [vmem:[#allocation9 + $0x1f0] ss:$24 sps:$4 sm:$0xff]  }
 0x312   : > { %v7790_v45 = vld [vmem:[#allocation9 + $0x460] ss:$24 sps:$4 sm:$0xff]  }
 0x314   : > { %5111 = vmatpush1.bf16.msra.mxu0 %v7721_v46  ;;  %5146 = vmatpush1.bf16.msra.mxu1 %v7724_v21  ;;  %v7795_v46 = vld [vmem:[#allocation9 + $0x1c4] ss:$24 sps:$4 sm:$0xff]   ;;  %v7798_v21 = vld [vmem:[#allocation9 + $0x434] ss:$24 sps:$4 sm:$0xff]  }
 0x315   : > { %5112 = vmatprep.subr.bf16.mxu0 %v7729_v50  ;;  %5147 = vmatprep.subr.bf16.mxu1 %v7732_v51  ;;  %v7793_v51 = vld [vmem:[#allocation9 + $0x1c0] ss:$24 sps:$4 sm:$0xff]  }
 0x318   : > { %5113 = vmatpush1.bf16.msra.mxu0 %v7727_v16  ;;  %5148 = vmatpush1.bf16.msra.mxu1 %v7730_v24  ;;  %v7796_v16 = vld [vmem:[#allocation9 + $0x430] ss:$24 sps:$4 sm:$0xff]  }
 0x319   : > { %5114 = vmatprep.subr.bf16.mxu0 %v7735_v56  ;;  %5149 = vmatprep.subr.bf16.mxu1 %v7738_v48  ;;  %v7801_v56 = vld [vmem:[#allocation9 + $0x194] ss:$24 sps:$4 sm:$0xff]   ;;  %v7804_v48 = vld [vmem:[#allocation9 + $0x404] ss:$24 sps:$4 sm:$0xff]  }
 0x31c   : > { %5115 = vmatpush1.bf16.msra.mxu0 %v7733_v53  ;;  %5150 = vmatpush1.bf16.msra.mxu1 %v7736_v58 }
 0x31d   : > { %5116 = vmatprep.subr.bf16.mxu0 %v7741_v59  ;;  %5151 = vmatprep.subr.bf16.mxu1 %v7744_v62  ;;  %v7799_v59 = vld [vmem:[#allocation9 + $0x190] ss:$24 sps:$4 sm:$0xff]  }
 0x320   : > { %5117 = vmatpush2.bf16.msra.mxu0 %v7739_v60  ;;  %5152 = vmatpush1.bf16.msra.mxu1 %v7742_v25  ;;  %v7807_v60 = vld [vmem:[#allocation9 + $0x3d4] ss:$24 sps:$4 sm:$0xff]   ;;  %v7810_v25 = vld [vmem:[#allocation9 + $0x764] ss:$24 sps:$4 sm:$0xff]  }
 0x321   : > { %5118 = vmatprep.subr.bf16.mxu0 %v7747_v32  ;;  %5153 = vmatprep.subr.bf16.mxu1 %v7750_v2  ;;  %v7808_v32 = vld [vmem:[#allocation9 + $0x760] ss:$24 sps:$4 sm:$0xff]   ;;  %v7813_v2 = vld [vmem:[#allocation9 + $0x3a4] ss:$24 sps:$4 sm:$0xff]  }
 0x324   : > { %5119 = vmatpush2.bf16.msra.mxu0 %v7745_v3  ;;  %5154 = vmatpush1.bf16.msra.mxu1 %v7748_v6  ;;  %v7811_v6 = vld [vmem:[#allocation9 + $0x3a0] ss:$24 sps:$4 sm:$0xff]  }
 0x325   : > { %5120 = vmatprep.subr.bf16.mxu0 %v7753_v8  ;;  %5155 = vmatprep.subr.bf16.mxu1 %v7756_v11  ;;  %v7814_v8 = vld [vmem:[#allocation9 + $0x730] ss:$24 sps:$4 sm:$0xff]  }
 0x328   : > { %5121 = vmatpush2.bf16.msra.mxu0 %v7751_v12  ;;  %5156 = vmatpush1.bf16.msra.mxu1 %v7754_v57  ;;  %v7819_v12 = vld [vmem:[#allocation9 + $0x374] ss:$24 sps:$4 sm:$0xff]   ;;  %v7822_v57 = vld [vmem:[#allocation9 + $0x704] ss:$24 sps:$4 sm:$0xff]  }
 0x329   : > { %5122 = vmatprep.subr.bf16.mxu0 %v7759_v13  ;;  %5157 = vmatprep.subr.bf16.mxu1 %v7762_v14  ;;  %v7817_v14 = vld [vmem:[#allocation9 + $0x370] ss:$24 sps:$4 sm:$0xff]  }
 0x32c   : > { %5123 = vmatpush2.bf16.msra.mxu0 %v7757_v15  ;;  %5158 = vmatpush2.bf16.msra.mxu1 %v7760_v17  ;;  %v7820_v15 = vld [vmem:[#allocation9 + $0x700] ss:$24 sps:$4 sm:$0xff]  }
 0x32d   : > { %5124 = vmatprep.subr.bf16.mxu0 %v7765_v19  ;;  %5159 = vmatprep.subr.bf16.mxu1 %v7768_v20  ;;  %v7828_v19 = vld [vmem:[#allocation9 + $0x6d4] ss:$24 sps:$4 sm:$0xff]   ;;  %v7823_v20 = vld [vmem:[#allocation9 + $0x340] ss:$24 sps:$4 sm:$0xff]  }
 0x330   : > { %5125 = vmatpush2.bf16.msra.mxu0 %v7763_v0  ;;  %5160 = vmatpush2.bf16.msra.mxu1 %v7766_v22  ;;  %v7831_v0 = vld [vmem:[#allocation9 + $0x314] ss:$24 sps:$4 sm:$0xff]   ;;  %v7834_v22 = vld [vmem:[#allocation9 + $0x6a4] ss:$24 sps:$4 sm:$0xff]  }
 0x331   : > { %5126 = vmatprep.subr.bf16.mxu0 %v7771_v23  ;;  %5161 = vmatprep.subr.bf16.mxu1 %v7774_v26  ;;  %v7829_v23 = vld [vmem:[#allocation9 + $0x310] ss:$24 sps:$4 sm:$0xff]   ;;  %v7832_v26 = vld [vmem:[#allocation9 + $0x6a0] ss:$24 sps:$4 sm:$0xff]  }
 0x334   : > { %5127 = vmatpush2.bf16.msra.mxu0 %v7769_v27  ;;  %5162 = vmatpush2.bf16.msra.mxu1 %v7772_v33  ;;  %v7837_v27 = vld [vmem:[#allocation9 + $0x5e4] ss:$24 sps:$4 sm:$0xff]   ;;  %v7840_v33 = vld [vmem:[#allocation9 + $0x674] ss:$24 sps:$4 sm:$0xff]  }
 0x335   : > { %5128 = vmatprep.subr.bf16.mxu0 %v7777_v34  ;;  %5163 = vmatprep.subr.bf16.mxu1 %v7780_v36  ;;  %v7835_v34 = vld [vmem:[#allocation9 + $0x5e0] ss:$24 sps:$4 sm:$0xff]   ;;  %v7838_v36 = vld [vmem:[#allocation9 + $0x670] ss:$24 sps:$4 sm:$0xff]  }
 0x338   : > { %5129 = vmatpush2.bf16.msra.mxu0 %v7775_v37  ;;  %5164 = vmatpush2.bf16.msra.mxu1 %v7778_v5  ;;  %v7843_v37 = vld [vmem:[#allocation9 + $0x5b4] ss:$24 sps:$4 sm:$0xff]   ;;  %v7846_v5 = vld [vmem:[#allocation9 + $0x644] ss:$24 sps:$4 sm:$0xff]  }
 0x339   : > { %5130 = vmatprep.subr.bf16.mxu0 %v7783_v38  ;;  %5165 = vmatprep.subr.bf16.mxu1 %v7786_v49  ;;  %v7841_v38 = vld [vmem:[#allocation9 + $0x5b0] ss:$24 sps:$4 sm:$0xff]   ;;  %v7844_v49 = vld [vmem:[#allocation9 + $0x640] ss:$24 sps:$4 sm:$0xff]  }
 0x33c   : > { %5131 = vmatpush2.bf16.msra.mxu0 %v7781_v43  ;;  %5166 = vmatpush2.bf16.msra.mxu1 %v7784_v9  ;;  %v7849_v43 = vld [vmem:[#allocation9 + $0x584] ss:$24 sps:$4 sm:$0xff]   ;;  %v7852_v9 = vld [vmem:[#allocation9 + $0x614] ss:$24 sps:$4 sm:$0xff]  }
 0x33d   : > { %5167 = vmatprep.subr.bf16.mxu1 %v7789_v35  ;;  %5182 = vmatprep.subr.bf16.mxu0 %v7792_v39  ;;  %v7847_v35 = vld [vmem:[#allocation9 + $0x580] ss:$24 sps:$4 sm:$0xff]   ;;  %v7850_v39 = vld [vmem:[#allocation9 + $0x610] ss:$24 sps:$4 sm:$0xff]  }
 0x33f   : > { %v3160_v47 = vpop.f32.mrf.mxu0  ;;  %5133 = vmatmul.mubr.bf16.vlgmr.msra.gmra.mxu0 %v8544_v61 }
 0x340   : > { %v8634_v50 = vadd.f32 %v3160_v47, %v8627_v7  ;;  %5168 = vmatpush2.bf16.msra.mxu1 %v7787_v40  ;;  %5183 = vmatpush1.bf16.msra.mxu0 %v7790_v45  ;;  %v7802_v7 = vld [vmem:[#allocation9 + $0x400] ss:$24 sps:$4 sm:$0xff]   ;;  %v7855_v40 = vld [vmem:[#allocation9 + $0x554] ss:$24 sps:$4 sm:$0xff]   ;;  %v7858_v45 = vld [vmem:[#allocation9 + $0x8e4] ss:$24 sps:$4 sm:$0xff]  }
 0x341   : > { %5214 = vmatprep.mubr.bf16.mxu0 %v8531_v52  ;;  %v3162_v24 = vpop.f32.mrf.mxu0  ;;  %5169 = vmatprep.subr.bf16.mxu1 %v7795_v46  ;;  %v7805_v52 = vld [vmem:[#allocation9 + $0x3d0] ss:$24 sps:$4 sm:$0xff]   ;;  %v7861_v47 = vld [vmem:[#allocation9 + $0x524] ss:$24 sps:$4 sm:$0xff]  }
 0x342   : > { %v8638_v53 = vadd.f32 %v3162_v24, %v8630_v41  ;;  %5184 = vmatprep.subr.bf16.mxu0 %v7798_v21  ;;  %v7816_v41 = vld [vmem:[#allocation9 + $0x734] ss:$24 sps:$4 sm:$0xff]   ;;  %v7853_v46 = vld [vmem:[#allocation9 + $0x550] ss:$24 sps:$4 sm:$0xff]   ;;  %v7856_v21 = vld [vmem:[#allocation9 + $0x8e0] ss:$24 sps:$4 sm:$0xff]  }
 0x343   : > { %v3164_v58 = vpop.f32.mrf.mxu0  ;;  %v7862_v24 = vld [vmem:[#allocation9 + $0x8b0] ss:$24 sps:$4 sm:$0xff]  }
 0x344   : > { %5170 = vmatpush2.bf16.msra.mxu1 %v7793_v51  ;;  %5185 = vmatpush1.bf16.msra.mxu0 %v7796_v16  ;;  %v7864_v51 = vld [vmem:[#allocation9 + $0x8b4] ss:$24 sps:$4 sm:$0xff]   ;;  %v7859_v16 = vld [vmem:[#allocation9 + $0x520] ss:$24 sps:$4 sm:$0xff]   ;;  %v7865_v58 = vld [vmem:[#allocation9 + $0x4f0] ss:$24 sps:$4 sm:$0xff]  }
 0x345   : > { %v3165_v62 = vpop.f32.mrf.mxu0  ;;  %5171 = vmatprep.subr.bf16.mxu1 %v7801_v56  ;;  %5186 = vmatprep.subr.bf16.mxu0 %v7804_v48  ;;  %v7867_v56 = vld [vmem:[#allocation9 + $0x4f4] ss:$24 sps:$4 sm:$0xff]   ;;  %v7870_v48 = vld [vmem:[#allocation9 + $0x884] ss:$24 sps:$4 sm:$0xff]  }
 0x346   : > { %v7876_v62 = vld [vmem:[#allocation9 + $0x854] ss:$24 sps:$4 sm:$0xff]  }
 0x348   : > { %5172 = vmatpush2.bf16.msra.mxu1 %v7799_v59  ;;  %5187 = vmatpush1.bf16.msra.mxu0 %v7802_v7  ;;  %v7868_v59 = vld [vmem:[#allocation9 + $0x880] ss:$24 sps:$4 sm:$0xff]   ;;  %v7873_v7 = vld [vmem:[#allocation9 + $0x4c4] ss:$24 sps:$4 sm:$0xff]  }
 0x349   : > { %5188 = vmatprep.subr.bf16.mxu0 %v7807_v60  ;;  %5223 = vmatprep.subr.bf16.mxu1 %v7810_v25  ;;  %v7871_v60 = vld [vmem:[#allocation9 + $0x4c0] ss:$24 sps:$4 sm:$0xff]   ;;  %v7874_v25 = vld [vmem:[#allocation9 + $0x850] ss:$24 sps:$4 sm:$0xff]  }
 0x34b   : > { %v8640_v3 = vpop.f32.mrf.mxu1  ;;  %5174 = vmatmul.mubr.bf16.vlgmr.msra.gmra.mxu1 %v8521_v18  ;;  %v7825_v18 = vld [vmem:[#allocation9 + $0x344] ss:$24 sps:$4 sm:$0xff]  }
 0x34c   : > { %5189 = vmatpush1.bf16.msra.mxu0 %v7805_v52  ;;  %5224 = vmatpush1.bf16.msra.mxu1 %v7808_v32  ;;  %v7879_v52 = vld [vmem:[#allocation9 + $0x494] ss:$24 sps:$4 sm:$0xff]   ;;  %v7882_v32 = vld [vmem:[#allocation9 + $0x824] ss:$24 sps:$4 sm:$0xff]  }
 0x34d   : > { %5255 = vmatprep.mubr.bf16.mxu1 %v8533_v54  ;;  %v8644_v11 = vpop.f32.mrf.mxu1  ;;  %5190 = vmatprep.subr.bf16.mxu0 %v7813_v2  ;;  %v7826_v54 = vld [vmem:[#allocation9 + $0x6d0] ss:$24 sps:$4 sm:$0xff]  }
 0x34e   : > { %5225 = vmatprep.subr.bf16.mxu1 %v7816_v41  ;;  %v7877_v2 = vld [vmem:[#allocation9 + $0x490] ss:$24 sps:$4 sm:$0xff]   ;;  %v7880_v41 = vld [vmem:[#allocation9 + $0x820] ss:$24 sps:$4 sm:$0xff]  }
 0x34f   : > { %v4933_v13 = vpop.f32.mrf.mxu1 }
 0x350   : > { %5191 = vmatpush1.bf16.msra.mxu0 %v7811_v6  ;;  %5226 = vmatpush1.bf16.msra.mxu1 %v7814_v8  ;;  %v7885_v6 = vld [vmem:[#allocation9 + $0x7f4] ss:$24 sps:$4 sm:$0xff]   ;;  %v7886_v8 = vld [vmem:[#allocation12 + $0x78] sm:$0xff]  }
 0x351   : > { %v4934_v17 = vpop.f32.mrf.mxu1  ;;  %5192 = vmatprep.subr.bf16.mxu0 %v7819_v12  ;;  %5227 = vmatprep.subr.bf16.mxu1 %v7822_v57  ;;  %v7883_v12 = vld [vmem:[#allocation9 + $0x7f0] ss:$24 sps:$4 sm:$0xff]   ;;  %v7887_v57 = vld [vmem:[#allocation12 + $0x38] sm:$0xff]  }
 0x352   : > { %v7890_v13 = vld [vmem:[#allocation9 + $0x7c4] ss:$24 sps:$4 sm:$0xff]   ;;  %v7888_v17 = vld [vmem:[#allocation9 + $0x7c0] ss:$24 sps:$4 sm:$0xff]  }
 0x354   : > { %5193 = vmatpush1.bf16.msra.mxu0 %v7817_v14  ;;  %5228 = vmatpush1.bf16.msra.mxu1 %v7820_v15  ;;  %v7891_v14 = vld [vmem:[#allocation12 + $0x70] sm:$0xff]  }
 0x355   : > { %5194 = vmatprep.subr.bf16.mxu0 %v7825_v18  ;;  %5229 = vmatprep.subr.bf16.mxu1 %v7828_v19  ;;  %v7892_v18 = vld [vmem:[#allocation12 + $0x30] sm:$0xff]  }
 0x358   : > { %5195 = vmatpush1.bf16.msra.mxu0 %v7823_v20  ;;  %5230 = vmatpush1.bf16.msra.mxu1 %v7826_v54  ;;  %v7895_v20 = vld [vmem:[#allocation9 + $0x794] ss:$24 sps:$4 sm:$0xff]  }
 0x359   : > { %5196 = vmatprep.subr.bf16.mxu0 %v7831_v0  ;;  %5231 = vmatprep.subr.bf16.mxu1 %v7834_v22  ;;  %v7896_v54 = vld [vmem:[#allocation12 + $0x68] sm:$0xff]  }
 0x35a   : > { %v7893_v22 = vld [vmem:[#allocation9 + $0x790] ss:$24 sps:$4 sm:$0xff]  }
 0x35c   : > { %5197 = vmatpush1.bf16.msra.mxu0 %v7829_v23  ;;  %5232 = vmatpush1.bf16.msra.mxu1 %v7832_v26  ;;  %v7897_v23 = vld [vmem:[#allocation12 + $0x28] sm:$0xff]  }
 0x35d   : > { %5198 = vmatprep.subr.bf16.mxu0 %v7837_v27  ;;  %5233 = vmatprep.subr.bf16.mxu1 %v7840_v33  ;;  %v7898_v27 = vld [vmem:[#allocation12 + $0x60] sm:$0xff]   ;;  %v7908_v33 = vld [vmem:[#allocation12 + $0xf8] sm:$0xff]  }
 0x360   : > { %5199 = vmatpush2.bf16.msra.mxu0 %v7835_v34  ;;  %5234 = vmatpush1.bf16.msra.mxu1 %v7838_v36  ;;  %v7899_v34 = vld [vmem:[#allocation12 + $0x20] sm:$0xff]   ;;  %v7909_v36 = vld [vmem:[#allocation12 + $0xb8] sm:$0xff]  }
 0x361   : > { %5200 = vmatprep.subr.bf16.mxu0 %v7843_v37  ;;  %5235 = vmatprep.subr.bf16.mxu1 %v7846_v5  ;;  %v7900_v37 = vld [vmem:[#allocation12 + $0x58] sm:$0xff]   ;;  %v7910_v5 = vld [vmem:[#allocation12 + $0xf0] sm:$0xff]  }
 0x364   : > { %5201 = vmatpush2.bf16.msra.mxu0 %v7841_v38  ;;  %5236 = vmatpush1.bf16.msra.mxu1 %v7844_v49  ;;  %v4932_v38 = vadd.f32 %v8644_v11, %v8566_v44  ;;  %v7903_v11 = vld [vmem:[#allocation12 + $0x10] sm:$0xff]  }
 0x365   : > { %5202 = vmatprep.subr.bf16.mxu0 %v7849_v43  ;;  %5237 = vmatprep.subr.bf16.mxu1 %v7852_v9 }
 0x368   : > { %5203 = vmatpush2.bf16.msra.mxu0 %v7847_v35  ;;  %5238 = vmatpush1.bf16.msra.mxu1 %v7850_v39  ;;  %v7901_v39 = vld [vmem:[#allocation12 + $0x18] sm:$0xff]  }
 0x369   : > { %5204 = vmatprep.subr.bf16.mxu0 %v7855_v40  ;;  %5239 = vmatprep.subr.bf16.mxu1 %v7858_v45  ;;  %v7902_v40 = vld [vmem:[#allocation12 + $0x50] sm:$0xff]   ;;  %v7912_v45 = vld [vmem:[#allocation12 + $0xe8] sm:$0xff]  }
 0x36c   : > { %5205 = vmatpush2.bf16.msra.mxu0 %v7853_v46  ;;  %5240 = vmatpush2.bf16.msra.mxu1 %v7856_v21 }
 0x36d   : > { %5206 = vmatprep.subr.bf16.mxu0 %v7861_v47  ;;  %5241 = vmatprep.subr.bf16.mxu1 %v7864_v51 }
 0x370   : > { %5207 = vmatpush2.bf16.msra.mxu0 %v7859_v16  ;;  %5242 = vmatpush2.bf16.msra.mxu1 %v7862_v24  ;;  %v7904_v16 = vld [vmem:[#allocation12 + $0x48] sm:$0xff]   ;;  %v7914_v24 = vld [vmem:[#allocation12 + $0xe0] sm:$0xff]  }
 0x371   : > { %5208 = vmatprep.subr.bf16.mxu0 %v7867_v56  ;;  %5243 = vmatprep.subr.bf16.mxu1 %v7870_v48 }
 0x374   : > { %5209 = vmatpush2.bf16.msra.mxu0 %v7865_v58  ;;  %5244 = vmatpush2.bf16.msra.mxu1 %v7868_v59  ;;  %v7905_v58 = vld [vmem:[#allocation12 + $0x8] sm:$0xff]   ;;  %v7915_v59 = vld [vmem:[#allocation12 + $0xa0] sm:$0xff]  }
 0x375   : > { %5210 = vmatprep.subr.bf16.mxu0 %v7873_v7  ;;  %5245 = vmatprep.subr.bf16.mxu1 %v7876_v62  ;;  %v7916_v7 = vld [vmem:[#allocation12 + $0xd8] sm:$0xff]  }
 0x376   : > { %v7917_v62 = vld [vmem:[#allocation12 + $0x98] sm:$0xff]  }
 0x378   : > { %5211 = vmatpush2.bf16.msra.mxu0 %v7871_v60  ;;  %5246 = vmatpush2.bf16.msra.mxu1 %v7874_v25  ;;  %v7918_v25 = vld [vmem:[#allocation12 + $0xd0] sm:$0xff]  }
 0x379   : > { %5212 = vmatprep.subr.bf16.mxu0 %v7879_v52  ;;  %5247 = vmatprep.subr.bf16.mxu1 %v7882_v32  ;;  %v7924_v52 = vld [vmem:[#allocation12 + $0x178] sm:$0xff]   ;;  %v7919_v32 = vld [vmem:[#allocation12 + $0x90] sm:$0xff]  }
 0x37c   : > { %5213 = vmatpush2.bf16.msra.mxu0 %v7877_v2  ;;  %5248 = vmatpush2.bf16.msra.mxu1 %v7880_v41  ;;  %v7925_v2 = vld [vmem:[#allocation12 + $0x138] sm:$0xff]  }
 0x37d   : > { %5249 = vmatprep.subr.bf16.mxu1 %v7885_v6  ;;  %6763 = vmatprep.subr.bf16.mxu0 %v7886_v8  ;;  %v7920_v6 = vld [vmem:[#allocation12 + $0xc8] sm:$0xff]   ;;  %v7926_v8 = vld [vmem:[#allocation12 + $0x170] sm:$0xff]  }
 0x37f   : > { %v4970_v15 = vpop.f32.mrf.mxu0  ;;  %5215 = vmatmul.mubr.bf16.vlgmr.msra.gmra.mxu0 %v8535_v55  ;;  %v4930_v55 = vadd.f32 %v8640_v3, %v8561_v42  ;;  %v7911_v42 = vld [vmem:[#allocation12 + $0xb0] sm:$0xff]  }
 0x380   : > { %5250 = vmatpush2.bf16.msra.mxu1 %v7883_v12  ;;  %6764 = vmatpush3.bf16.msra.mxu0 %v7887_v57  ;;  %v7921_v12 = vld [vmem:[#allocation12 + $0x88] sm:$0xff]   ;;  %v7927_v57 = vld [vmem:[#allocation12 + $0x130] sm:$0xff]  }
 0x381   : > { %v4972_v19 = vpop.f32.mrf.mxu0  ;;  %5251 = vmatprep.subr.bf16.mxu1 %v7890_v13  ;;  %6765 = vmatprep.subr.bf16.mxu0 %v7891_v14  ;;  %v4971_v49 = vadd.f32 %v4970_v15, %v4930_v55  ;;  %v7922_v13 = vld [vmem:[#allocation12 + $0xc0] sm:$0xff]   ;;  %v7928_v15 = vld [vmem:[#allocation12 + $0x168] sm:$0xff]   ;;  %v7935_v55 = vld [vmem:[#allocation12 + $0x110] sm:$0xff]  }
 0x382   : > { %v4973_v9 = vadd.f32 %v4972_v19, %v4932_v38  ;;  %v7923_v14 = vld [vmem:[#allocation12 + $0x80] sm:$0xff]  }
 0x383   : > { %v4974_v0 = vpop.f32.mrf.mxu0 }
 0x384   : > { %5252 = vmatpush2.bf16.msra.mxu1 %v7888_v17  ;;  %6766 = vmatpush3.bf16.msra.mxu0 %v7892_v18  ;;  %v7929_v18 = vld [vmem:[#allocation12 + $0x128] sm:$0xff]   ;;  %v7931_v0 = vld [vmem:[#allocation12 + $0x120] sm:$0xff]  }
 0x385   : > { %v4975_v26 = vpop.f32.mrf.mxu0  ;;  %5253 = vmatprep.subr.bf16.mxu1 %v7895_v20  ;;  %6767 = vmatprep.subr.bf16.mxu0 %v7896_v54  ;;  %v7930_v20 = vld [vmem:[#allocation12 + $0x160] sm:$0xff]  }
 0x386   : > { %v7933_v26 = vld [vmem:[#allocation12 + $0x118] sm:$0xff]  }
 0x388   : > { %5254 = vmatpush2.bf16.msra.mxu1 %v7893_v22  ;;  %6768 = vmatpush3.bf16.msra.mxu0 %v7897_v23  ;;  %v7932_v23 = vld [vmem:[#allocation12 + $0x158] sm:$0xff]  }
 0x389   : > { %6769 = vmatprep.subr.bf16.mxu0 %v7898_v27  ;;  %6785 = vmatprep.subr.bf16.mxu1 %v7908_v33  ;;  %v7934_v27 = vld [vmem:[#allocation12 + $0x150] sm:$0xff]  }
 0x38b   : > { %v5011_v43 = vpop.f32.mrf.mxu1  ;;  %5256 = vmatmul.mubr.bf16.vlgmr.msra.gmra.mxu1 %v8544_v61  ;;  %v7913_v61 = vld [vmem:[#allocation12 + $0xa8] sm:$0xff]  }
 0x38c   : > { %v5012_v35 = vadd.f32 %v5011_v43, %v4971_v49  ;;  %6770 = vmatpush3.bf16.msra.mxu0 %v7899_v34  ;;  %6786 = vmatpush3.bf16.msra.mxu1 %v7909_v36  ;;  %v7936_v36 = vld [vmem:[#allocation12 + $0x148] sm:$0xff]   ;;  %v7938_v49 = vld [vmem:[#allocation12 + $0x140] sm:$0xff]  }
 0x38d   : > { %v5013_v3 = vpop.f32.mrf.mxu1  ;;  %6771 = vmatprep.subr.bf16.mxu0 %v7900_v37  ;;  %6787 = vmatprep.subr.bf16.mxu1 %v7910_v5  ;;  %v7937_v5 = vld [vmem:[#allocation12 + $0x108] sm:$0xff]   ;;  %v7939_v43 = vld [vmem:[#allocation12 + $0x100] sm:$0xff]  }
 0x38e   : > { %v5264_v46 = vmax.f32 %v8578_v1, %v5012_v35  ;;  %v5014_v21 = vadd.f32 %v5013_v3, %v4973_v9  ;;  %v7906_v1 = vld [vmem:[#allocation12 + $0x40] sm:$0xff]  }
 0x38f   : > { %v5015_v47 = vpop.f32.mrf.mxu1 }
 0x390   : > { %v5265_v44 = vmax.f32 %v8582_v10, %v5014_v21  ;;  %6772 = vmatpush3.bf16.msra.mxu0 %v7901_v39  ;;  %6788 = vmatpush3.bf16.msra.mxu1 %v7911_v42  ;;  %v7907_v10 = vld [vmem:[#allocation12] sm:$0xff]   ;;  %v5270_v60 = vmax.f32 %v5264_v46, 0.0 }
 0x391   : > { %v5016_v51 = vpop.f32.mrf.mxu1  ;;  %6773 = vmatprep.subr.bf16.mxu0 %v7902_v40  ;;  %6789 = vmatprep.subr.bf16.mxu1 %v7912_v45 }
 0x392   : > { %v5271_v56 = vmax.f32 %v5265_v44, 0.0  ;;  %v5276_v41 = vpack.c.bf16 %v5270_v60, %v5270_v60 }
 0x394   : > { %v5277_v48 = vpack.c.bf16 %v5271_v56, %v5271_v56  ;;  %6774 = vmatpush3.bf16.msra.mxu0 %v7903_v11  ;;  %6790 = vmatpush3.bf16.msra.mxu1 %v7913_v61 }
 0x395   : > { %6775 = vmatprep.subr.bf16.mxu0 %v7904_v16  ;;  %6791 = vmatprep.subr.bf16.mxu1 %v7914_v24 }
 0x396   : > { %5705 = vmatprep.mubr.bf16.mxu0 %v5277_v48 }
 0x398   : > { %6776 = vmatpush3.bf16.msra.mxu0 %v7905_v58  ;;  %6792 = vmatpush3.bf16.msra.mxu1 %v7915_v59 }
 0x399   : > { %6777 = vmatprep.subr.bf16.mxu0 %v7906_v1  ;;  %6793 = vmatprep.subr.bf16.mxu1 %v7916_v7 }
 0x39c   : > { %6778 = vmatpush3.bf16.msra.mxu0 %v7907_v10  ;;  %6794 = vmatpush3.bf16.msra.mxu1 %v7917_v62 }
 0x39d   : > { %6795 = vmatprep.subr.bf16.mxu1 %v7918_v25  ;;  %6807 = vmatprep.subr.bf16.mxu0 %v7924_v52 }
 0x39f   : > { %5706 = vmatmul.mubr.bf16.vlgmr.msra.gmra.mxu0 %v5276_v41 }
 0x3a0   : > { %6796 = vmatpush3.bf16.msra.mxu1 %v7919_v32  ;;  %6808 = vmatpush3.bf16.msra.mxu0 %v7925_v2 }
 0x3a1   : > { %6797 = vmatprep.subr.bf16.mxu1 %v7920_v6  ;;  %6809 = vmatprep.subr.bf16.mxu0 %v7926_v8 }
 0x3a4   : > { %6798 = vmatpush3.bf16.msra.mxu1 %v7921_v12  ;;  %6810 = vmatpush3.bf16.msra.mxu0 %v7927_v57  ;;  %v7940_v57 = vld [vmem:[#allocation15 + $0x38] sm:$0xff]  }
 0x3a5   : > { %6799 = vmatprep.subr.bf16.mxu1 %v7922_v13  ;;  %6811 = vmatprep.subr.bf16.mxu0 %v7928_v15 }
 0x3a8   : > { %6800 = vmatpush3.bf16.msra.mxu1 %v7923_v14  ;;  %6812 = vmatpush3.bf16.msra.mxu0 %v7929_v18  ;;  %v8255_v14 = vmov 0.0   ;;  %v7944_v18 = vld [vmem:[#allocation15 + $0x18] sm:$0xff]  }
 0x3a9   : > { %6813 = vmatprep.subr.bf16.mxu0 %v7930_v20  ;;  %6838 = vmatprep.subr.bf16.mxu1 %v8255_v14 }
 0x3ac   : > { %6814 = vmatpush3.bf16.msra.mxu0 %v7931_v0 }
 0x3ad   : > { %6815 = vmatprep.subr.bf16.mxu0 %v7932_v23  ;;  %v7946_v23 = vld [vmem:[#allocation15 + $0x8] sm:$0xff]  }
 0x3b0   : > { %6816 = vmatpush3.bf16.msra.mxu0 %v7933_v26  ;;  %v7947_v26 = vld [vmem:[#allocation15] sm:$0xff]  }
 0x3b1   : > { %6817 = vmatprep.subr.bf16.mxu0 %v7934_v27  ;;  %v6703_v27 = vld [vmem:[#allocation13] ss:$0 sm:$0xff] }
 0x3b4   : > { %6818 = vmatpush3.bf16.msra.mxu0 %v7935_v55 }
 0x3b5   : > { %6819 = vmatprep.subr.bf16.mxu0 %v7936_v36 }
 0x3b8   : > { %6820 = vmatpush3.bf16.msra.mxu0 %v7937_v5 }
 0x3b9   : > { %6821 = vmatprep.subr.bf16.mxu0 %v7938_v49 }
 0x3bc   : > { %6822 = vmatpush3.bf16.msra.mxu0 %v7939_v43 }
 0x3bf   : > { %v5052_v17 = vpop.f32.mrf.mxu0 }
 0x3c0   : > { %v5053_v9 = vadd.f32 %v5052_v17, %v8593_v28  ;;  %v7942_v17 = vld [vmem:[#allocation15 + $0x28] sm:$0xff]  }
 0x3c1   : > { %v5054_v19 = vpop.f32.mrf.mxu0 }
 0x3c2   : > { %v5055_v35 = vadd.f32 %v5054_v19, %v8598_v29 }
 0x3c3   : > { %v5056_v54 = vpop.f32.mrf.mxu0 }
 0x3c5   : > { %v5057_v22 = vpop.f32.mrf.mxu0 }
 0x3c6   : > { %v7945_v22 = vld [vmem:[#allocation15 + $0x10] sm:$0xff]  }
 0x3cb   : > { %v5093_v33 = vpop.f32.mrf.mxu1 }
 0x3cc   : > { %v5094_v39 = vadd.f32 %v5093_v33, %v5053_v9 }
 0x3cd   : > { %v5095_v34 = vpop.f32.mrf.mxu1 }
 0x3ce   : > { %v5096_v3 = vadd.f32 %v5095_v34, %v5055_v35 }
 0x3cf   : > { %v5097_v37 = vpop.f32.mrf.mxu1 }
 0x3d1   : > { %v5098_v38 = vpop.f32.mrf.mxu1 }
 0x3ff   : > { %v5134_v42 = vpop.f32.mrf.mxu0 }
 0x400   : > { %v5135_v40 = vadd.f32 %v5134_v42, %v5094_v39 }
 0x401   : > { %v5136_v45 = vpop.f32.mrf.mxu0 }
 0x402   : > { %v5266_v46 = vmax.f32 %v8607_v63, %v5135_v40  ;;  %v5137_v21 = vadd.f32 %v5136_v45, %v5096_v3  ;;  %v6752_v45 = vld [vmem:[#allocation16] ss:$0 sm:$0xff] }
 0x403   : > { %v5138_v47 = vpop.f32.mrf.mxu0 }
 0x404   : > { %v5267_v44 = vmax.f32 %v8610_v4, %v5137_v21  ;;  %v5272_v11 = vmax.f32 %v5266_v46, 0.0 }
 0x405   : > { %v5139_v61 = vpop.f32.mrf.mxu0 }
 0x406   : > { %v5273_v51 = vmax.f32 %v5267_v44, 0.0  ;;  %v5278_v24 = vpack.c.bf16 %v5272_v11, %v5272_v11 }
 0x408   : > { %v5279_v16 = vpack.c.bf16 %v5273_v51, %v5273_v51 }
 0x40a   : > { %5745 = vmatprep.mubr.bf16.mxu1 %v5279_v16 }
 0x40b   : > { %v5175_v28 = vpop.f32.mrf.mxu1  ;;  %5746 = vmatmul.mubr.bf16.vlgmr.msra.gmra.mxu1 %v5278_v24 }
 0x40c   : > { %v5176_v63 = vadd.f32 %v5175_v28, %v8617_v30  ;;  %6839 = vmatpush3.bf16.msra.mxu1 %v7940_v57  ;;  %v7941_v30 = vld [vmem:[#allocation15 + $0x30] sm:$0xff]   ;;  %6854 = vmatprep.mubr.msk.bf16.mxu1 %vm8256_vm1, %v8255_v14 }
 0x40d   : > { %v5177_v29 = vpop.f32.mrf.mxu1  ;;  %6840 = vmatprep.subr.bf16.mxu1 %v8255_v14 }
 0x40e   : > { %v5178_v10 = vadd.f32 %v5177_v29, %v8622_v31 }
 0x40f   : > { %v5179_v56 = vpop.f32.mrf.mxu1 }
 0x410   : > { %6841 = vmatpush3.bf16.msra.mxu1 %v7941_v30 }
 0x411   : > { %v5180_v48 = vpop.f32.mrf.mxu1  ;;  %6842 = vmatprep.subr.bf16.mxu1 %v8255_v14 }
 0x414   : > { %6843 = vmatpush3.bf16.msra.mxu1 %v7942_v17 }
 0x415   : > { %6844 = vmatprep.subr.bf16.mxu1 %v8255_v14 }
 0x43f   : > { %v5216_v58 = vpop.f32.mrf.mxu0 }
 0x440   : > { %v5217_v4 = vadd.f32 %v5216_v58, %v5176_v63 }
 0x441   : > { %v5218_v59 = vpop.f32.mrf.mxu0 }
 0x442   : > { %v5219_v60 = vadd.f32 %v5218_v59, %v5178_v10 }
 0x443   : > { %v5220_v1 = vpop.f32.mrf.mxu0 }
 0x445   : > { %v5221_v7 = vpop.f32.mrf.mxu0 }
 0x44b   : > { %v5257_v62 = vpop.f32.mrf.mxu1 }
 0x44c   : > { %v5258_v25 = vadd.f32 %v5257_v62, %v5217_v4 }
 0x44d   : > { %v5259_v52 = vpop.f32.mrf.mxu1 }
 0x44e   : > { %v5268_v32 = vmax.f32 %v8634_v50, %v5258_v25  ;;  %v5260_v2 = vadd.f32 %v5259_v52, %v5219_v60  ;;  %v7943_v50 = vld [vmem:[#allocation15 + $0x20] sm:$0xff]  }
 0x44f   : > { %v5261_v41 = vpop.f32.mrf.mxu1  ;;  %6845 = vmatpush3.bf16.msra.mxu1 %v7943_v50 }
 0x450   : > { %v5269_v6 = vmax.f32 %v8638_v53, %v5260_v2  ;;  %v5274_v8 = vmax.f32 %v5268_v32, 0.0  ;;  %6846 = vmatprep.subr.bf16.mxu1 %v8255_v14 }
 0x451   : > { %v5262_v12 = vpop.f32.mrf.mxu1 }
 0x452   : > { %v5275_v13 = vmax.f32 %v5269_v6, 0.0  ;;  %v5280_v15 = vpack.c.bf16 %v5274_v8, %v5274_v8 }
 0x453   : > { %6847 = vmatpush3.bf16.msra.mxu1 %v7944_v18 }
 0x454   : > { %v5281_v31 = vpack.c.bf16 %v5275_v13, %v5275_v13  ;;  %6848 = vmatprep.subr.bf16.mxu1 %v8255_v14 }
 0x456   : > { %5785 = vmatprep.mubr.bf16.mxu0 %v5281_v31 }
 0x457   : > { %5786 = vmatmul.mubr.bf16.vlgmr.msra.gmra.mxu0 %v5280_v15  ;;  %6849 = vmatpush3.bf16.msra.mxu1 %v7945_v22 }
 0x458   : > { %6850 = vmatprep.subr.bf16.mxu1 %v8255_v14 }
 0x45b   : > { %6851 = vmatpush3.bf16.msra.mxu1 %v7946_v23 }
 0x45c   : > { %6852 = vmatprep.subr.bf16.mxu1 %v8255_v14 }
 0x45f   : > { %v6779_v53 = vpop.f32.mrf.mxu0  ;;  %6853 = vmatpush3.bf16.msra.mxu1 %v7947_v26 }
 0x461   : > { %v6780_v19 = vpop.f32.mrf.mxu0 }
 0x462   : > { %v6781_v20 = vadd.f32 %v6780_v19, %v6779_v53 }
 0x463   : > { %v6782_v54 = vpop.f32.mrf.mxu0 }
 0x464   : > { %v5708_v34 = vadd.f32 %v6781_v20, %v6703_v27 }
 0x465   : > { %v6783_v0 = vpop.f32.mrf.mxu0 }
 0x4cb   : > { %v6801_v33 = vpop.f32.mrf.mxu1 }
 0x4cd   : > { %v6802_v55 = vpop.f32.mrf.mxu1 }
 0x4ce   : > { %v6803_v36 = vadd.f32 %v6802_v55, %v6801_v33 }
 0x4cf   : > { %v6804_v37 = vpop.f32.mrf.mxu1 }
 0x4d0   : > { %v5748_v5 = vadd.f32 %v6803_v36, %v5708_v34 }
 0x4d1   : > { %v6805_v38 = vpop.f32.mrf.mxu1 }
 0x517   : > { %v6823_v49 = vpop.f32.mrf.mxu0 }
 0x519   : > { %v6824_v43 = vpop.f32.mrf.mxu0 }
 0x51a   : > { %v6825_v9 = vadd.f32 %v6824_v43, %v6823_v49 }
 0x51b   : > { %v6826_v35 = vpop.f32.mrf.mxu0 }
 0x51c   : > { %v5788_v39 = vadd.f32 %v6825_v9, %v5748_v5 }
 0x51d   : > { %v6827_v42 = vpop.f32.mrf.mxu0 }
 0x51e   : > { %v5793_v3 = vmax.f32 %v5788_v39, 0.0 }
 0x520   : > { %v5794_v40 = vpack.c.bf16 %v5793_v3, %v5793_v3 }
 0x522   : > { %6855 = vmatmul.mubr.bf16.vlgmr.msra.gmra.mxu1 %v5794_v40 }
 0x5e2   : > { %v5900_v46 = vpop.f32.mrf.mxu1 }
 0x5e3   : > { %v5901_v21 = vadd.f32 %v6752_v45, %v5900_v46 }
 0x5e4   : > { %v6856_v47 = vpop.f32.mrf.mxu1 }
 0x5e5   : > { %5906 = vst [vmem:[%s519_s13] sm:$0xff] %v5901_v21 }
 0x5e6   : > { %v5903_v44 = vpop.f32.mrf.mxu1 }
 0x5e8   : > { %v6857_v11 = vpop.f32.mrf.mxu1 }
 0x5e9 PF: > { %s27_s17 = sadd.s32 1, %s8238_s17  }
 0x5ea   : > { %p24_p4 = scmp.ge.s32.totalorder %s27_s17, 4  }
 0x5ec   :  { %26 = sbr.rel (!%p24_p4) target bundleno = 6 (0x6), region = 135 }
 0x5f1   :  { %5926 = vsyncpa [#allocation3], 1 }
 0x5f2   :  { %5928 = vsyncpa [#allocation3 + $0x1], 1 }
 0x5f3   :  { %5929 = vsyncpa [#allocation5], 1 }
 0x5f4   :  { %5930 = vsyncpa [#allocation8], 1 }
 0x5f5   :  { %5931 = vsyncpa [#allocation11], 1 }
 0x5f6   :  { %5932 = vsyncpa [#allocation14], 1 }
 0x5f7   :  { %5933 = vsyncpa [#allocation17], 1 }

</bundles_post_ra>
